<compile_context>
chip_gen: v7x
topology: tpu7x:2x2x1
jax: 0.10.0
libtpu: 0.0.40
codegen_flags: <defaults>
</compile_context>

<pallas_src>
import functools

import jax
import jax.numpy as jnp
from jax import lax
from jax.experimental import pallas as pl
from jax.experimental.pallas import tpu as pltpu


def _round_up(x, m):
    return (x + m - 1) // m * m


def _dot_bf16(x, w_ref):
    # MXU matmul: bf16 operands, f32 accumulation.
    return jnp.dot(x.astype(jnp.bfloat16), w_ref[...],
                   preferred_element_type=jnp.float32)


# ----------------------------------------------------------------------------
# Pallas kernel A: fused (FC_layer_cla + sigmoid) and (vote_layer + residual),
# with both branches merged into a single 3-layer MLP via block-diagonal
# weights built in the wrapper.  Rows = B*N (batch folded into the MXU M dim),
# tiled over the row dimension.
# Output packed layout: [vote_xyz(3) | vote_feat(F) | score(1) | cla(1) | pad].
# ----------------------------------------------------------------------------
def _cla_vote_fused(x_packed, w1, b1, w2, b2, w3, b3, *, wpad, tm):
    r_pad, cin = x_packed.shape
    assert r_pad % tm == 0
    two_h = w1.shape[1]
    grid = (r_pad // tm,)

    def kernel(x_ref, w1_ref, b1_ref, w2_ref, b2_ref, w3_ref, b3_ref, o_ref):
        x = x_ref[...].astype(jnp.float32)                      # (tm, cin)
        h = jnp.maximum(_dot_bf16(x, w1_ref) + b1_ref[...], 0.0)
        h = jnp.maximum(_dot_bf16(h, w2_ref) + b2_ref[...], 0.0)
        y = _dot_bf16(h, w3_ref) + b3_ref[...]                  # (tm, wpad)
        # residual over the first `cin` lanes; score/cla/pad lanes get +0
        res = jnp.concatenate(
            [x, jnp.zeros((tm, wpad - cin), jnp.float32)], axis=-1)
        y = y + res
        # sigmoid only on the score lane (lane == cin) via a lane mask
        lane = lax.broadcasted_iota(jnp.int32, y.shape, 1)
        y = jnp.where(lane == cin, jax.nn.sigmoid(y), y)
        o_ref[...] = y.astype(o_ref.dtype)                      # full-width store

    weight_args = (w1.astype(jnp.bfloat16), b1,
                   w2.astype(jnp.bfloat16), b2,
                   w3.astype(jnp.bfloat16), b3)

    in_specs = [pl.BlockSpec((tm, cin), lambda i: (i, 0))]
    in_specs += [pl.BlockSpec(a.shape, lambda i: (0, 0)) for a in weight_args]

    flops = 2 * r_pad * (cin * two_h + two_h * two_h + two_h * wpad)
    bytes_accessed = 4 * r_pad * (cin + wpad) + sum(2 * a.size for a in weight_args)

    return pl.pallas_call(
        kernel,
        out_shape=jax.ShapeDtypeStruct((r_pad, wpad), jnp.float32),
        grid=grid,
        in_specs=in_specs,
        out_specs=pl.BlockSpec((tm, wpad), lambda i: (i, 0)),
        compiler_params=pltpu.CompilerParams(
            dimension_semantics=("parallel",),
            vmem_limit_bytes=48 * 1024 * 1024),
        cost_estimate=pl.CostEstimate(
            flops=int(flops),
            transcendentals=int(r_pad * wpad),
            bytes_accessed=int(bytes_accessed)),
    )(x_packed, *weight_args)


# ----------------------------------------------------------------------------
# Pallas kernel B: fused SA shared-MLP (with in-kernel recentering) + max-pool
# over nsample + FC_proposal + center add.  Grouped rows are ordered (b, m, s)
# so each grid step owns `g` whole proposals and the pool is block-local.
# ----------------------------------------------------------------------------
def _sa_prop_fused(grouped, centers, sw1_xyz, sa_w, prop_w, *, nsample, g, ppad):
    rows, cg = grouped.shape
    bm_pad = centers.shape[0]
    assert rows == bm_pad * nsample and bm_pad % g == 0
    sw1, sb1, sw2, sb2, sw3, sb3 = sa_w
    pw1, pb1, pw2, pb2, pw3p, pb3p = prop_w
    V = sw1.shape[1]
    gs = g * nsample
    grid = (bm_pad // g,)

    def kernel(g_ref, c_ref, sxyz_ref,
               sw1_ref, sb1_ref, sw2_ref, sb2_ref, sw3_ref, sb3_ref,
               pw1_ref, pb1_ref, pw2_ref, pb2_ref, pw3_ref, pb3_ref,
               o_ref):
        x = g_ref[...].astype(jnp.float32)                      # (gs, cg)
        ctr = c_ref[...].astype(jnp.float32)                    # (g, 3)

        # layer 1 with in-kernel recentering:
        #   ((x_xyz - ctr) | feats) @ W1  ==  x @ W1 - ctr @ W1[:3, :]
        pre = _dot_bf16(x, sw1_ref)                             # (gs, V)
        corr = _dot_bf16(ctr, sxyz_ref)                         # (g, V)
        pre = (pre.reshape(g, nsample, V) - corr[:, None, :]).reshape(gs, V)
        h = jnp.maximum(pre + sb1_ref[...], 0.0)
        h = jnp.maximum(_dot_bf16(h, sw2_ref) + sb2_ref[...], 0.0)
        h = jnp.maximum(_dot_bf16(h, sw3_ref) + sb3_ref[...], 0.0)
        # max-pool over nsample (groups contiguous, nsample multiple of 8)
        pooled = jnp.max(h.reshape(g, nsample, V), axis=1)      # (g, V)
        p = jnp.maximum(_dot_bf16(pooled, pw1_ref) + pb1_ref[...], 0.0)
        p = jnp.maximum(_dot_bf16(p, pw2_ref) + pb2_ref[...], 0.0)
        out = _dot_bf16(p, pw3_ref) + pb3_ref[...]              # (g, ppad)
        # add proposal centers onto the xyz offsets (lanes 0:3)
        ctr_wide = jnp.concatenate(
            [ctr, jnp.zeros((g, ppad - 3), jnp.float32)], axis=-1)
        o_ref[...] = (out + ctr_wide).astype(o_ref.dtype)

    bf = lambda w: w.astype(jnp.bfloat16)
    weight_args = (bf(sw1_xyz), bf(sw1), sb1, bf(sw2), sb2, bf(sw3), sb3,
                   bf(pw1), pb1, bf(pw2), pb2, bf(pw3p), pb3p)

    in_specs = [pl.BlockSpec((gs, cg), lambda i: (i, 0)),
                pl.BlockSpec((g, 3), lambda i: (i, 0))]
    in_specs += [pl.BlockSpec(a.shape, lambda i: (0, 0)) for a in weight_args]

    flops = 2 * (rows * (cg * V + 2 * V * V)
                 + bm_pad * (2 * V * V + V * ppad))
    bytes_accessed = 4 * (rows * cg + bm_pad * (3 + ppad)) \
        + sum(2 * a.size for a in weight_args)

    return pl.pallas_call(
        kernel,
        out_shape=jax.ShapeDtypeStruct((bm_pad, ppad), jnp.float32),
        grid=grid,
        in_specs=in_specs,
        out_specs=pl.BlockSpec((g, ppad), lambda i: (i, 0)),
        compiler_params=pltpu.CompilerParams(
            dimension_semantics=("parallel",),
            vmem_limit_bytes=48 * 1024 * 1024),
        cost_estimate=pl.CostEstimate(
            flops=int(flops), transcendentals=0,
            bytes_accessed=int(bytes_accessed)),
    )(grouped, centers, *weight_args)


# ----------------------------------------------------------------------------
# Plain-JAX helpers for the data-dependent parts of PointnetSAModule.
# TODO(synk): furthest-point-sampling and ball-query index selection are
# inherently sequential / gather-heavy; kept in plain JAX (they are the real
# bottleneck at production N — a VMEM-resident Pallas FPS kernel would help).
# ----------------------------------------------------------------------------
def _furthest_point_sample(points, npoint):
    # points: (N, 3) -> (npoint,) int32 indices; matches pointnet2 FPS.
    N = points.shape[0]

    def body(i, state):
        dists, idxs, last = state
        d = jnp.sum((points - points[last]) ** 2, axis=-1)
        dists = jnp.minimum(dists, d)
        nxt = jnp.argmax(dists).astype(jnp.int32)
        idxs = idxs.at[i].set(nxt)
        return dists, idxs, nxt

    dists0 = jnp.full((N,), 1e10, jnp.float32)
    idxs0 = jnp.zeros((npoint,), jnp.int32)
    _, idxs, _ = lax.fori_loop(1, npoint, body, (dists0, idxs0, jnp.int32(0)))
    return idxs


def _ball_query_one(query, points, radius, nsample):
    # query: (3,), points: (N, 3) -> (nsample,) int32; reproduces pointnet2
    # ball_query: first `nsample` in-radius points, padded with the first hit.
    N = points.shape[0]
    d2 = jnp.sum((points - query) ** 2, axis=-1)
    mask = d2 < radius * radius
    ranks = jnp.cumsum(mask.astype(jnp.int32)) - 1
    slot = jnp.where(mask & (ranks < nsample), ranks, nsample)
    slots = jnp.zeros((nsample + 1,), jnp.int32).at[slot].set(
        jnp.arange(N, dtype=jnp.int32))
    count = jnp.sum(mask.astype(jnp.int32))
    first = jnp.argmax(mask).astype(jnp.int32)
    fill = jnp.where(count > 0, first, jnp.int32(0))
    return jnp.where(jnp.arange(nsample) < count, slots[:nsample], fill)


# ----------------------------------------------------------------------------
# Full forward pass (mirrors P2BVoteNetRPN.forward).
# ----------------------------------------------------------------------------
def p2b_votenet_rpn_forward(xyz, feature, params, *, num_proposal, nsample,
                            radius, normalize_xyz=False, row_tile=512):
    B, N, _ = xyz.shape
    F = feature.shape[1]
    M = num_proposal
    cin = 3 + F

    feat_cl = jnp.transpose(feature, (0, 2, 1))                  # (B, N, F)
    x_packed = jnp.concatenate([xyz, feat_cl], axis=-1).reshape(B * N, cin)

    # ---- wrapper-side fusion of cla + vote branches into one 3-layer MLP ---
    cw1, cb1, cw2, cb2, cw3, cb3 = params["cla"]
    vw1, vb1, vw2, vb2, vw3, vb3 = params["vote"]
    H = cw1.shape[1]                                             # feature_channel
    wpad = _round_up(cin + 2, 128)                               # lane-dense width

    W1 = jnp.zeros((cin, 2 * H), jnp.float32)
    W1 = W1.at[:, :H].set(vw1).at[3:, H:].set(cw1)               # cla sees no xyz
    b1 = jnp.concatenate([vb1, cb1], axis=-1)
    W2 = jnp.zeros((2 * H, 2 * H), jnp.float32)
    W2 = W2.at[:H, :H].set(vw2).at[H:, H:].set(cw2)              # block-diagonal
    b2 = jnp.concatenate([vb2, cb2], axis=-1)
    W3 = jnp.zeros((2 * H, wpad), jnp.float32)
    W3 = W3.at[:H, :cin].set(vw3)                                # vote offsets
    W3 = W3.at[H:, cin].set(cw3[:, 0]).at[H:, cin + 1].set(cw3[:, 0])
    b3 = jnp.zeros((1, wpad), jnp.float32)
    b3 = b3.at[:, :cin].set(vb3).at[:, cin].set(cb3[0, 0]).at[:, cin + 1].set(cb3[0, 0])

    # ---- kernel A: row-tiled fused cla + sigmoid + vote --------------------
    R = B * N
    tm = min(row_tile, _round_up(R, 8))
    r_pad = _round_up(R, tm)
    if r_pad != R:
        x_packed = jnp.pad(x_packed, ((0, r_pad - R), (0, 0)))
    packed = _cla_vote_fused(x_packed, W1, b1, W2, b2, W3, b3,
                             wpad=wpad, tm=tm)[:R].reshape(B, N, wpad)

    vote_xyz = packed[..., 0:3]                                  # (B, N, 3)
    estimation_cla = packed[..., cin + 1]                        # (B, N)
    votes_pack = packed[..., :cin + 1]                           # [xyz|feat|score]

    # ---- vote_aggregation = PointnetSAModule(radius, nsample, use_xyz) -----
    fps_idx = jax.vmap(lambda pts: _furthest_point_sample(pts, M))(vote_xyz)
    gather = jax.vmap(lambda a, i: a[i])
    center_xyzs = gather(vote_xyz, fps_idx)                      # (B, M, 3)

    bq = jax.vmap(jax.vmap(_ball_query_one, in_axes=(0, None, None, None)),
                  in_axes=(0, 0, None, None))
    idx = bq(center_xyzs, vote_xyz, radius, nsample)             # (B, M, ns)

    # single XLA gather of packed rows; recentering + normalize happen IN
    # kernel B (rank-correction / folded weights), so no (B,M,ns,4+F) HBM
    # elementwise pass here.
    gathered = gather(votes_pack, idx)                           # (B, M, ns, 4+F)
    grouped_flat = gathered.reshape(B * M * nsample, cin + 1)    # (b,m,s) order
    centers_flat = center_xyzs.reshape(B * M, 3)

    # ---- SA / proposal weight prep (row-permute to packed layout) ----------
    sw1, sb1, sw2, sb2, sw3, sb3 = params["sa"]
    # original row order (use_xyz=True): [rel_xyz(3) | score(1) | feat(F)];
    # permute to grouped layout [rel_xyz(3) | feat(F) | score(1)].
    sw1p = jnp.concatenate([sw1[:3], sw1[4:4 + F], sw1[3:4]], axis=0)
    if normalize_xyz:
        sw1p = sw1p.at[:3].multiply(1.0 / radius)   # fold /radius into weights
    sw1_xyz = sw1p[:3]

    pw1, pb1, pw2, pb2, pw3, pb3 = params["prop"]
    V = sw1.shape[1]
    ppad = 128
    pw3p = jnp.zeros((V, ppad), pw3.dtype).at[:, :5].set(pw3)
    pb3p = jnp.zeros((1, ppad), pb3.dtype).at[:, :5].set(pb3)

    # ---- kernel B: tiled over proposal groups ------------------------------
    assert nsample % 8 == 0, "tile-aligned pooling assumes nsample % 8 == 0"
    BM = B * M
    g = min(BM, max(1, 512 // max(nsample, 1)))      # ~512 grouped rows / step
    if g < BM:
        g = max(8, (g // 8) * 8)                     # keep blocks 8-aligned
    bm_pad = _round_up(BM, g)
    if bm_pad != BM:
        grouped_flat = jnp.pad(grouped_flat,
                               ((0, (bm_pad - BM) * nsample), (0, 0)))
        centers_flat = jnp.pad(centers_flat, ((0, bm_pad - BM), (0, 0)))

    boxes = _sa_prop_fused(grouped_flat, centers_flat, sw1_xyz,
                           (sw1p, sb1, sw2, sb2, sw3, sb3),
                           (pw1, pb1, pw2, pb2, pw3p, pb3p),
                           nsample=nsample, g=g, ppad=ppad)
    estimation_boxes = boxes[:BM, 0:5].reshape(B, M, 5)

    return estimation_boxes, estimation_cla, vote_xyz, center_xyzs


# ----------------------------------------------------------------------------
# Deterministic parameter init (BatchNorm folded into weight/bias).
# ----------------------------------------------------------------------------
def _init_linear(key, cin, cout):
    kw, kb = jax.random.split(key)
    w = jax.random.normal(kw, (cin, cout), jnp.float32) * (1.0 / (cin ** 0.5))
    b = jax.random.normal(kb, (1, cout), jnp.float32) * 0.01
    return w, b


def init_params(key, feature_channel, vote_channel):
    F, V = feature_channel, vote_channel
    dims = {
        "cla":  [(F, F), (F, F), (F, 1)],
        "vote": [(3 + F, F), (F, F), (F, 3 + F)],
        "sa":   [(3 + 1 + F, V), (V, V), (V, V)],   # use_xyz=True adds +3
        "prop": [(V, V), (V, V), (V, 5)],
    }
    params = {}
    keys = jax.random.split(key, len(dims))
    for (name, layer_dims), k in zip(dims.items(), keys):
        lks = jax.random.split(k, len(layer_dims))
        flat = []
        for (c_in, c_out), lk in zip(layer_dims, lks):
            w, b = _init_linear(lk, c_in, c_out)
            flat.extend([w, b])
        params[name] = tuple(flat)
    return params


if __name__ == "__main__":
    B, N, FC = 2, 64, 32                       # batch, num points, feature_channel
    VOTE_C, M, NS, RADIUS = 64, 16, 16, 0.3    # vote_channel, num_proposal, nsample, radius

    key = jax.random.PRNGKey(0)
    k1, k2, kp = jax.random.split(key, 3)
    xyz = jax.random.uniform(k1, (B, N, 3), jnp.float32, minval=-1.0, maxval=1.0)
    feature = jax.random.normal(k2, (B, FC, N), jnp.float32)
    params = init_params(kp, FC, VOTE_C)

    forward = jax.jit(functools.partial(
        p2b_votenet_rpn_forward, num_proposal=M, nsample=NS, radius=RADIUS,
        normalize_xyz=False))

    outs = jax.block_until_ready(forward(xyz, feature, params))
    est_boxes, est_cla, vote_xyz, center_xyzs = outs

    assert est_boxes.shape == (B, M, 5)
    assert est_cla.shape == (B, N)
    assert vote_xyz.shape == (B, N, 3)
    assert center_xyzs.shape == (B, M, 3)
    assert all(bool(jnp.isfinite(o).all()) for o in outs)
    print("KERNEL_OK")
</pallas_src>

<mosaic_0001>
module attributes {stable_mosaic.version = 11 : i64} {
  func.func @kernel(%arg0: i32, %arg1: memref<128x35xf32, #tpu.memory_space<vmem>>, %arg2: memref<35x64xbf16, #tpu.memory_space<vmem>>, %arg3: memref<1x64xf32, #tpu.memory_space<vmem>>, %arg4: memref<64x64xbf16, #tpu.memory_space<vmem>>, %arg5: memref<1x64xf32, #tpu.memory_space<vmem>>, %arg6: memref<64x128xbf16, #tpu.memory_space<vmem>>, %arg7: memref<1x128xf32, #tpu.memory_space<vmem>>, %arg8: memref<128x128xf32, #tpu.memory_space<vmem>>) attributes {dimension_semantics = [#tpu.dimension_semantics<parallel>], iteration_bounds = array<i64: 1>, scalar_prefetch = 0 : i64, scratch_operands = 0 : i64, tpu.core_type = #tpu.core_type<tc>, window_params = [{transform_indices = @transform_0, window_bounds = array<i64: 128, 35>}, {pipeline_mode = #tpu.pipeline_mode<synchronous>, transform_indices = @transform_1, window_bounds = array<i64: 35, 64>}, {pipeline_mode = #tpu.pipeline_mode<synchronous>, transform_indices = @transform_2, window_bounds = array<i64: 1, 64>}, {pipeline_mode = #tpu.pipeline_mode<synchronous>, transform_indices = @transform_3, window_bounds = array<i64: 64, 64>}, {pipeline_mode = #tpu.pipeline_mode<synchronous>, transform_indices = @transform_4, window_bounds = array<i64: 1, 64>}, {pipeline_mode = #tpu.pipeline_mode<synchronous>, transform_indices = @transform_5, window_bounds = array<i64: 64, 128>}, {pipeline_mode = #tpu.pipeline_mode<synchronous>, transform_indices = @transform_6, window_bounds = array<i64: 1, 128>}, {transform_indices = @transform_7, window_bounds = array<i64: 128, 128>}]} {
    %c0 = arith.constant 0 : index
    %c0_0 = arith.constant 0 : index
    %0 = vector.load %arg1[%c0, %c0_0] : memref<128x35xf32, #tpu.memory_space<vmem>>, vector<128x35xf32>
    %1 = arith.truncf %0 : vector<128x35xf32> to vector<128x35xbf16>
    %c0_1 = arith.constant 0 : index
    %c0_2 = arith.constant 0 : index
    %2 = vector.load %arg2[%c0_1, %c0_2] : memref<35x64xbf16, #tpu.memory_space<vmem>>, vector<35x64xbf16>
    %cst = arith.constant dense<0.000000e+00> : vector<128x64xf32>
    %3 = tpu.matmul %1, %2, %cst {dimension_numbers = #tpu.dot_dimension_numbers<[1], [0], [0], [1], [0, 0, 1, 1], [], []>} : vector<128x35xbf16>, vector<35x64xbf16>, vector<128x64xf32> -> vector<128x64xf32>
    %c0_3 = arith.constant 0 : index
    %c0_4 = arith.constant 0 : index
    %4 = vector.load %arg3[%c0_3, %c0_4] : memref<1x64xf32, #tpu.memory_space<vmem>>, vector<1x64xf32>
    %5 = vector.broadcast %4 : vector<1x64xf32> to vector<128x64xf32>
    %6 = arith.addf %3, %5 : vector<128x64xf32>
    %cst_5 = arith.constant 0.000000e+00 : f32
    %7 = vector.broadcast %cst_5 : f32 to vector<128x64xf32>
    %8 = arith.maximumf %6, %7 : vector<128x64xf32>
    %9 = arith.truncf %8 : vector<128x64xf32> to vector<128x64xbf16>
    %c0_6 = arith.constant 0 : index
    %c0_7 = arith.constant 0 : index
    %10 = vector.load %arg4[%c0_6, %c0_7] : memref<64x64xbf16, #tpu.memory_space<vmem>>, vector<64x64xbf16>
    %cst_8 = arith.constant dense<0.000000e+00> : vector<128x64xf32>
    %11 = tpu.matmul %9, %10, %cst_8 {dimension_numbers = #tpu.dot_dimension_numbers<[1], [0], [0], [1], [0, 0, 1, 1], [], []>} : vector<128x64xbf16>, vector<64x64xbf16>, vector<128x64xf32> -> vector<128x64xf32>
    %c0_9 = arith.constant 0 : index
    %c0_10 = arith.constant 0 : index
    %12 = vector.load %arg5[%c0_9, %c0_10] : memref<1x64xf32, #tpu.memory_space<vmem>>, vector<1x64xf32>
    %13 = vector.broadcast %12 : vector<1x64xf32> to vector<128x64xf32>
    %14 = arith.addf %11, %13 : vector<128x64xf32>
    %cst_11 = arith.constant 0.000000e+00 : f32
    %15 = vector.broadcast %cst_11 : f32 to vector<128x64xf32>
    %16 = arith.maximumf %14, %15 : vector<128x64xf32>
    %17 = arith.truncf %16 : vector<128x64xf32> to vector<128x64xbf16>
    %c0_12 = arith.constant 0 : index
    %c0_13 = arith.constant 0 : index
    %18 = vector.load %arg6[%c0_12, %c0_13] : memref<64x128xbf16, #tpu.memory_space<vmem>>, vector<64x128xbf16>
    %cst_14 = arith.constant dense<0.000000e+00> : vector<128x128xf32>
    %19 = tpu.matmul %17, %18, %cst_14 {dimension_numbers = #tpu.dot_dimension_numbers<[1], [0], [0], [1], [0, 0, 1, 1], [], []>} : vector<128x64xbf16>, vector<64x128xbf16>, vector<128x128xf32> -> vector<128x128xf32>
    %c0_15 = arith.constant 0 : index
    %c0_16 = arith.constant 0 : index
    %20 = vector.load %arg7[%c0_15, %c0_16] : memref<1x128xf32, #tpu.memory_space<vmem>>, vector<1x128xf32>
    %21 = vector.broadcast %20 : vector<1x128xf32> to vector<128x128xf32>
    %22 = arith.addf %19, %21 : vector<128x128xf32>
    %cst_17 = arith.constant 0.000000e+00 : f32
    %23 = vector.broadcast %cst_17 : f32 to vector<128x93xf32>
    %24 = tpu.concatenate %0, %23 in 1 : vector<128x35xf32>, vector<128x93xf32> -> vector<128x128xf32>
    %25 = arith.addf %22, %24 : vector<128x128xf32>
    %26 = tpu.iota {dimensions = array<i32: 1>} : vector<128x128xi32>
    %c35_i32 = arith.constant 35 : i32
    %27 = vector.broadcast %c35_i32 : i32 to vector<128x128xi32>
    %28 = arith.cmpi eq, %26, %27 : vector<128x128xi32>
    %29 = arith.negf %25 : vector<128x128xf32>
    %30 = math.exp %29 : vector<128x128xf32>
    %cst_18 = arith.constant 1.000000e+00 : f32
    %31 = vector.broadcast %cst_18 : f32 to vector<128x128xf32>
    %32 = arith.addf %31, %30 : vector<128x128xf32>
    %33 = arith.divf %31, %32 : vector<128x128xf32>
    %34 = arith.select %28, %33, %25 : vector<128x128xi1>, vector<128x128xf32>
    %c0_19 = arith.constant 0 : index
    %c0_20 = arith.constant 0 : index
    %35 = vector.load %arg8[%c0_19, %c0_20] : memref<128x128xf32, #tpu.memory_space<vmem>>, vector<128x128xf32>
    tpu.vector_store %arg8[%c0_19, %c0_20], %34 {strides = array<i32>} : memref<128x128xf32, #tpu.memory_space<vmem>>, vector<128x128xf32>,
    return
  }
  func.func @transform_0(%arg0: i32) -> (i32, i32) {
    %c0_i32 = arith.constant 0 : i32
    %c0_i32_0 = arith.constant 0 : i32
    return %arg0, %c0_i32 : i32, i32
  }
  func.func @transform_1(%arg0: i32) -> (i32, i32) {
    %c0_i32 = arith.constant 0 : i32
    %c0_i32_0 = arith.constant 0 : i32
    %c0_i32_1 = arith.constant 0 : i32
    return %c0_i32, %c0_i32_0 : i32, i32
  }
  func.func @transform_2(%arg0: i32) -> (i32, i32) {
    %c0_i32 = arith.constant 0 : i32
    %c0_i32_0 = arith.constant 0 : i32
    %c0_i32_1 = arith.constant 0 : i32
    return %c0_i32, %c0_i32_0 : i32, i32
  }
  func.func @transform_3(%arg0: i32) -> (i32, i32) {
    %c0_i32 = arith.constant 0 : i32
    %c0_i32_0 = arith.constant 0 : i32
    %c0_i32_1 = arith.constant 0 : i32
    return %c0_i32, %c0_i32_0 : i32, i32
  }
  func.func @transform_4(%arg0: i32) -> (i32, i32) {
    %c0_i32 = arith.constant 0 : i32
    %c0_i32_0 = arith.constant 0 : i32
    %c0_i32_1 = arith.constant 0 : i32
    return %c0_i32, %c0_i32_0 : i32, i32
  }
  func.func @transform_5(%arg0: i32) -> (i32, i32) {
    %c0_i32 = arith.constant 0 : i32
    %c0_i32_0 = arith.constant 0 : i32
    %c0_i32_1 = arith.constant 0 : i32
    return %c0_i32, %c0_i32_0 : i32, i32
  }
  func.func @transform_6(%arg0: i32) -> (i32, i32) {
    %c0_i32 = arith.constant 0 : i32
    %c0_i32_0 = arith.constant 0 : i32
    %c0_i32_1 = arith.constant 0 : i32
    return %c0_i32, %c0_i32_0 : i32, i32
  }
  func.func @transform_7(%arg0: i32) -> (i32, i32) {
    %c0_i32 = arith.constant 0 : i32
    %c0_i32_0 = arith.constant 0 : i32
    return %arg0, %c0_i32 : i32, i32
  }
}

module attributes {stable_mosaic.version = 11 : i64} {
  func.func @kernel(%arg0: i32, %arg1: memref<512x36xf32, #tpu.memory_space<vmem>>, %arg2: memref<32x3xf32, #tpu.memory_space<vmem>>, %arg3: memref<3x64xbf16, #tpu.memory_space<vmem>>, %arg4: memref<36x64xbf16, #tpu.memory_space<vmem>>, %arg5: memref<1x64xf32, #tpu.memory_space<vmem>>, %arg6: memref<64x64xbf16, #tpu.memory_space<vmem>>, %arg7: memref<1x64xf32, #tpu.memory_space<vmem>>, %arg8: memref<64x64xbf16, #tpu.memory_space<vmem>>, %arg9: memref<1x64xf32, #tpu.memory_space<vmem>>, %arg10: memref<64x64xbf16, #tpu.memory_space<vmem>>, %arg11: memref<1x64xf32, #tpu.memory_space<vmem>>, %arg12: memref<64x64xbf16, #tpu.memory_space<vmem>>, %arg13: memref<1x64xf32, #tpu.memory_space<vmem>>, %arg14: memref<64x128xbf16, #tpu.memory_space<vmem>>, %arg15: memref<1x128xf32, #tpu.memory_space<vmem>>, %arg16: memref<32x128xf32, #tpu.memory_space<vmem>>) attributes {dimension_semantics = [#tpu.dimension_semantics<parallel>], iteration_bounds = array<i64: 1>, scalar_prefetch = 0 : i64, scratch_operands = 0 : i64, tpu.core_type = #tpu.core_type<tc>, window_params = [{transform_indices = @transform_0, window_bounds = array<i64: 512, 36>}, {transform_indices = @transform_1, window_bounds = array<i64: 32, 3>}, {pipeline_mode = #tpu.pipeline_mode<synchronous>, transform_indices = @transform_2, window_bounds = array<i64: 3, 64>}, {pipeline_mode = #tpu.pipeline_mode<synchronous>, transform_indices = @transform_3, window_bounds = array<i64: 36, 64>}, {pipeline_mode = #tpu.pipeline_mode<synchronous>, transform_indices = @transform_4, window_bounds = array<i64: 1, 64>}, {pipeline_mode = #tpu.pipeline_mode<synchronous>, transform_indices = @transform_5, window_bounds = array<i64: 64, 64>}, {pipeline_mode = #tpu.pipeline_mode<synchronous>, transform_indices = @transform_6, window_bounds = array<i64: 1, 64>}, {pipeline_mode = #tpu.pipeline_mode<synchronous>, transform_indices = @transform_7, window_bounds = array<i64: 64, 64>}, {pipeline_mode = #tpu.pipeline_mode<synchronous>, transform_indices = @transform_8, window_bounds = array<i64: 1, 64>}, {pipeline_mode = #tpu.pipeline_mode<synchronous>, transform_indices = @transform_9, window_bounds = array<i64: 64, 64>}, {pipeline_mode = #tpu.pipeline_mode<synchronous>, transform_indices = @transform_10, window_bounds = array<i64: 1, 64>}, {pipeline_mode = #tpu.pipeline_mode<synchronous>, transform_indices = @transform_11, window_bounds = array<i64: 64, 64>}, {pipeline_mode = #tpu.pipeline_mode<synchronous>, transform_indices = @transform_12, window_bounds = array<i64: 1, 64>}, {pipeline_mode = #tpu.pipeline_mode<synchronous>, transform_indices = @transform_13, window_bounds = array<i64: 64, 128>}, {pipeline_mode = #tpu.pipeline_mode<synchronous>, transform_indices = @transform_14, window_bounds = array<i64: 1, 128>}, {transform_indices = @transform_15, window_bounds = array<i64: 32, 128>}]} {
    %c0 = arith.constant 0 : index
    %c0_0 = arith.constant 0 : index
    %0 = vector.load %arg1[%c0, %c0_0] : memref<512x36xf32, #tpu.memory_space<vmem>>, vector<512x36xf32>
    %c0_1 = arith.constant 0 : index
    %c0_2 = arith.constant 0 : index
    %1 = vector.load %arg2[%c0_1, %c0_2] : memref<32x3xf32, #tpu.memory_space<vmem>>, vector<32x3xf32>
    %2 = arith.truncf %0 : vector<512x36xf32> to vector<512x36xbf16>
    %c0_3 = arith.constant 0 : index
    %c0_4 = arith.constant 0 : index
    %3 = vector.load %arg4[%c0_3, %c0_4] : memref<36x64xbf16, #tpu.memory_space<vmem>>, vector<36x64xbf16>
    %cst = arith.constant dense<0.000000e+00> : vector<512x64xf32>
    %4 = tpu.matmul %2, %3, %cst {dimension_numbers = #tpu.dot_dimension_numbers<[1], [0], [0], [1], [0, 0, 1, 1], [], []>} : vector<512x36xbf16>, vector<36x64xbf16>, vector<512x64xf32> -> vector<512x64xf32>
    %5 = arith.truncf %1 : vector<32x3xf32> to vector<32x3xbf16>
    %c0_5 = arith.constant 0 : index
    %c0_6 = arith.constant 0 : index
    %6 = vector.load %arg3[%c0_5, %c0_6] : memref<3x64xbf16, #tpu.memory_space<vmem>>, vector<3x64xbf16>
    %cst_7 = arith.constant dense<0.000000e+00> : vector<32x64xf32>
    %7 = tpu.matmul %5, %6, %cst_7 {dimension_numbers = #tpu.dot_dimension_numbers<[1], [0], [0], [1], [0, 0, 1, 1], [], []>} : vector<32x3xbf16>, vector<3x64xbf16>, vector<32x64xf32> -> vector<32x64xf32>
    %8 = vector.shape_cast %4 : vector<512x64xf32> to vector<32x16x64xf32>
    %9 = vector.shape_cast %7 : vector<32x64xf32> to vector<32x1x64xf32>
    %10 = vector.broadcast %9 : vector<32x1x64xf32> to vector<32x16x64xf32>
    %11 = arith.subf %8, %10 : vector<32x16x64xf32>
    %12 = vector.shape_cast %11 : vector<32x16x64xf32> to vector<512x64xf32>
    %c0_8 = arith.constant 0 : index
    %c0_9 = arith.constant 0 : index
    %13 = vector.load %arg5[%c0_8, %c0_9] : memref<1x64xf32, #tpu.memory_space<vmem>>, vector<1x64xf32>
    %14 = vector.broadcast %13 : vector<1x64xf32> to vector<512x64xf32>
    %15 = arith.addf %12, %14 : vector<512x64xf32>
    %cst_10 = arith.constant 0.000000e+00 : f32
    %16 = vector.broadcast %cst_10 : f32 to vector<512x64xf32>
    %17 = arith.maximumf %15, %16 : vector<512x64xf32>
    %18 = arith.truncf %17 : vector<512x64xf32> to vector<512x64xbf16>
    %c0_11 = arith.constant 0 : index
    %c0_12 = arith.constant 0 : index
    %19 = vector.load %arg6[%c0_11, %c0_12] : memref<64x64xbf16, #tpu.memory_space<vmem>>, vector<64x64xbf16>
    %cst_13 = arith.constant dense<0.000000e+00> : vector<512x64xf32>
    %20 = tpu.matmul %18, %19, %cst_13 {dimension_numbers = #tpu.dot_dimension_numbers<[1], [0], [0], [1], [0, 0, 1, 1], [], []>} : vector<512x64xbf16>, vector<64x64xbf16>, vector<512x64xf32> -> vector<512x64xf32>
    %c0_14 = arith.constant 0 : index
    %c0_15 = arith.constant 0 : index
    %21 = vector.load %arg7[%c0_14, %c0_15] : memref<1x64xf32, #tpu.memory_space<vmem>>, vector<1x64xf32>
    %22 = vector.broadcast %21 : vector<1x64xf32> to vector<512x64xf32>
    %23 = arith.addf %20, %22 : vector<512x64xf32>
    %cst_16 = arith.constant 0.000000e+00 : f32
    %24 = vector.broadcast %cst_16 : f32 to vector<512x64xf32>
    %25 = arith.maximumf %23, %24 : vector<512x64xf32>
    %26 = arith.truncf %25 : vector<512x64xf32> to vector<512x64xbf16>
    %c0_17 = arith.constant 0 : index
    %c0_18 = arith.constant 0 : index
    %27 = vector.load %arg8[%c0_17, %c0_18] : memref<64x64xbf16, #tpu.memory_space<vmem>>, vector<64x64xbf16>
    %cst_19 = arith.constant dense<0.000000e+00> : vector<512x64xf32>
    %28 = tpu.matmul %26, %27, %cst_19 {dimension_numbers = #tpu.dot_dimension_numbers<[1], [0], [0], [1], [0, 0, 1, 1], [], []>} : vector<512x64xbf16>, vector<64x64xbf16>, vector<512x64xf32> -> vector<512x64xf32>
    %c0_20 = arith.constant 0 : index
    %c0_21 = arith.constant 0 : index
    %29 = vector.load %arg9[%c0_20, %c0_21] : memref<1x64xf32, #tpu.memory_space<vmem>>, vector<1x64xf32>
    %30 = vector.broadcast %29 : vector<1x64xf32> to vector<512x64xf32>
    %31 = arith.addf %28, %30 : vector<512x64xf32>
    %cst_22 = arith.constant 0.000000e+00 : f32
    %32 = vector.broadcast %cst_22 : f32 to vector<512x64xf32>
    %33 = arith.maximumf %31, %32 : vector<512x64xf32>
    %34 = vector.shape_cast %33 : vector<512x64xf32> to vector<32x16x64xf32>
    %cst_23 = arith.constant dense<0xFF800000> : vector<32x64xf32>
    %35 = vector.multi_reduction <maximumf>, %34, %cst_23 [1] : vector<32x16x64xf32> to vector<32x64xf32>
    %36 = arith.truncf %35 : vector<32x64xf32> to vector<32x64xbf16>
    %c0_24 = arith.constant 0 : index
    %c0_25 = arith.constant 0 : index
    %37 = vector.load %arg10[%c0_24, %c0_25] : memref<64x64xbf16, #tpu.memory_space<vmem>>, vector<64x64xbf16>
    %cst_26 = arith.constant dense<0.000000e+00> : vector<32x64xf32>
    %38 = tpu.matmul %36, %37, %cst_26 {dimension_numbers = #tpu.dot_dimension_numbers<[1], [0], [0], [1], [0, 0, 1, 1], [], []>} : vector<32x64xbf16>, vector<64x64xbf16>, vector<32x64xf32> -> vector<32x64xf32>
    %c0_27 = arith.constant 0 : index
    %c0_28 = arith.constant 0 : index
    %39 = vector.load %arg11[%c0_27, %c0_28] : memref<1x64xf32, #tpu.memory_space<vmem>>, vector<1x64xf32>
    %40 = vector.broadcast %39 : vector<1x64xf32> to vector<32x64xf32>
    %41 = arith.addf %38, %40 : vector<32x64xf32>
    %cst_29 = arith.constant 0.000000e+00 : f32
    %42 = vector.broadcast %cst_29 : f32 to vector<32x64xf32>
    %43 = arith.maximumf %41, %42 : vector<32x64xf32>
    %44 = arith.truncf %43 : vector<32x64xf32> to vector<32x64xbf16>
    %c0_30 = arith.constant 0 : index
    %c0_31 = arith.constant 0 : index
    %45 = vector.load %arg12[%c0_30, %c0_31] : memref<64x64xbf16, #tpu.memory_space<vmem>>, vector<64x64xbf16>
    %cst_32 = arith.constant dense<0.000000e+00> : vector<32x64xf32>
    %46 = tpu.matmul %44, %45, %cst_32 {dimension_numbers = #tpu.dot_dimension_numbers<[1], [0], [0], [1], [0, 0, 1, 1], [], []>} : vector<32x64xbf16>, vector<64x64xbf16>, vector<32x64xf32> -> vector<32x64xf32>
    %c0_33 = arith.constant 0 : index
    %c0_34 = arith.constant 0 : index
    %47 = vector.load %arg13[%c0_33, %c0_34] : memref<1x64xf32, #tpu.memory_space<vmem>>, vector<1x64xf32>
    %48 = vector.broadcast %47 : vector<1x64xf32> to vector<32x64xf32>
    %49 = arith.addf %46, %48 : vector<32x64xf32>
    %cst_35 = arith.constant 0.000000e+00 : f32
    %50 = vector.broadcast %cst_35 : f32 to vector<32x64xf32>
    %51 = arith.maximumf %49, %50 : vector<32x64xf32>
    %52 = arith.truncf %51 : vector<32x64xf32> to vector<32x64xbf16>
    %c0_36 = arith.constant 0 : index
    %c0_37 = arith.constant 0 : index
    %53 = vector.load %arg14[%c0_36, %c0_37] : memref<64x128xbf16, #tpu.memory_space<vmem>>, vector<64x128xbf16>
    %cst_38 = arith.constant dense<0.000000e+00> : vector<32x128xf32>
    %54 = tpu.matmul %52, %53, %cst_38 {dimension_numbers = #tpu.dot_dimension_numbers<[1], [0], [0], [1], [0, 0, 1, 1], [], []>} : vector<32x64xbf16>, vector<64x128xbf16>, vector<32x128xf32> -> vector<32x128xf32>
    %c0_39 = arith.constant 0 : index
    %c0_40 = arith.constant 0 : index
    %55 = vector.load %arg15[%c0_39, %c0_40] : memref<1x128xf32, #tpu.memory_space<vmem>>, vector<1x128xf32>
    %56 = vector.broadcast %55 : vector<1x128xf32> to vector<32x128xf32>
    %57 = arith.addf %54, %56 : vector<32x128xf32>
    %cst_41 = arith.constant 0.000000e+00 : f32
    %58 = vector.broadcast %cst_41 : f32 to vector<32x125xf32>
    %59 = tpu.concatenate %1, %58 in 1 : vector<32x3xf32>, vector<32x125xf32> -> vector<32x128xf32>
    %60 = arith.addf %57, %59 : vector<32x128xf32>
    %c0_42 = arith.constant 0 : index
    %c0_43 = arith.constant 0 : index
    %61 = vector.load %arg16[%c0_42, %c0_43] : memref<32x128xf32, #tpu.memory_space<vmem>>, vector<32x128xf32>
    tpu.vector_store %arg16[%c0_42, %c0_43], %60 {strides = array<i32>} : memref<32x128xf32, #tpu.memory_space<vmem>>, vector<32x128xf32>,
    return
  }
  func.func @transform_0(%arg0: i32) -> (i32, i32) {
    %c0_i32 = arith.constant 0 : i32
    %c0_i32_0 = arith.constant 0 : i32
    return %arg0, %c0_i32 : i32, i32
  }
  func.func @transform_1(%arg0: i32) -> (i32, i32) {
    %c0_i32 = arith.constant 0 : i32
    %c0_i32_0 = arith.constant 0 : i32
    return %arg0, %c0_i32 : i32, i32
  }
  func.func @transform_2(%arg0: i32) -> (i32, i32) {
    %c0_i32 = arith.constant 0 : i32
    %c0_i32_0 = arith.constant 0 : i32
    %c0_i32_1 = arith.constant 0 : i32
    return %c0_i32, %c0_i32_0 : i32, i32
  }
  func.func @transform_3(%arg0: i32) -> (i32, i32) {
    %c0_i32 = arith.constant 0 : i32
    %c0_i32_0 = arith.constant 0 : i32
    %c0_i32_1 = arith.constant 0 : i32
    return %c0_i32, %c0_i32_0 : i32, i32
  }
  func.func @transform_4(%arg0: i32) -> (i32, i32) {
    %c0_i32 = arith.constant 0 : i32
    %c0_i32_0 = arith.constant 0 : i32
    %c0_i32_1 = arith.constant 0 : i32
    return %c0_i32, %c0_i32_0 : i32, i32
  }
  func.func @transform_5(%arg0: i32) -> (i32, i32) {
    %c0_i32 = arith.constant 0 : i32
    %c0_i32_0 = arith.constant 0 : i32
    %c0_i32_1 = arith.constant 0 : i32
    return %c0_i32, %c0_i32_0 : i32, i32
  }
  func.func @transform_6(%arg0: i32) -> (i32, i32) {
    %c0_i32 = arith.constant 0 : i32
    %c0_i32_0 = arith.constant 0 : i32
    %c0_i32_1 = arith.constant 0 : i32
    return %c0_i32, %c0_i32_0 : i32, i32
  }
  func.func @transform_7(%arg0: i32) -> (i32, i32) {
    %c0_i32 = arith.constant 0 : i32
    %c0_i32_0 = arith.constant 0 : i32
    %c0_i32_1 = arith.constant 0 : i32
    return %c0_i32, %c0_i32_0 : i32, i32
  }
  func.func @transform_8(%arg0: i32) -> (i32, i32) {
    %c0_i32 = arith.constant 0 : i32
    %c0_i32_0 = arith.constant 0 : i32
    %c0_i32_1 = arith.constant 0 : i32
    return %c0_i32, %c0_i32_0 : i32, i32
  }
  func.func @transform_9(%arg0: i32) -> (i32, i32) {
    %c0_i32 = arith.constant 0 : i32
    %c0_i32_0 = arith.constant 0 : i32
    %c0_i32_1 = arith.constant 0 : i32
    return %c0_i32, %c0_i32_0 : i32, i32
  }
  func.func @transform_10(%arg0: i32) -> (i32, i32) {
    %c0_i32 = arith.constant 0 : i32
    %c0_i32_0 = arith.constant 0 : i32
    %c0_i32_1 = arith.constant 0 : i32
    return %c0_i32, %c0_i32_0 : i32, i32
  }
  func.func @transform_11(%arg0: i32) -> (i32, i32) {
    %c0_i32 = arith.constant 0 : i32
    %c0_i32_0 = arith.constant 0 : i32
    %c0_i32_1 = arith.constant 0 : i32
    return %c0_i32, %c0_i32_0 : i32, i32
  }
  func.func @transform_12(%arg0: i32) -> (i32, i32) {
    %c0_i32 = arith.constant 0 : i32
    %c0_i32_0 = arith.constant 0 : i32
    %c0_i32_1 = arith.constant 0 : i32
    return %c0_i32, %c0_i32_0 : i32, i32
  }
  func.func @transform_13(%arg0: i32) -> (i32, i32) {
    %c0_i32 = arith.constant 0 : i32
    %c0_i32_0 = arith.constant 0 : i32
    %c0_i32_1 = arith.constant 0 : i32
    return %c0_i32, %c0_i32_0 : i32, i32
  }
  func.func @transform_14(%arg0: i32) -> (i32, i32) {
    %c0_i32 = arith.constant 0 : i32
    %c0_i32_0 = arith.constant 0 : i32
    %c0_i32_1 = arith.constant 0 : i32
    return %c0_i32, %c0_i32_0 : i32, i32
  }
  func.func @transform_15(%arg0: i32) -> (i32, i32) {
    %c0_i32 = arith.constant 0 : i32
    %c0_i32_0 = arith.constant 0 : i32
    return %arg0, %c0_i32 : i32, i32
  }
}

</mosaic_0001>

<bundles_post_ra>
// kernel: custom-call.6
= control target key start
LH: loop header
LB: loop body
LE: loop exit
PB: predicated region body
PF: predicated region fallthrough
CT: control target
= control target key end

     0   :  { %s6_s0 = inlined_call_operand.vmem [shape: f32[2,64], index: 0, kind: output, shape index: {}]  }

// kernel: p2b_votenet_rpn_forward.2
= control target key start
LH: loop header
LB: loop body
LE: loop exit
PB: predicated region body
PF: predicated region fallthrough
CT: control target
= control target key end

     0   :  { %vm103_vm0 = vcmask 1040384   ;;  %vm104_vm1 = vcmask 1041408   ;;  %v984_v1 = vmov 65535   ;;  %vm78_vm2 = vcmask 285696   ;;  %s1384_s1 = inlined_call_operand.vmem [shape: bf16[35,64], index: 1, kind: input, shape index: {}]   ;;  %s1385_s0 = inlined_call_operand.vmem [shape: f32[128,35], index: 0, kind: input, shape index: {}]   ;;  %s1386_s3 = inlined_call_operand.vmem [shape: bf16[64,64], index: 3, kind: input, shape index: {}]   ;;  %s1387_s5 = inlined_call_operand.vmem [shape: bf16[64,128], index: 5, kind: input, shape index: {}]   ;;  %s1388_s2 = inlined_call_operand.vmem [shape: f32[1,64], index: 2, kind: input, shape index: {}]   ;;  %s1389_s4 = inlined_call_operand.vmem [shape: f32[1,64], index: 4, kind: input, shape index: {}]   ;;  %s1390_s6 = inlined_call_operand.vmem [shape: f32[1,128], index: 6, kind: input, shape index: {}]   ;;  %s1391_s7 = inlined_call_operand.vmem [shape: f32[128,128], index: 7, kind: output, shape index: {}]  }
   0x1   :  { %v909_v0 = vld [vmem:[%s1384_s1] sm:$0xff]   ;;  %v105_v2 = vsel %vm103_vm0, 4294967295, %v984_v1  ;;  %v910_v3 = vld [vmem:[%s1384_s1 + $0x8] sm:$0xff]   ;;  %v911_v5 = vld [vmem:[%s1384_s1 + $0x10] ss:$0 sps:$4 sm:$0x33]  }
   0x2   :  { %v106_v4 = vsel %vm104_vm1, %v105_v2, 0  ;;  %832 = vmatprep.subr.bf16.mxu0 %v909_v0  ;;  %v1037_v6 = vld [vmem:[%s1385_s0] sm:$0xff]  ;;  %902 = vmatprep.subr.bf16.mxu1 %v909_v0  ;;  %v1042_v7 = vld [vmem:[%s1385_s0 + $0x8] sm:$0xff]  ;;  %v1049_v10 = vld [vmem:[%s1385_s0 + $0x10] sm:$0xff]  ;;  %vm270_vm3 = vcmask 523264  }
   0x3   :  { %833 = vmatpush3.bf16.msra.mxu0 %v909_v0  ;;  %905 = vmatpush3.bf16.msra.mxu1 %v909_v0  ;;  %v108_v8 = vand.u32 %v911_v5, %v106_v4  ;;  %v43_v9 = vpack.c.bf16 %v1042_v7, %v1037_v6  ;;  %v1054_v11 = vld [vmem:[%s1385_s0 + $0x18] sm:$0xff]  ;;  %v1059_v12 = vld [vmem:[%s1385_s0 + $0x40] sm:$0xff]  ;;  %v1064_v13 = vld [vmem:[%s1385_s0 + $0x48] sm:$0xff] }
   0x4   :  { %834 = vmatprep.subr.bf16.mxu0 %v910_v3  ;;  %903 = vmatprep.subr.bf16.mxu1 %v910_v3  ;;  %v1070_v14 = vld [vmem:[%s1385_s0 + $0x20] sm:$0xff]  ;;  %v1075_v15 = vld [vmem:[%s1385_s0 + $0x28] sm:$0xff]  ;;  %v47_v16 = vpack.c.bf16 %v1064_v13, %v1059_v12  ;;  %v1082_v17 = vld [vmem:[%s1385_s0 + $0x50] sm:$0xff]  ;;  %v44_v22 = vpack.c.bf16 %v1054_v11, %v1049_v10 }
   0x5   :  { %838 = vmatprep.mubr.msk.bf16.mxu0 %vm78_vm2, %v43_v9  ;;  %v1087_v18 = vld [vmem:[%s1385_s0 + $0x58] sm:$0xff]  ;;  %v1092_v19 = vld [vmem:[%s1385_s0 + $0x60] sm:$0xff]  ;;  %v1097_v20 = vld [vmem:[%s1385_s0 + $0x68] sm:$0xff]  ;;  %v45_v24 = vpack.c.bf16 %v1075_v15, %v1070_v14 }
   0x6   :  { %v912_v21 = vld [vmem:[%s1386_s3] sm:$0xff]   ;;  %846 = vmatprep.mubr.msk.bf16.mxu1 %vm78_vm2, %v47_v16  ;;  %v48_v23 = vpack.c.bf16 %v1087_v18, %v1082_v17  ;;  %v49_v25 = vpack.c.bf16 %v1097_v20, %v1092_v19  ;;  %v913_v26 = vld [vmem:[%s1386_s3 + $0x8] sm:$0xff]   ;;  %v1118_v27 = vld [vmem:[%s1385_s0 + $0x30] sm:$0xff] }
   0x7   :  { %835 = vmatpush3.bf16.msra.mxu0 %v910_v3  ;;  %906 = vmatpush3.bf16.msra.mxu1 %v910_v3  ;;  %v1125_v28 = vld [vmem:[%s1385_s0 + $0x38] sm:$0xff]  ;;  %v1131_v29 = vld [vmem:[%s1385_s0 + $0x70] sm:$0xff]  ;;  %v916_v35 = vld [vmem:[%s1387_s5] sm:$0xff]  }
   0x8   :  { %836 = vmatprep.subr.bf16.mxu0 %v108_v8  ;;  %904 = vmatprep.subr.bf16.mxu1 %v108_v8  ;;  %v1136_v30 = vld [vmem:[%s1385_s0 + $0x78] sm:$0xff]  ;;  %v46_v31 = vpack.c.bf16 %v1125_v28, %v1118_v27  ;;  %v914_v33 = vld [vmem:[%s1386_s3 + $0x10] sm:$0xff]   ;;  %v917_v36 = vld [vmem:[%s1387_s5 + $0x8] sm:$0xff]  }
   0x9   :  { %v50_v32 = vpack.c.bf16 %v1136_v30, %v1131_v29  ;;  %v915_v34 = vld [vmem:[%s1386_s3 + $0x18] sm:$0xff]   ;;  %v743_v37 = vld [vmem:[%s1388_s2] ss:$0 sm:$0xff] }
   0xb   :  { %837 = vmatpush3.bf16.msra.mxu0 %v108_v8  ;;  %907 = vmatpush3.bf16.msra.mxu1 %v108_v8 }
   0xc   :  { %854 = vmatprep.subr.bf16.mxu1 %v912_v21  ;;  %878 = vmatprep.subr.bf16.mxu0 %v916_v35 }
   0xe   :  { %839 = vmatmul.mubr.msk.bf16.vlgmr.msra.gmra.mrb[0].mxu0 %vm78_vm2, %v44_v22  ;;  %847 = vmatmul.mubr.msk.bf16.vlgmr.msra.gmra.mrb[0].mxu1 %vm78_vm2, %v48_v23 }
   0xf   :  { %842 = vmatprep.mubr.msk.bf16.mxu0 %vm78_vm2, %v45_v24  ;;  %850 = vmatprep.mubr.msk.bf16.mxu1 %vm78_vm2, %v49_v25 }
  0x10   :  { %855 = vmatpush3.bf16.msra.mxu1 %v912_v21  ;;  %879 = vmatpush3.bf16.msra.mxu0 %v916_v35 }
  0x11   :  { %856 = vmatprep.subr.bf16.mxu1 %v913_v26  ;;  %880 = vmatprep.subr.bf16.mxu0 %v917_v36 }
  0x14   :  { %857 = vmatpush3.bf16.msra.mxu1 %v913_v26  ;;  %881 = vmatpush3.bf16.msra.mxu0 %v917_v36 }
  0x15   :  { %858 = vmatprep.subr.bf16.mxu1 %v914_v33 }
  0x16   :  { %843 = vmatmul.mubr.msk.bf16.gmra.mrb[4].mxu0 %vm78_vm2, %v46_v31  ;;  %851 = vmatmul.mubr.msk.bf16.gmra.mrb[4].mxu1 %vm78_vm2, %v50_v32 }
  0x18   :  { %859 = vmatpush3.bf16.msra.mxu1 %v914_v33 }
  0x19   :  { %860 = vmatprep.subr.bf16.mxu1 %v915_v34 }
  0x1c   :  { %861 = vmatpush3.bf16.msra.mxu1 %v915_v34 }
  0xe1   :  { %v840_v38 = vpop.f32.mrb[0].mxu0  ;;  %v848_v39 = vpop.f32.mrb[0].mxu1 }
  0xe2   :  { %v153_v40 = vadd.f32 %v840_v38, %v743_v37  ;;  %v144_v41 = vpop.f32.mrb[1].mxu0  ;;  %v185_v42 = vadd.f32 %v848_v39, %v743_v37  ;;  %v176_v43 = vpop.f32.mrb[1].mxu1 }
  0xe3   :  { %v145_v44 = vadd.f32 %v743_v37, %v144_v41  ;;  %v841_v45 = vpop.f32.mrb[2].mxu0  ;;  %v177_v46 = vadd.f32 %v743_v37, %v176_v43  ;;  %v849_v47 = vpop.f32.mrb[2].mxu1 }
  0xe4   :  { %v156_v48 = vadd.f32 %v841_v45, %v743_v37  ;;  %v147_v49 = vpop.f32.mrb[3].mxu0  ;;  %v217_v50 = vmax.f32 %v185_v42, 0.0  ;;  %v188_v51 = vadd.f32 %v849_v47, %v743_v37  ;;  %v179_v52 = vpop.f32.mrb[3].mxu1  ;;  %v209_v56 = vmax.f32 %v153_v40, 0.0  ;;  %v919_v47 = vld [vmem:[%s1387_s5 + $0x18] sm:$0xff]  }
  0xe5   :  { %v148_v53 = vadd.f32 %v743_v37, %v147_v49  ;;  %v215_v54 = vmax.f32 %v177_v46, 0.0  ;;  %v180_v55 = vadd.f32 %v743_v37, %v179_v52  ;;  %v207_v59 = vmax.f32 %v145_v44, 0.0 }
  0xe6   :  { %v210_v57 = vmax.f32 %v156_v48, 0.0  ;;  %v218_v58 = vmax.f32 %v188_v51, 0.0  ;;  %v755_v48 = vld [vmem:[%s1389_s4] ss:$0 sm:$0xff] }
  0xe7   :  { %v208_v60 = vmax.f32 %v148_v53, 0.0  ;;  %v216_v61 = vmax.f32 %v180_v55, 0.0 }
  0xe8   :  { %v224_v62 = vpack.c.bf16 %v210_v57, %v209_v56  ;;  %v228_v63 = vpack.c.bf16 %v218_v58, %v217_v50 }
  0xe9   :  { %v223_v0 = vpack.c.bf16 %v208_v60, %v207_v59  ;;  %v844_v1 = vpop.f32.mrb[4].mxu0  ;;  %v227_v2 = vpack.c.bf16 %v216_v61, %v215_v54  ;;  %v852_v3 = vpop.f32.mrb[4].mxu1 }
  0xea   :  { %v169_v4 = vadd.f32 %v844_v1, %v743_v37  ;;  %v160_v5 = vpop.f32.mrb[5].mxu0  ;;  %v201_v8 = vadd.f32 %v852_v3, %v743_v37  ;;  %v192_v9 = vpop.f32.mrb[5].mxu1 }
  0xeb   :  { %v161_v16 = vadd.f32 %v743_v37, %v160_v5  ;;  %v845_v21 = vpop.f32.mrb[6].mxu0  ;;  %862 = vmatprep.mubr.msk.bf16.mxu1 %vm270_vm3, %v223_v0  ;;  %v193_v22 = vadd.f32 %v743_v37, %v192_v9  ;;  %v853_v23 = vpop.f32.mrb[6].mxu1 }
  0xec   :  { %v172_v24 = vadd.f32 %v845_v21, %v743_v37  ;;  %v163_v25 = vpop.f32.mrb[7].mxu0  ;;  %863 = vmatmul.mubr.msk.bf16.vlgmr.msra.gmra.mrb[8].mxu1 %vm270_vm3, %v224_v62  ;;  %v221_v26 = vmax.f32 %v201_v8, 0.0  ;;  %v204_v31 = vadd.f32 %v853_v23, %v743_v37  ;;  %v195_v32 = vpop.f32.mrb[7].mxu1  ;;  %v213_v36 = vmax.f32 %v169_v4, 0.0 }
  0xed   :  { %v164_v33 = vadd.f32 %v743_v37, %v163_v25  ;;  %v219_v34 = vmax.f32 %v193_v22, 0.0  ;;  %v196_v35 = vadd.f32 %v743_v37, %v195_v32  ;;  %v211_v40 = vmax.f32 %v161_v16, 0.0  ;;  %v918_v37 = vld [vmem:[%s1387_s5 + $0x10] sm:$0xff]  }
  0xee   :  { %v214_v38 = vmax.f32 %v172_v24, 0.0  ;;  %v222_v39 = vmax.f32 %v204_v31, 0.0  ;;  %882 = vmatprep.subr.bf16.mxu0 %v918_v37 }
  0xef   :  { %v212_v41 = vmax.f32 %v164_v33, 0.0  ;;  %v220_v42 = vmax.f32 %v196_v35, 0.0  ;;  %883 = vmatpush3.bf16.msra.mxu0 %v918_v37 }
  0xf0   :  { %v226_v43 = vpack.c.bf16 %v214_v38, %v213_v36  ;;  %v230_v44 = vpack.c.bf16 %v222_v39, %v221_v26  ;;  %884 = vmatprep.subr.bf16.mxu0 %v919_v47 }
  0xf1   :  { %v225_v45 = vpack.c.bf16 %v212_v41, %v211_v40  ;;  %v229_v46 = vpack.c.bf16 %v220_v42, %v219_v34 }
  0xf3   :  { %866 = vmatprep.mubr.msk.bf16.mxu1 %vm270_vm3, %v225_v45  ;;  %885 = vmatpush3.bf16.msra.mxu0 %v919_v47 }
  0xf4   :  { %867 = vmatmul.mubr.msk.bf16.gmra.mrb[12].mxu1 %vm270_vm3, %v226_v43 }
  0xf5   :  { %870 = vmatprep.mubr.msk.bf16.mxu1 %vm270_vm3, %v227_v2 }
  0xfc   :  { %871 = vmatmul.mubr.msk.bf16.gmra.mrb[16].mxu1 %vm270_vm3, %v228_v63 }
  0xfd   :  { %874 = vmatprep.mubr.msk.bf16.mxu1 %vm270_vm3, %v229_v46 }
 0x104   :  { %875 = vmatmul.mubr.msk.bf16.gmra.mrb[20].mxu1 %vm270_vm3, %v230_v44 }
 0x1bf   :  { %v864_v49 = vpop.f32.mrb[8].mxu1 }
 0x1c0   :  { %v338_v50 = vadd.f32 %v864_v49, %v755_v48  ;;  %v329_v51 = vpop.f32.mrb[9].mxu1 }
 0x1c1   :  { %v330_v52 = vadd.f32 %v755_v48, %v329_v51  ;;  %v865_v53 = vpop.f32.mrb[10].mxu1 }
 0x1c2   :  { %v341_v54 = vadd.f32 %v865_v53, %v755_v48  ;;  %v332_v55 = vpop.f32.mrb[11].mxu1  ;;  %v394_v57 = vmax.f32 %v338_v50, 0.0 }
 0x1c3   :  { %v333_v56 = vadd.f32 %v755_v48, %v332_v55  ;;  %v392_v59 = vmax.f32 %v330_v52, 0.0 }
 0x1c4   :  { %v395_v58 = vmax.f32 %v341_v54, 0.0 }
 0x1c5   :  { %v393_v60 = vmax.f32 %v333_v56, 0.0 }
 0x1c6   :  { %v409_v61 = vpack.c.bf16 %v395_v58, %v394_v57  ;;  %v1187_v58 = vld [vmem:[%s1390_s6] ss:$0 sm:$0xff] }
 0x1c7   :  { %v408_v62 = vpack.c.bf16 %v393_v60, %v392_v59  ;;  %v868_v63 = vpop.f32.mrb[12].mxu1  ;;  %v578_v60 = vsel %vm78_vm2, %v1049_v10, 0.0  ;;  %v577_v10 = vsel %vm78_vm2, %v1042_v7, 0.0  ;;  %v582_v7 = vsel %vm78_vm2, %v1118_v27, 0.0 }
 0x1c8   :  { %v354_v0 = vadd.f32 %v868_v63, %v755_v48  ;;  %v345_v1 = vpop.f32.mrb[13].mxu1  ;;  %v581_v27 = vsel %vm78_vm2, %v1075_v15, 0.0 }
 0x1c9   :  { %v346_v2 = vadd.f32 %v755_v48, %v345_v1  ;;  %v869_v3 = vpop.f32.mrb[14].mxu1  ;;  %886 = vmatprep.mubr.msk.bf16.mxu0 %vm270_vm3, %v408_v62  ;;  %v576_v62 = vsel %vm78_vm2, %v1037_v6, 0.0  ;;  %v579_v1 = vsel %vm78_vm2, %v1054_v11, 0.0 }
 0x1ca   :  { %v357_v4 = vadd.f32 %v869_v3, %v755_v48  ;;  %v348_v5 = vpop.f32.mrb[15].mxu1  ;;  %887 = vmatmul.mubr.msk.bf16.vlgmr.msra.gmra.mrb[8].mxu0 %vm270_vm3, %v409_v61  ;;  %v398_v9 = vmax.f32 %v354_v0, 0.0 }
 0x1cb   :  { %v349_v8 = vadd.f32 %v755_v48, %v348_v5  ;;  %v396_v21 = vmax.f32 %v346_v2, 0.0 }
 0x1cc   :  { %v399_v16 = vmax.f32 %v357_v4, 0.0 }
 0x1cd   :  { %v397_v22 = vmax.f32 %v349_v8, 0.0 }
 0x1ce   :  { %v411_v23 = vpack.c.bf16 %v399_v16, %v398_v9 }
 0x1cf   :  { %v410_v24 = vpack.c.bf16 %v397_v22, %v396_v21  ;;  %v872_v25 = vpop.f32.mrb[16].mxu1 }
 0x1d0   :  { %v370_v26 = vadd.f32 %v872_v25, %v755_v48  ;;  %v361_v31 = vpop.f32.mrb[17].mxu1 }
 0x1d1   :  { %v362_v32 = vadd.f32 %v755_v48, %v361_v31  ;;  %v873_v33 = vpop.f32.mrb[18].mxu1  ;;  %890 = vmatprep.mubr.msk.bf16.mxu0 %vm270_vm3, %v410_v24 }
 0x1d2   :  { %v373_v34 = vadd.f32 %v873_v33, %v755_v48  ;;  %v364_v35 = vpop.f32.mrb[19].mxu1  ;;  %891 = vmatmul.mubr.msk.bf16.gmra.mrb[12].mxu0 %vm270_vm3, %v411_v23  ;;  %v402_v38 = vmax.f32 %v370_v26, 0.0  ;;  %v580_v26 = vsel %vm78_vm2, %v1070_v14, 0.0  ;;  %v583_v33 = vsel %vm78_vm2, %v1125_v28, 0.0 }
 0x1d3   :  { %v365_v36 = vadd.f32 %v755_v48, %v364_v35  ;;  %v400_v40 = vmax.f32 %v362_v32, 0.0  ;;  %v608_v14 = vlaneseq }
 0x1d4   :  { %v403_v39 = vmax.f32 %v373_v34, 0.0 }
 0x1d5   :  { %v401_v41 = vmax.f32 %v365_v36, 0.0 }
 0x1d6   :  { %v413_v42 = vpack.c.bf16 %v403_v39, %v402_v38 }
 0x1d7   :  { %v412_v43 = vpack.c.bf16 %v401_v41, %v400_v40  ;;  %v876_v44 = vpop.f32.mrb[20].mxu1 }
 0x1d8   :  { %v386_v45 = vadd.f32 %v876_v44, %v755_v48  ;;  %v377_v46 = vpop.f32.mrb[21].mxu1 }
 0x1d9   :  { %v378_v37 = vadd.f32 %v755_v48, %v377_v46  ;;  %v877_v47 = vpop.f32.mrb[22].mxu1  ;;  %894 = vmatprep.mubr.msk.bf16.mxu0 %vm270_vm3, %v412_v43 }
 0x1da   :  { %v389_v49 = vadd.f32 %v877_v47, %v755_v48  ;;  %v380_v50 = vpop.f32.mrb[23].mxu1  ;;  %895 = vmatmul.mubr.msk.bf16.gmra.mrb[16].mxu0 %vm270_vm3, %v413_v42  ;;  %v406_v52 = vmax.f32 %v386_v45, 0.0  ;;  %v586_v45 = vsel %vm78_vm2, %v1082_v17, 0.0 }
 0x1db   :  { %v381_v51 = vadd.f32 %v755_v48, %v380_v50  ;;  %v404_v54 = vmax.f32 %v378_v37, 0.0  ;;  %v1239_v37 = vand.u32 127, %v608_v14  ;;  %v584_v50 = vsel %vm78_vm2, %v1059_v12, 0.0 }
 0x1dc   :  { %v407_v53 = vmax.f32 %v389_v49, 0.0 }
 0x1dd   :  { %v405_v55 = vmax.f32 %v381_v51, 0.0  ;;  %vm610_vm4 = vcmp.eq.s32.totalorder %v1239_v37, 35 }
 0x1de   :  { %v415_v56 = vpack.c.bf16 %v407_v53, %v406_v52 }
 0x1df   :  { %v414_v57 = vpack.c.bf16 %v405_v55, %v404_v54  ;;  %v587_v55 = vsel %vm78_vm2, %v1087_v18, 0.0 }
 0x1e1   :  { %898 = vmatprep.mubr.msk.bf16.mxu0 %vm270_vm3, %v414_v57 }
 0x1e2   :  { %899 = vmatmul.mubr.msk.bf16.gmra.mrb[20].mxu0 %vm270_vm3, %v415_v56 }
 0x29d   :  { %v888_v59 = vpop.f32.mrb[8].mxu0 }
 0x29e   :  { %v522_v48 = vadd.f32 %v888_v59, %v1187_v58  ;;  %v513_v61 = vpop.f32.mrb[9].mxu0 }
 0x29f   :  { %v514_v63 = vadd.f32 %v1187_v58, %v513_v61  ;;  %v889_v0 = vpop.f32.mrb[10].mxu0 }
 0x2a0   :  { %v1197_v2 = vadd.f32 %v578_v60, %v522_v48  ;;  %v525_v3 = vadd.f32 %v889_v0, %v1187_v58  ;;  %v516_v4 = vpop.f32.mrb[11].mxu0  ;;  %v585_v48 = vsel %vm78_vm2, %v1064_v13, 0.0 }
 0x2a1   :  { %v1202_v5 = vadd.f32 %v576_v62, %v514_v63  ;;  %v517_v8 = vadd.f32 %v1187_v58, %v516_v4 }
 0x2a2   :  { %v783_v6 = vmul.f32 -1.442695, %v1197_v2  ;;  %v1206_v9 = vadd.f32 %v579_v1, %v525_v3 }
 0x2a3   :  { %v781_v16 = vmul.f32 -1.442695, %v1202_v5  ;;  %v1209_v21 = vadd.f32 %v577_v10, %v517_v8 }
 0x2a4   :  { %920 = vpow2.f32 %v783_v6  ;;  %v784_v11 = vmul.f32 -1.442695, %v1206_v9  ;;  %v590_v6 = vsel %vm78_vm2, %v1131_v29, 0.0  ;;  %v589_v29 = vsel %vm78_vm2, %v1097_v20, 0.0 }
 0x2a5   :  { %922 = vpow2.f32 %v781_v16  ;;  %v782_v22 = vmul.f32 -1.442695, %v1209_v21  ;;  %v892_v23 = vpop.f32.mrb[12].mxu0 }
 0x2a6   :  { %924 = vpow2.f32 %v784_v11  ;;  %v538_v24 = vadd.f32 %v892_v23, %v1187_v58  ;;  %v529_v25 = vpop.f32.mrb[13].mxu0  ;;  %v588_v23 = vsel %vm78_vm2, %v1092_v19, 0.0 }
 0x2a7   :  { %926 = vpow2.f32 %v782_v22  ;;  %v530_v31 = vadd.f32 %v1187_v58, %v529_v25  ;;  %v893_v32 = vpop.f32.mrb[14].mxu0 }
 0x2a8   :  { %v1221_v34 = vadd.f32 %v582_v7, %v538_v24  ;;  %v541_v35 = vadd.f32 %v893_v32, %v1187_v58  ;;  %v532_v36 = vpop.f32.mrb[15].mxu0  ;;  %v591_v7 = vsel %vm78_vm2, %v1136_v30, 0.0 }
 0x2a9   :  { %v1226_v38 = vadd.f32 %v580_v26, %v530_v31  ;;  %v533_v39 = vadd.f32 %v1187_v58, %v532_v36 }
 0x2aa   :  { %v787_v40 = vmul.f32 -1.442695, %v1221_v34  ;;  %v1230_v41 = vadd.f32 %v583_v33, %v541_v35 }
 0x2ab   :  { %v785_v42 = vmul.f32 -1.442695, %v1226_v38  ;;  %v1233_v28 = vadd.f32 %v581_v27, %v533_v39 }
 0x2ac   :  { %928 = vpow2.f32 %v787_v40  ;;  %v788_v43 = vmul.f32 -1.442695, %v1230_v41 }
 0x2ad   :  { %930 = vpow2.f32 %v785_v42  ;;  %v786_v44 = vmul.f32 -1.442695, %v1233_v28  ;;  %v896_v15 = vpop.f32.mrb[16].mxu0 }
 0x2ae   :  { %v921_v46 = vpop.eup %920  ;;  %932 = vpow2.f32 %v788_v43  ;;  %v554_v47 = vadd.f32 %v896_v15, %v1187_v58  ;;  %v545_v49 = vpop.f32.mrb[17].mxu0 }
 0x2af   :  { %v923_v51 = vpop.eup %922  ;;  %v661_v52 = vadd.f32 1.0, %v921_v46  ;;  %934 = vpow2.f32 %v786_v44  ;;  %v546_v53 = vadd.f32 %v1187_v58, %v545_v49  ;;  %v897_v54 = vpop.f32.mrb[18].mxu0 }
 0x2b0   :  { %v925_v17 = vpop.eup %924  ;;  %v659_v56 = vadd.f32 1.0, %v923_v51  ;;  %v1247_v57 = vadd.f32 %v586_v45, %v554_v47  ;;  %v557_v59 = vadd.f32 %v897_v54, %v1187_v58  ;;  %v548_v60 = vpop.f32.mrb[19].mxu0 }
 0x2b1   :  { %v927_v12 = vpop.eup %926  ;;  %936 = vrcp.f32 %v661_v52  ;;  %v662_v61 = vadd.f32 1.0, %v925_v17  ;;  %v1252_v62 = vadd.f32 %v584_v50, %v546_v53  ;;  %v549_v63 = vadd.f32 %v1187_v58, %v548_v60 }
 0x2b2   :  { %938 = vrcp.f32 %v659_v56  ;;  %v660_v0 = vadd.f32 1.0, %v927_v12  ;;  %v791_v18 = vmul.f32 -1.442695, %v1247_v57  ;;  %v1256_v1 = vadd.f32 %v587_v55, %v557_v59 }
 0x2b3   :  { %940 = vrcp.f32 %v662_v61  ;;  %v789_v3 = vmul.f32 -1.442695, %v1252_v62  ;;  %v1259_v4 = vadd.f32 %v585_v48, %v549_v63 }
 0x2b4   :  { %942 = vrcp.f32 %v660_v0  ;;  %v792_v13 = vmul.f32 -1.442695, %v1256_v1 }
 0x2b5   :  { %944 = vpow2.f32 %v791_v18  ;;  %v790_v10 = vmul.f32 -1.442695, %v1259_v4  ;;  %v900_v8 = vpop.f32.mrb[20].mxu0 }
 0x2b6   :  { %v929_v16 = vpop.eup %928  ;;  %946 = vpow2.f32 %v789_v3  ;;  %v570_v11 = vadd.f32 %v900_v8, %v1187_v58  ;;  %v561_v22 = vpop.f32.mrb[21].mxu0 }
 0x2b7   :  { %v931_v24 = vpop.eup %930  ;;  %v665_v25 = vadd.f32 1.0, %v929_v16  ;;  %948 = vpow2.f32 %v792_v13  ;;  %v562_v26 = vadd.f32 %v1187_v58, %v561_v22  ;;  %v901_v31 = vpop.f32.mrb[22].mxu0 }
 0x2b8   :  { %v933_v32 = vpop.eup %932  ;;  %v663_v33 = vadd.f32 1.0, %v931_v24  ;;  %950 = vpow2.f32 %v790_v10  ;;  %v1274_v35 = vadd.f32 %v590_v6, %v570_v11  ;;  %v573_v36 = vadd.f32 %v901_v31, %v1187_v58  ;;  %v564_v19 = vpop.f32.mrb[23].mxu0 }
 0x2b9   :  { %v935_v27 = vpop.eup %934  ;;  %952 = vrcp.f32 %v665_v25  ;;  %v666_v30 = vadd.f32 1.0, %v933_v32  ;;  %v1277_v39 = vadd.f32 %v588_v23, %v562_v26  ;;  %v565_v14 = vadd.f32 %v1187_v58, %v564_v19 }
 0x2ba   :  { %954 = vrcp.f32 %v663_v33  ;;  %v664_v40 = vadd.f32 1.0, %v935_v27  ;;  %v795_v42 = vmul.f32 -1.442695, %v1274_v35  ;;  %v1281_v20 = vadd.f32 %v591_v7, %v573_v36 }
 0x2bb   :  { %v937_v43 = vpop.eup %936  ;;  %956 = vrcp.f32 %v666_v30  ;;  %v793_v44 = vmul.f32 -1.442695, %v1277_v39  ;;  %v1284_v15 = vadd.f32 %v589_v29, %v565_v14 }
 0x2bc   :  { %v939_v45 = vpop.eup %938  ;;  %v709_v46 = vsel %vm610_vm4, %v937_v43, %v1197_v2  ;;  %958 = vrcp.f32 %v664_v40  ;;  %v796_v58 = vmul.f32 -1.442695, %v1281_v20 }
 0x2bd   :  { %v941_v47 = vpop.eup %940  ;;  %725 = vst [vmem:[%s1391_s7 + $0x10] sm:$0xff] %v709_v46  ;;  %v707_v49 = vsel %vm610_vm4, %v939_v45, %v1202_v5  ;;  %960 = vpow2.f32 %v795_v42  ;;  %v794_v50 = vmul.f32 -1.442695, %v1284_v15 }
 0x2be   :  { %v943_v51 = vpop.eup %942  ;;  %723 = vst [vmem:[%s1391_s7] sm:$0xff] %v707_v49  ;;  %v710_v2 = vsel %vm610_vm4, %v941_v47, %v1206_v9  ;;  %962 = vpow2.f32 %v793_v44 }
 0x2bf   :  { %v945_v52 = vpop.eup %944  ;;  %726 = vst [vmem:[%s1391_s7 + $0x18] sm:$0xff] %v710_v2  ;;  %v708_v5 = vsel %vm610_vm4, %v943_v51, %v1209_v21  ;;  %964 = vpow2.f32 %v796_v58 }
 0x2c0   :  { %v947_v53 = vpop.eup %946  ;;  %724 = vst [vmem:[%s1391_s7 + $0x8] sm:$0xff] %v708_v5  ;;  %v669_v54 = vadd.f32 1.0, %v945_v52  ;;  %966 = vpow2.f32 %v794_v50 }
 0x2c1   :  { %v949_v55 = vpop.eup %948  ;;  %v667_v9 = vadd.f32 1.0, %v947_v53 }
 0x2c2   :  { %v951_v17 = vpop.eup %950  ;;  %968 = vrcp.f32 %v669_v54  ;;  %v670_v56 = vadd.f32 1.0, %v949_v55 }
 0x2c3   :  { %v953_v59 = vpop.eup %952  ;;  %970 = vrcp.f32 %v667_v9  ;;  %v668_v60 = vadd.f32 1.0, %v951_v17 }
 0x2c4   :  { %v955_v48 = vpop.eup %954  ;;  %v713_v21 = vsel %vm610_vm4, %v953_v59, %v1221_v34  ;;  %972 = vrcp.f32 %v670_v56 }
 0x2c5   :  { %v957_v12 = vpop.eup %956  ;;  %729 = vst [vmem:[%s1391_s7 + $0x30] sm:$0xff] %v713_v21  ;;  %v711_v61 = vsel %vm610_vm4, %v955_v48, %v1226_v38  ;;  %974 = vrcp.f32 %v668_v60 }
 0x2c6   :  { %v959_v63 = vpop.eup %958  ;;  %727 = vst [vmem:[%s1391_s7 + $0x20] sm:$0xff] %v711_v61  ;;  %v714_v34 = vsel %vm610_vm4, %v957_v12, %v1230_v41 }
 0x2c7   :  { %v961_v0 = vpop.eup %960  ;;  %730 = vst [vmem:[%s1391_s7 + $0x38] sm:$0xff] %v714_v34  ;;  %v712_v18 = vsel %vm610_vm4, %v959_v63, %v1233_v28 }
 0x2c8   :  { %v963_v38 = vpop.eup %962  ;;  %728 = vst [vmem:[%s1391_s7 + $0x28] sm:$0xff] %v712_v18  ;;  %v673_v3 = vadd.f32 1.0, %v961_v0 }
 0x2c9   :  { %v965_v13 = vpop.eup %964  ;;  %v671_v10 = vadd.f32 1.0, %v963_v38 }
 0x2ca   :  { %v967_v8 = vpop.eup %966  ;;  %976 = vrcp.f32 %v673_v3  ;;  %v674_v41 = vadd.f32 1.0, %v965_v13 }
 0x2cb   :  { %978 = vrcp.f32 %v671_v10  ;;  %v672_v6 = vadd.f32 1.0, %v967_v8 }
 0x2cc   :  { %v969_v16 = vpop.eup %968  ;;  %980 = vrcp.f32 %v674_v41 }
 0x2cd   :  { %v971_v11 = vpop.eup %970  ;;  %v717_v28 = vsel %vm610_vm4, %v969_v16, %v1247_v57  ;;  %982 = vrcp.f32 %v672_v6 }
 0x2ce   :  { %v973_v22 = vpop.eup %972  ;;  %733 = vst [vmem:[%s1391_s7 + $0x50] sm:$0xff] %v717_v28  ;;  %v715_v23 = vsel %vm610_vm4, %v971_v11, %v1252_v62 }
 0x2cf   :  { %v975_v7 = vpop.eup %974  ;;  %731 = vst [vmem:[%s1391_s7 + $0x40] sm:$0xff] %v715_v23  ;;  %v718_v24 = vsel %vm610_vm4, %v973_v22, %v1256_v1 }
 0x2d0   :  { %734 = vst [vmem:[%s1391_s7 + $0x58] sm:$0xff] %v718_v24  ;;  %v716_v57 = vsel %vm610_vm4, %v975_v7, %v1259_v4 }
 0x2d1   :  { %732 = vst [vmem:[%s1391_s7 + $0x48] sm:$0xff] %v716_v57 }
 0x2d4   :  { %v977_v62 = vpop.eup %976 }
 0x2d5   :  { %v979_v25 = vpop.eup %978  ;;  %v721_v26 = vsel %vm610_vm4, %v977_v62, %v1274_v35 }
 0x2d6   :  { %v981_v31 = vpop.eup %980  ;;  %737 = vst [vmem:[%s1391_s7 + $0x70] sm:$0xff] %v721_v26  ;;  %v719_v1 = vsel %vm610_vm4, %v979_v25, %v1277_v39 }
 0x2d7   :  { %v983_v4 = vpop.eup %982  ;;  %735 = vst [vmem:[%s1391_s7 + $0x60] sm:$0xff] %v719_v1  ;;  %v722_v29 = vsel %vm610_vm4, %v981_v31, %v1281_v20 }
 0x2d8   :  { %738 = vst [vmem:[%s1391_s7 + $0x78] sm:$0xff] %v722_v29  ;;  %v720_v32 = vsel %vm610_vm4, %v983_v4, %v1284_v15 }
 0x2d9   :  { %736 = vst [vmem:[%s1391_s7 + $0x68] sm:$0xff] %v720_v32 }

// kernel: p2b_votenet_rpn_forward.3
= control target key start
LH: loop header
LB: loop body
LE: loop exit
PB: predicated region body
PF: predicated region fallthrough
CT: control target
= control target key end

     0   :  { %vm268_vm0 = vcmask 1041408   ;;  %vm571_vm1 = vcmask 1040384   ;;  %v3513_v1 = vmov 65535   ;;  %vm564_vm2 = vcmask 23552   ;;  %s4504_s3 = inlined_call_operand.vmem [shape: bf16[36,64], index: 3, kind: input, shape index: {}]   ;;  %s4505_s2 = inlined_call_operand.vmem [shape: bf16[3,64], index: 2, kind: input, shape index: {}]   ;;  %s4506_s1 = inlined_call_operand.vmem [shape: f32[32,3], index: 1, kind: input, shape index: {}]   ;;  %s4507_s0 = inlined_call_operand.vmem [shape: f32[512,36], index: 0, kind: input, shape index: {}]   ;;  %s4508_s5 = inlined_call_operand.vmem [shape: bf16[64,64], index: 5, kind: input, shape index: {}]   ;;  %s4509_s4 = inlined_call_operand.vmem [shape: f32[1,64], index: 4, kind: input, shape index: {}]   ;;  %s4510_s7 = inlined_call_operand.vmem [shape: bf16[64,64], index: 7, kind: input, shape index: {}]   ;;  %s4511_s6 = inlined_call_operand.vmem [shape: f32[1,64], index: 6, kind: input, shape index: {}]   ;;  %s4512_s8 = inlined_call_operand.vmem [shape: f32[1,64], index: 8, kind: input, shape index: {}]   ;;  %s4513_s9 = inlined_call_operand.vmem [shape: bf16[64,64], index: 9, kind: input, shape index: {}]   ;;  %s4514_s11 = inlined_call_operand.vmem [shape: bf16[64,64], index: 11, kind: input, shape index: {}]   ;;  %s4515_s13 = inlined_call_operand.vmem [shape: bf16[64,128], index: 13, kind: input, shape index: {}]   ;;  %s4516_s10 = inlined_call_operand.vmem [shape: f32[1,64], index: 10, kind: input, shape index: {}]   ;;  %s4517_s12 = inlined_call_operand.vmem [shape: f32[1,64], index: 12, kind: input, shape index: {}]   ;;  %s4518_s14 = inlined_call_operand.vmem [shape: f32[1,128], index: 14, kind: input, shape index: {}]   ;;  %s4519_s15 = inlined_call_operand.vmem [shape: f32[32,128], index: 15, kind: output, shape index: {}]  }
   0x1   :  { %v3485_v0 = vld [vmem:[%s4504_s3] sm:$0xff]   ;;  %v572_v2 = vsel %vm571_vm1, 4294967295, %v3513_v1  ;;  %v3486_v5 = vld [vmem:[%s4504_s3 + $0x8] sm:$0xff]   ;;  %v117_v10 = vld [vmem:[%s4506_s1 + $0x10] sm:$0xff]  ;;  %vm171_vm3 = vcmask 293888   ;;  %vm1256_vm4 = vcmask 523264  }
   0x2   :  { %v563_v3 = vld [vmem:[%s4505_s2] sm:$0x3]  ;;  %v573_v4 = vsel %vm268_vm0, %v572_v2, 0  ;;  %3218 = vmatprep.subr.bf16.mxu0 %v3485_v0  ;;  %v116_v8 = vld [vmem:[%s4506_s1 + $0x8] sm:$0xff]  ;;  %v118_v11 = vld [vmem:[%s4506_s1 + $0x18] sm:$0xff]  ;;  %vm2625_vm5 = vcmask 1041409  }
   0x3   :  { %v575_v6 = vand.u32 %v573_v4, %v563_v3  ;;  %v115_v7 = vld [vmem:[%s4506_s1] sm:$0xff]  ;;  %3219 = vmatpush3.bf16.msra.mxu0 %v3485_v0  ;;  %v562_v12 = vpack.c.bf16 %v118_v11, %v117_v10  ;;  %v3487_v13 = vld [vmem:[%s4504_s3 + $0x10] ss:$0 sps:$4 sm:$0x33]   ;;  %v52_v15 = vld [vmem:[%s4507_s0 + $0x8] sm:$0xff]  ;;  %vm2627_vm6 = vcmask 1042434  }
   0x4   :  { %v561_v9 = vpack.c.bf16 %v116_v8, %v115_v7  ;;  %3220 = vmatprep.subr.bf16.mxu0 %v3486_v5  ;;  %v51_v14 = vld [vmem:[%s4507_s0] sm:$0xff]  ;;  %v53_v17 = vld [vmem:[%s4507_s0 + $0x10] sm:$0xff]  ;;  %v54_v18 = vld [vmem:[%s4507_s0 + $0x18] sm:$0xff]  ;;  %v270_v19 = vsel %vm268_vm0, %v3487_v13, 0  ;;  %vm2629_vm7 = vcmask 1043459   ;;  %vm2631_vm8 = vcmask 1044484  }
   0x5   :  { %3288 = vmatprep.subr.bf16.mxu1 %v575_v6  ;;  %v119_v16 = vpack.c.bf16 %v52_v15, %v51_v14  ;;  %v55_v20 = vld [vmem:[%s4507_s0 + $0x20] sm:$0xff]  ;;  %v56_v21 = vld [vmem:[%s4507_s0 + $0x28] sm:$0xff]  ;;  %v120_v22 = vpack.c.bf16 %v54_v18, %v53_v17  ;;  %v57_v24 = vld [vmem:[%s4507_s0 + $0x30] sm:$0xff]  ;;  %vm2633_vm9 = vcmask 1045509   ;;  %vm2635_vm10 = vcmask 1046534  }
   0x6   :  { %3289 = vmatpush3.bf16.msra.mxu1 %v575_v6  ;;  %3290 = vmatprep.mubr.msk.bf16.mxu1 %vm564_vm2, %v561_v9  ;;  %v121_v23 = vpack.c.bf16 %v56_v21, %v55_v20  ;;  %v58_v25 = vld [vmem:[%s4507_s0 + $0x38] sm:$0xff]  ;;  %v59_v26 = vld [vmem:[%s4507_s0 + $0x40] sm:$0xff]  ;;  %v60_v27 = vld [vmem:[%s4507_s0 + $0x48] sm:$0xff]  ;;  %vm2637_vm11 = vcmask 1047559  }
   0x7   :  { %3221 = vmatpush3.bf16.msra.mxu0 %v3486_v5  ;;  %3224 = vmatprep.mubr.msk.bf16.mxu0 %vm171_vm3, %v119_v16  ;;  %v122_v28 = vpack.c.bf16 %v58_v25, %v57_v24  ;;  %v123_v29 = vpack.c.bf16 %v60_v27, %v59_v26  ;;  %v61_v30 = vld [vmem:[%s4507_s0 + $0x50] sm:$0xff]  ;;  %v62_v31 = vld [vmem:[%s4507_s0 + $0x58] sm:$0xff]  ;;  %v63_v32 = vld [vmem:[%s4507_s0 + $0x60] sm:$0xff] }
   0x8   :  { %3482 = vmatprep.subr.msk.bf16.mxu0 %vm268_vm0, %v3487_v13  ;;  %v64_v33 = vld [vmem:[%s4507_s0 + $0x68] sm:$0xff]  ;;  %v124_v34 = vpack.c.bf16 %v62_v31, %v61_v30  ;;  %v65_v36 = vld [vmem:[%s4507_s0 + $0x70] sm:$0xff]  ;;  %v66_v37 = vld [vmem:[%s4507_s0 + $0x78] sm:$0xff] }
   0x9   :  { %3291 = vmatmul.mubr.msk.bf16.vlgmr.msra.gmra.mrb[0].mxu1 %vm564_vm2, %v562_v12  ;;  %v125_v35 = vpack.c.bf16 %v64_v33, %v63_v32  ;;  %v67_v38 = vld [vmem:[%s4507_s0 + $0x80] sm:$0xff]  ;;  %v68_v39 = vld [vmem:[%s4507_s0 + $0x88] sm:$0xff]  ;;  %v126_v40 = vpack.c.bf16 %v66_v37, %v65_v36  ;;  %v69_v42 = vld [vmem:[%s4507_s0 + $0x90] sm:$0xff] }
   0xa   :  { %v127_v41 = vpack.c.bf16 %v68_v39, %v67_v38  ;;  %v70_v43 = vld [vmem:[%s4507_s0 + $0x98] sm:$0xff]  ;;  %v71_v44 = vld [vmem:[%s4507_s0 + $0xa0] sm:$0xff]  ;;  %v72_v45 = vld [vmem:[%s4507_s0 + $0xa8] sm:$0xff] }
   0xb   :  { %3223 = vmatpush3.bf16.msra.mxu0 %v270_v19  ;;  %v128_v46 = vpack.c.bf16 %v70_v43, %v69_v42  ;;  %v129_v47 = vpack.c.bf16 %v72_v45, %v71_v44  ;;  %v73_v48 = vld [vmem:[%s4507_s0 + $0xb0] sm:$0xff]  ;;  %v74_v49 = vld [vmem:[%s4507_s0 + $0xb8] sm:$0xff]  ;;  %v75_v50 = vld [vmem:[%s4507_s0 + $0xc0] sm:$0xff] }
   0xc   :  { %v76_v51 = vld [vmem:[%s4507_s0 + $0xc8] sm:$0xff]  ;;  %v130_v52 = vpack.c.bf16 %v74_v49, %v73_v48  ;;  %v77_v54 = vld [vmem:[%s4507_s0 + $0xd0] sm:$0xff]  ;;  %v78_v55 = vld [vmem:[%s4507_s0 + $0xd8] sm:$0xff] }
   0xd   :  { %v131_v53 = vpack.c.bf16 %v76_v51, %v75_v50  ;;  %v79_v56 = vld [vmem:[%s4507_s0 + $0xe0] sm:$0xff]  ;;  %v80_v57 = vld [vmem:[%s4507_s0 + $0xe8] sm:$0xff]  ;;  %v132_v58 = vpack.c.bf16 %v78_v55, %v77_v54  ;;  %v81_v60 = vld [vmem:[%s4507_s0 + $0xf0] sm:$0xff]  ;;  %v3514_v51 = vmov 1966171168  }
   0xe   :  { %3225 = vmatmul.mubr.msk.bf16.vlgmr.msra.gmra.mrb[0].mxu0 %vm171_vm3, %v120_v22  ;;  %v133_v59 = vpack.c.bf16 %v80_v57, %v79_v56  ;;  %v82_v61 = vld [vmem:[%s4507_s0 + $0xf8] sm:$0xff]  ;;  %v83_v62 = vld [vmem:[%s4507_s0 + $0x100] sm:$0xff]  ;;  %v84_v63 = vld [vmem:[%s4507_s0 + $0x108] sm:$0xff] }
   0xf   :  { %3228 = vmatprep.mubr.msk.bf16.mxu0 %vm171_vm3, %v121_v23  ;;  %v134_v0 = vpack.c.bf16 %v82_v61, %v81_v60  ;;  %v135_v1 = vpack.c.bf16 %v84_v63, %v83_v62  ;;  %v85_v2 = vld [vmem:[%s4507_s0 + $0x110] sm:$0xff]  ;;  %v86_v3 = vld [vmem:[%s4507_s0 + $0x118] sm:$0xff]  ;;  %v87_v4 = vld [vmem:[%s4507_s0 + $0x120] sm:$0xff] }
  0x10   :  { %v88_v5 = vld [vmem:[%s4507_s0 + $0x128] sm:$0xff]  ;;  %v136_v6 = vpack.c.bf16 %v86_v3, %v85_v2  ;;  %v89_v8 = vld [vmem:[%s4507_s0 + $0x130] sm:$0xff]  ;;  %v90_v9 = vld [vmem:[%s4507_s0 + $0x138] sm:$0xff] }
  0x11   :  { %v137_v7 = vpack.c.bf16 %v88_v5, %v87_v4  ;;  %v91_v10 = vld [vmem:[%s4507_s0 + $0x140] sm:$0xff]  ;;  %v92_v11 = vld [vmem:[%s4507_s0 + $0x148] sm:$0xff]  ;;  %v138_v12 = vpack.c.bf16 %v90_v9, %v89_v8  ;;  %v93_v14 = vld [vmem:[%s4507_s0 + $0x150] sm:$0xff] }
  0x12   :  { %v139_v13 = vpack.c.bf16 %v92_v11, %v91_v10  ;;  %v94_v15 = vld [vmem:[%s4507_s0 + $0x158] sm:$0xff]  ;;  %v95_v16 = vld [vmem:[%s4507_s0 + $0x160] sm:$0xff]  ;;  %v96_v17 = vld [vmem:[%s4507_s0 + $0x168] sm:$0xff] }
  0x13   :  { %v140_v18 = vpack.c.bf16 %v94_v15, %v93_v14  ;;  %v141_v19 = vpack.c.bf16 %v96_v17, %v95_v16  ;;  %v97_v20 = vld [vmem:[%s4507_s0 + $0x170] sm:$0xff]  ;;  %v98_v21 = vld [vmem:[%s4507_s0 + $0x178] sm:$0xff]  ;;  %v3488_v22 = vld [vmem:[%s4508_s5] sm:$0xff]  }
  0x14   :  { %3294 = vmatprep.subr.bf16.mxu1 %v3488_v22  ;;  %v99_v23 = vld [vmem:[%s4507_s0 + $0x180] sm:$0xff]  ;;  %v100_v24 = vld [vmem:[%s4507_s0 + $0x188] sm:$0xff]  ;;  %v142_v25 = vpack.c.bf16 %v98_v21, %v97_v20  ;;  %v102_v30 = vld [vmem:[%s4507_s0 + $0x198] sm:$0xff] }
  0x15   :  { %3295 = vmatpush3.bf16.msra.mxu1 %v3488_v22  ;;  %v3489_v26 = vld [vmem:[%s4508_s5 + $0x8] sm:$0xff]   ;;  %v143_v27 = vpack.c.bf16 %v100_v24, %v99_v23  ;;  %v103_v31 = vld [vmem:[%s4507_s0 + $0x1a0] sm:$0xff]  ;;  %v105_v36 = vld [vmem:[%s4507_s0 + $0x1b0] sm:$0xff] }
  0x16   :  { %3229 = vmatmul.mubr.msk.bf16.gmra.mrb[4].mxu0 %vm171_vm3, %v122_v28  ;;  %3296 = vmatprep.subr.bf16.mxu1 %v3489_v26  ;;  %v3490_v28 = vld [vmem:[%s4508_s5 + $0x10] sm:$0xff]   ;;  %v104_v32 = vld [vmem:[%s4507_s0 + $0x1a8] sm:$0xff]  ;;  %v106_v37 = vld [vmem:[%s4507_s0 + $0x1b8] sm:$0xff] }
  0x17   :  { %3232 = vmatprep.mubr.msk.bf16.mxu0 %vm171_vm3, %v123_v29  ;;  %v101_v29 = vld [vmem:[%s4507_s0 + $0x190] sm:$0xff]  ;;  %v107_v38 = vld [vmem:[%s4507_s0 + $0x1c0] sm:$0xff]  ;;  %v108_v39 = vld [vmem:[%s4507_s0 + $0x1c8] sm:$0xff] }
  0x18   :  { %v144_v33 = vpack.c.bf16 %v102_v30, %v101_v29  ;;  %v109_v42 = vld [vmem:[%s4507_s0 + $0x1d0] sm:$0xff]  ;;  %v110_v43 = vld [vmem:[%s4507_s0 + $0x1d8] sm:$0xff]  ;;  %v111_v44 = vld [vmem:[%s4507_s0 + $0x1e0] sm:$0xff] }
  0x19   :  { %3297 = vmatpush3.bf16.msra.mxu1 %v3489_v26  ;;  %v112_v45 = vld [vmem:[%s4507_s0 + $0x1e8] sm:$0xff]  ;;  %v113_v48 = vld [vmem:[%s4507_s0 + $0x1f0] sm:$0xff]  ;;  %v114_v49 = vld [vmem:[%s4507_s0 + $0x1f8] sm:$0xff] }
  0x1a   :  { %3298 = vmatprep.subr.bf16.mxu1 %v3490_v28  ;;  %v150_v50 = vpack.c.bf16 %v114_v49, %v113_v48 }
  0x1d   :  { %3299 = vmatpush3.bf16.msra.mxu1 %v3490_v28 }
  0x1e   :  { %3233 = vmatmul.mubr.msk.bf16.gmra.mrb[8].mxu0 %vm171_vm3, %v124_v34  ;;  %v145_v34 = vpack.c.bf16 %v104_v32, %v103_v31  ;;  %v3492_v32 = vld [vmem:[%s4510_s7] sm:$0xff]  }
  0x1f   :  { %3236 = vmatprep.mubr.msk.bf16.mxu0 %vm171_vm3, %v125_v35  ;;  %v3491_v35 = vld [vmem:[%s4508_s5 + $0x18] sm:$0xff]   ;;  %3366 = vmatprep.subr.bf16.mxu0 %v3492_v32 }
  0x20   :  { %3300 = vmatprep.subr.bf16.mxu1 %v3491_v35  ;;  %3367 = vmatpush3.bf16.msra.mxu0 %v3492_v32 }
  0x21   :  { %3301 = vmatpush3.bf16.msra.mxu1 %v3491_v35 }
  0x22   :  { %3474 = vmatprep.subr.bf16.mxu1 %v3492_v32 }
  0x26   :  { %3237 = vmatmul.mubr.msk.bf16.gmra.mrb[12].mxu0 %vm171_vm3, %v126_v40  ;;  %v146_v40 = vpack.c.bf16 %v106_v37, %v105_v36  ;;  %v3493_v36 = vld [vmem:[%s4510_s7 + $0x8] sm:$0xff]  }
  0x27   :  { %3240 = vmatprep.mubr.msk.bf16.mxu0 %vm171_vm3, %v127_v41  ;;  %v147_v41 = vpack.c.bf16 %v108_v39, %v107_v38  ;;  %3368 = vmatprep.subr.bf16.mxu0 %v3493_v36 }
  0x28   :  { %3369 = vmatpush3.bf16.msra.mxu0 %v3493_v36 }
  0x2e   :  { %3241 = vmatmul.mubr.msk.bf16.gmra.mrb[16].mxu0 %vm171_vm3, %v128_v46  ;;  %v148_v46 = vpack.c.bf16 %v110_v43, %v109_v42 }
  0x2f   :  { %3244 = vmatprep.mubr.msk.bf16.mxu0 %vm171_vm3, %v129_v47  ;;  %v149_v47 = vpack.c.bf16 %v112_v45, %v111_v44 }
  0x36   :  { %3245 = vmatmul.mubr.msk.bf16.gmra.mrb[20].mxu0 %vm171_vm3, %v130_v52  ;;  %v632_v52 = vunpack.c.l.s4 %v3514_v51  ;;  %v3920_v51 = vld [vmem:[%s4510_s7 + $0x10] sm:$0xff]  }
  0x37   :  { %3248 = vmatprep.mubr.msk.bf16.mxu0 %vm171_vm3, %v131_v53  ;;  %v634_v53 = vlaneseq  ;;  %3370 = vmatprep.subr.bf16.mxu0 %v3920_v51 }
  0x38   :  { %v633_v54 = vunpack.c.0.s8 %v632_v52  ;;  %3371 = vmatpush3.bf16.msra.mxu0 %v3920_v51 }
  0x39   :  { %v635_v55 = vshrl.u32 %v634_v53, 7 }
  0x3b   :  { %v3860_v56 = vsub.s32 %v633_v54, %v635_v55  ;;  %v3875_v4 = vsub.s32 0, %v635_v55 }
  0x3e   :  { %3249 = vmatmul.mubr.msk.bf16.gmra.mrb[24].mxu0 %vm171_vm3, %v132_v58 }
  0x3f   :  { %3252 = vmatprep.mubr.msk.bf16.mxu0 %vm171_vm3, %v133_v59 }
  0x46   :  { %3253 = vmatmul.mubr.msk.bf16.gmra.mrb[28].mxu0 %vm171_vm3, %v134_v0 }
  0x47   :  { %3256 = vmatprep.mubr.msk.bf16.mxu0 %vm171_vm3, %v135_v1 }
  0x4e   :  { %3257 = vmatmul.mubr.msk.bf16.gmra.mrb[32].mxu0 %vm171_vm3, %v136_v6 }
  0x4f   :  { %3260 = vmatprep.mubr.msk.bf16.mxu0 %vm171_vm3, %v137_v7 }
  0x56   :  { %3261 = vmatmul.mubr.msk.bf16.gmra.mrb[36].mxu0 %vm171_vm3, %v138_v12 }
  0x57   :  { %3264 = vmatprep.mubr.msk.bf16.mxu0 %vm171_vm3, %v139_v13 }
  0x5e   :  { %3265 = vmatmul.mubr.msk.bf16.gmra.mrb[40].mxu0 %vm171_vm3, %v140_v18  ;;  %v3895_v18 = vld [vmem:[%s4509_s4] ss:$0 sm:$0xff] }
  0x5f   :  { %3268 = vmatprep.mubr.msk.bf16.mxu0 %vm171_vm3, %v141_v19 }
  0x66   :  { %3269 = vmatmul.mubr.msk.bf16.gmra.mrb[44].mxu0 %vm171_vm3, %v142_v25 }
  0x67   :  { %3272 = vmatprep.mubr.msk.bf16.mxu0 %vm171_vm3, %v143_v27 }
  0x6e   :  { %3273 = vmatmul.mubr.msk.bf16.gmra.mrb[48].mxu0 %vm171_vm3, %v144_v33 }
  0x6f   :  { %3276 = vmatprep.mubr.msk.bf16.mxu0 %vm171_vm3, %v145_v34 }
  0x76   :  { %3277 = vmatmul.mubr.msk.bf16.gmra.mrb[52].mxu0 %vm171_vm3, %v146_v40 }
  0x77   :  { %3280 = vmatprep.mubr.msk.bf16.mxu0 %vm171_vm3, %v147_v41 }
  0x7e   :  { %3281 = vmatmul.mubr.msk.bf16.gmra.mrb[56].mxu0 %vm171_vm3, %v148_v46 }
  0x7f   :  { %3284 = vmatprep.mubr.msk.bf16.mxu0 %vm171_vm3, %v149_v47 }
  0x86   :  { %3285 = vmatmul.mubr.msk.bf16.gmra.mrb[60].mxu0 %vm171_vm3, %v150_v50 }
  0xdc   :  { %v3292_v57 = vpop.f32.mrb[0].mxu1 }
  0xdd   :  { %v728_v58 = vcombine.high %v3292_v57, %v3292_v57  ;;  %v3863_v59 = vrot.slane %v3292_v57, %v3860_v56  ;;  %v611_v60 = vpop.f32.mrb[1].mxu1 }
  0xde   :  { %v630_v61 = vcombine.high %v611_v60, %v611_v60  ;;  %v637_v62 = vrot.slane %v611_v60, %v3860_v56  ;;  %v3293_v63 = vpop.f32.mrb[2].mxu1 }
  0xdf   :  { %v3867_v0 = vrot.slane %v728_v58, %v3860_v56  ;;  %v3871_v1 = vrot.slane %v3863_v59, %v3860_v56  ;;  %v777_v2 = vcombine.high %v3293_v63, %v3293_v63  ;;  %v3873_v3 = vpop.f32.mrb[3].mxu1  ;;  %v3880_v8 = vrot.slane %v3293_v63, %v3860_v56 }
  0xe0   :  { %v644_v5 = vrot.slane %v630_v61, %v3860_v56  ;;  %v645_v6 = vcombine.high %v637_v62, %v637_v62  ;;  %v653_v7 = vrot.slane %v637_v62, %v3860_v56  ;;  %v3908_v33 = vrot.slane %v3873_v3, %v3860_v56 }
  0xe1   :  { %v3883_v9 = vrot.slane %v777_v2, %v3860_v56  ;;  %v3887_v10 = vrot.slane %v3880_v8, %v3860_v56  ;;  %v3226_v11 = vpop.f32.mrb[0].mxu0  ;;  %v743_v42 = vcombine.high %v3863_v59, %v3863_v59  ;;  %v744_v52 = vcombine.high %v3867_v0, %v3867_v0 }
  0xe2   :  { %v667_v12 = vrot.slane %v645_v6, %v3860_v56  ;;  %v646_v13 = vcombine.high %v644_v5, %v644_v5  ;;  %v306_v14 = vpop.f32.mrb[1].mxu0  ;;  %v829_v16 = vrot.slane %v653_v7, %v3875_v4  ;;  %v675_v21 = vcombine.high %v653_v7, %v653_v7 }
  0xe3   :  { %v3227_v17 = vpop.f32.mrb[2].mxu0  ;;  %v660_v27 = vrot.slane %v644_v5, %v3860_v56  ;;  %v792_v53 = vcombine.high %v3880_v8, %v3880_v8  ;;  %v793_v58 = vcombine.high %v3883_v9, %v3883_v9  ;;  %v694_v59 = vcombine.high %v3908_v33, %v3908_v33 }
  0xe4   :  { %v833_v15 = vrot.slane %v667_v12, %v3875_v4  ;;  %v309_v19 = vpop.f32.mrb[3].mxu0  ;;  %v677_v20 = vcombine.high %v667_v12, %v667_v12  ;;  %v986_v23 = vsub.f32 %v306_v14, %v829_v16  ;;  %v674_v26 = vrot.slane %v646_v13, %v3860_v56 }
  0xe5   :  { %v987_v25 = vsub.f32 %v309_v19, %v829_v16  ;;  %v837_v35 = vrot.slane %v675_v21, %v3875_v4  ;;  %v676_v50 = vcombine.high %v660_v27, %v660_v27  ;;  %v845_v2 = vrot.slane %v660_v27, %v3875_v4 }
  0xe6   :  { %v988_v22 = vsub.f32 %v3226_v11, %v833_v15  ;;  %v989_v24 = vsub.f32 %v3227_v17, %v833_v15  ;;  %v1057_v29 = vadd.f32 %v3895_v18, %v986_v23  ;;  %v841_v34 = vrot.slane %v677_v20, %v3875_v4 }
  0xe7   :  { %v1058_v31 = vadd.f32 %v3895_v18, %v987_v25  ;;  %v678_v45 = vcombine.high %v674_v26, %v674_v26  ;;  %v849_v63 = vrot.slane %v674_v26, %v3875_v4  ;;  %v3942_v7 = vrot.slane %v676_v50, %v3875_v4 }
  0xe8   :  { %v1059_v28 = vadd.f32 %v3895_v18, %v988_v22  ;;  %v1060_v30 = vadd.f32 %v3895_v18, %v989_v24  ;;  %v1121_v38 = vmax.f32 %v1057_v29, 0.0  ;;  %v765_v12 = vrot.slane %v743_v42, %v3860_v56 }
  0xe9   :  { %v1122_v40 = vmax.f32 %v1058_v31, 0.0  ;;  %v3230_v41 = vpop.f32.mrb[4].mxu0  ;;  %v3939_v6 = vrot.slane %v678_v45, %v3875_v4  ;;  %v3948_v13 = vrot.slane %v3871_v1, %v3875_v4  ;;  %v773_v17 = vcombine.high %v3871_v1, %v3871_v1 }
  0xea   :  { %v1123_v37 = vmax.f32 %v1059_v28, 0.0  ;;  %v1124_v39 = vmax.f32 %v1060_v30, 0.0  ;;  %v992_v43 = vsub.f32 %v3230_v41, %v841_v34  ;;  %v322_v44 = vpop.f32.mrb[5].mxu0  ;;  %v772_v19 = vrot.slane %v744_v52, %v3860_v56 }
  0xeb   :  { %v1185_v47 = vpack.c.bf16 %v1122_v40, %v1121_v38  ;;  %v990_v48 = vsub.f32 %v322_v44, %v837_v35  ;;  %v3231_v49 = vpop.f32.mrb[6].mxu0  ;;  %v3954_v23 = vrot.slane %v765_v12, %v3875_v4  ;;  %v775_v24 = vcombine.high %v765_v12, %v765_v12 }
  0xec   :  { %v1186_v46 = vpack.c.bf16 %v1124_v39, %v1123_v37  ;;  %v1063_v54 = vadd.f32 %v3895_v18, %v992_v43  ;;  %v993_v55 = vsub.f32 %v3231_v49, %v841_v34  ;;  %v325_v57 = vpop.f32.mrb[7].mxu0  ;;  %v3958_v28 = vrot.slane %v773_v17, %v3875_v4 }
  0xed   :  { %v1061_v60 = vadd.f32 %v3895_v18, %v990_v48  ;;  %v991_v61 = vsub.f32 %v325_v57, %v837_v35  ;;  %3302 = vmatprep.mubr.msk.bf16.mxu1 %vm1256_vm4, %v1185_v47  ;;  %v3961_v29 = vrot.slane %v772_v19, %v3875_v4  ;;  %v758_v34 = vrot.slane %v3867_v0, %v3860_v56 }
  0xee   :  { %v1064_v62 = vadd.f32 %v3895_v18, %v993_v55  ;;  %3303 = vmatmul.mubr.msk.bf16.vlgmr.msra.gmra.mrb[4].mxu1 %vm1256_vm4, %v1186_v46  ;;  %v1127_v8 = vmax.f32 %v1063_v54, 0.0  ;;  %v776_v38 = vcombine.high %v772_v19, %v772_v19  ;;  %v3991_v48 = vrot.slane %v3887_v10, %v3875_v4 }
  0xef   :  { %v1062_v5 = vadd.f32 %v3895_v18, %v991_v61  ;;  %3478 = vmatpush3.bf16.msra.mxu1 %v3492_v32  ;;  %v1125_v14 = vmax.f32 %v1061_v60, 0.0  ;;  %v3965_v32 = vrot.slane %v775_v24, %v3875_v4  ;;  %v3976_v41 = vrot.slane %v758_v34, %v3875_v4 }
  0xf0   :  { %v1128_v11 = vmax.f32 %v1064_v62, 0.0  ;;  %3475 = vmatprep.subr.bf16.mxu1 %v3493_v36  ;;  %v774_v42 = vcombine.high %v758_v34, %v758_v34  ;;  %v3980_v44 = vrot.slane %v776_v38, %v3875_v4  ;;  %v821_v54 = vrot.slane %v793_v58, %v3860_v56 }
  0xf1   :  { %v1126_v15 = vmax.f32 %v1062_v5, 0.0  ;;  %v3234_v16 = vpop.f32.mrb[8].mxu0  ;;  %v716_v61 = vrot.slane %v694_v59, %v3860_v56 }
  0xf2   :  { %v1188_v20 = vpack.c.bf16 %v1128_v11, %v1127_v8  ;;  %v996_v21 = vsub.f32 %v3234_v16, %v849_v63  ;;  %v338_v22 = vpop.f32.mrb[9].mxu0  ;;  %v3987_v47 = vrot.slane %v774_v42, %v3875_v4  ;;  %v825_v12 = vcombine.high %v821_v54, %v821_v54 }
  0xf3   :  { %v1187_v25 = vpack.c.bf16 %v1126_v15, %v1125_v14  ;;  %v994_v26 = vsub.f32 %v338_v22, %v845_v2  ;;  %v3235_v27 = vpop.f32.mrb[10].mxu0  ;;  %3479 = vmatpush3.bf16.msra.mxu1 %v3493_v36  ;;  %v814_v36 = vrot.slane %v792_v53, %v3860_v56  ;;  %v822_v53 = vcombine.high %v3887_v10, %v3887_v10 }
  0xf4   :  { %v1067_v1 = vadd.f32 %v3895_v18, %v996_v21  ;;  %v997_v30 = vsub.f32 %v3235_v27, %v849_v63  ;;  %v341_v31 = vpop.f32.mrb[11].mxu0  ;;  %3476 = vmatprep.subr.bf16.mxu1 %v3920_v51  ;;  %v702_v14 = vrot.slane %v3908_v33, %v3860_v56  ;;  %v679_v33 = vcombine.high %v3873_v3, %v3873_v3 }
  0xf5   :  { %v1065_v35 = vadd.f32 %v3895_v18, %v994_v26  ;;  %v995_v37 = vsub.f32 %v341_v31, %v845_v2  ;;  %3306 = vmatprep.mubr.msk.bf16.mxu1 %vm1256_vm4, %v1187_v25  ;;  %v3983_v45 = vrot.slane %v814_v36, %v3875_v4  ;;  %v824_v49 = vcombine.high %v814_v36, %v814_v36 }
  0xf6   :  { %v1131_v39 = vmax.f32 %v1067_v1, 0.0  ;;  %v1068_v40 = vadd.f32 %v3895_v18, %v997_v30  ;;  %3307 = vmatmul.mubr.msk.bf16.gmra.mrb[8].mxu1 %vm1256_vm4, %v1188_v20  ;;  %v4011_v58 = vrot.slane %v822_v53, %v3875_v4  ;;  %v865_v24 = vrot.slane %v716_v61, %v3875_v4 }
  0xf7   :  { %v1129_v0 = vmax.f32 %v1065_v35, 0.0  ;;  %v1066_v43 = vadd.f32 %v3895_v18, %v995_v37  ;;  %3480 = vmatpush3.bf16.msra.mxu1 %v3920_v51  ;;  %v807_v51 = vrot.slane %v3883_v9, %v3860_v56  ;;  %v4007_v62 = vrot.slane %v824_v49, %v3875_v4 }
  0xf8   :  { %v1132_v46 = vmax.f32 %v1068_v40, 0.0  ;;  %v4014_v9 = vrot.slane %v821_v54, %v3875_v4  ;;  %v861_v1 = vrot.slane %v702_v14, %v3875_v4  ;;  %v693_v36 = vrot.slane %v679_v33, %v3860_v56 }
  0xf9   :  { %v1130_v50 = vmax.f32 %v1066_v43, 0.0  ;;  %v3238_v52 = vpop.f32.mrb[12].mxu0  ;;  %v4019_v59 = vrot.slane %v807_v51, %v3875_v4  ;;  %v823_v17 = vcombine.high %v807_v51, %v807_v51  ;;  %v726_v42 = vcombine.high %v716_v61, %v716_v61 }
  0xfa   :  { %v1190_v55 = vpack.c.bf16 %v1132_v46, %v1131_v39  ;;  %v1000_v57 = vsub.f32 %v3238_v52, %v3939_v6  ;;  %v354_v60 = vpop.f32.mrb[13].mxu0  ;;  %v724_v46 = vcombine.high %v702_v14, %v702_v14  ;;  %v695_v52 = vcombine.high %v693_v36, %v693_v36 }
  0xfb   :  { %v1189_v10 = vpack.c.bf16 %v1130_v50, %v1129_v0  ;;  %v998_v63 = vsub.f32 %v354_v60, %v3942_v7  ;;  %v3239_v2 = vpop.f32.mrb[14].mxu0  ;;  %v4033_v21 = vrot.slane %v823_v17, %v3875_v4  ;;  %v873_v51 = vrot.slane %v726_v42, %v3875_v4 }
  0xfc   :  { %v1071_v5 = vadd.f32 %v3895_v18, %v1000_v57  ;;  %v1001_v8 = vsub.f32 %v3239_v2, %v3939_v6  ;;  %v357_v11 = vpop.f32.mrb[15].mxu0  ;;  %v4029_v6 = vrot.slane %v825_v12, %v3875_v4  ;;  %v869_v61 = vrot.slane %v724_v46, %v3875_v4 }
  0xfd   :  { %v1069_v15 = vadd.f32 %v3895_v18, %v998_v63  ;;  %v999_v16 = vsub.f32 %v357_v11, %v3942_v7  ;;  %3310 = vmatprep.mubr.msk.bf16.mxu1 %vm1256_vm4, %v1189_v10 }
  0xfe   :  { %v1072_v19 = vadd.f32 %v3895_v18, %v1001_v8  ;;  %3311 = vmatmul.mubr.msk.bf16.gmra.mrb[12].mxu1 %vm1256_vm4, %v1190_v55  ;;  %v1135_v22 = vmax.f32 %v1071_v5, 0.0 }
  0xff   :  { %v1070_v20 = vadd.f32 %v3895_v18, %v999_v16  ;;  %v1133_v25 = vmax.f32 %v1069_v15, 0.0  ;;  %v723_v16 = vrot.slane %v695_v52, %v3860_v56 }
 0x100   :  { %v1136_v7 = vmax.f32 %v1072_v19, 0.0 }
 0x101   :  { %v1134_v26 = vmax.f32 %v1070_v20, 0.0  ;;  %v3242_v27 = vpop.f32.mrb[16].mxu0  ;;  %v709_v20 = vrot.slane %v693_v36, %v3860_v56 }
 0x102   :  { %v1192_v30 = vpack.c.bf16 %v1136_v7, %v1135_v22  ;;  %v1004_v31 = vsub.f32 %v3242_v27, %v865_v24  ;;  %v370_v34 = vpop.f32.mrb[17].mxu0 }
 0x103   :  { %v1191_v35 = vpack.c.bf16 %v1134_v26, %v1133_v25  ;;  %v1002_v37 = vsub.f32 %v370_v34, %v861_v1  ;;  %v3243_v38 = vpop.f32.mrb[18].mxu0  ;;  %v881_v25 = vrot.slane %v723_v16, %v3875_v4 }
 0x104   :  { %v1075_v39 = vadd.f32 %v3895_v18, %v1004_v31  ;;  %v1005_v3 = vsub.f32 %v3243_v38, %v865_v24  ;;  %v373_v40 = vpop.f32.mrb[19].mxu0 }
 0x105   :  { %v1073_v0 = vadd.f32 %v3895_v18, %v1002_v37  ;;  %v1003_v43 = vsub.f32 %v373_v40, %v861_v1  ;;  %3314 = vmatprep.mubr.msk.bf16.mxu1 %vm1256_vm4, %v1191_v35  ;;  %v727_v40 = vcombine.high %v723_v16, %v723_v16 }
 0x106   :  { %v1076_v49 = vadd.f32 %v3895_v18, %v1005_v3  ;;  %3315 = vmatmul.mubr.msk.bf16.gmra.mrb[16].mxu1 %vm1256_vm4, %v1192_v30  ;;  %v1139_v53 = vmax.f32 %v1075_v39, 0.0  ;;  %v877_v30 = vrot.slane %v709_v20, %v3875_v4 }
 0x107   :  { %v1074_v50 = vadd.f32 %v3895_v18, %v1003_v43  ;;  %v1137_v55 = vmax.f32 %v1073_v0, 0.0  ;;  %v725_v43 = vcombine.high %v709_v20, %v709_v20 }
 0x108   :  { %v1140_v54 = vmax.f32 %v1076_v49, 0.0 }
 0x109   :  { %v1138_v57 = vmax.f32 %v1074_v50, 0.0  ;;  %v3246_v60 = vpop.f32.mrb[20].mxu0 }
 0x10a   :  { %v1194_v10 = vpack.c.bf16 %v1140_v54, %v1139_v53  ;;  %v1008_v63 = vsub.f32 %v3246_v60, %v873_v51  ;;  %v386_v2 = vpop.f32.mrb[21].mxu0  ;;  %v889_v53 = vrot.slane %v727_v40, %v3875_v4 }
 0x10b   :  { %v1193_v5 = vpack.c.bf16 %v1138_v57, %v1137_v55  ;;  %v1006_v8 = vsub.f32 %v386_v2, %v869_v61  ;;  %v3247_v11 = vpop.f32.mrb[22].mxu0  ;;  %v885_v57 = vrot.slane %v725_v43, %v3875_v4 }
 0x10c   :  { %v1079_v12 = vadd.f32 %v3895_v18, %v1008_v63  ;;  %v1009_v14 = vsub.f32 %v3247_v11, %v873_v51  ;;  %v389_v15 = vpop.f32.mrb[23].mxu0 }
 0x10d   :  { %v1077_v17 = vadd.f32 %v3895_v18, %v1006_v8  ;;  %v1007_v19 = vsub.f32 %v389_v15, %v869_v61  ;;  %3318 = vmatprep.mubr.msk.bf16.mxu1 %vm1256_vm4, %v1193_v5 }
 0x10e   :  { %v1080_v33 = vadd.f32 %v3895_v18, %v1009_v14  ;;  %3319 = vmatmul.mubr.msk.bf16.gmra.mrb[20].mxu1 %vm1256_vm4, %v1194_v10  ;;  %v1143_v7 = vmax.f32 %v1079_v12, 0.0 }
 0x10f   :  { %v1078_v22 = vadd.f32 %v3895_v18, %v1007_v19  ;;  %v1141_v26 = vmax.f32 %v1077_v17, 0.0 }
 0x110   :  { %v1144_v24 = vmax.f32 %v1080_v33, 0.0 }
 0x111   :  { %v1142_v27 = vmax.f32 %v1078_v22, 0.0  ;;  %v3250_v1 = vpop.f32.mrb[24].mxu0 }
 0x112   :  { %v1196_v31 = vpack.c.bf16 %v1144_v24, %v1143_v7  ;;  %v1012_v34 = vsub.f32 %v3250_v1, %v881_v25  ;;  %v402_v35 = vpop.f32.mrb[25].mxu0 }
 0x113   :  { %v1195_v37 = vpack.c.bf16 %v1142_v27, %v1141_v26  ;;  %v1010_v56 = vsub.f32 %v402_v35, %v877_v30  ;;  %v3251_v38 = vpop.f32.mrb[26].mxu0 }
 0x114   :  { %v1083_v36 = vadd.f32 %v3895_v18, %v1012_v34  ;;  %v1013_v39 = vsub.f32 %v3251_v38, %v881_v25  ;;  %v405_v3 = vpop.f32.mrb[27].mxu0 }
 0x115   :  { %v1081_v42 = vadd.f32 %v3895_v18, %v1010_v56  ;;  %v1011_v0 = vsub.f32 %v405_v3, %v877_v30  ;;  %3322 = vmatprep.mubr.msk.bf16.mxu1 %vm1256_vm4, %v1195_v37 }
 0x116   :  { %v1084_v46 = vadd.f32 %v3895_v18, %v1013_v39  ;;  %3323 = vmatmul.mubr.msk.bf16.gmra.mrb[24].mxu1 %vm1256_vm4, %v1196_v31  ;;  %v1147_v50 = vmax.f32 %v1083_v36, 0.0 }
 0x117   :  { %v1082_v49 = vadd.f32 %v3895_v18, %v1011_v0  ;;  %v1145_v54 = vmax.f32 %v1081_v42, 0.0 }
 0x118   :  { %v1148_v52 = vmax.f32 %v1084_v46, 0.0 }
 0x119   :  { %v1146_v51 = vmax.f32 %v1082_v49, 0.0  ;;  %v3254_v55 = vpop.f32.mrb[28].mxu0 }
 0x11a   :  { %v1198_v60 = vpack.c.bf16 %v1148_v52, %v1147_v50  ;;  %v1016_v61 = vsub.f32 %v3254_v55, %v889_v53  ;;  %v418_v10 = vpop.f32.mrb[29].mxu0 }
 0x11b   :  { %v1197_v63 = vpack.c.bf16 %v1146_v51, %v1145_v54  ;;  %v1014_v2 = vsub.f32 %v418_v10, %v885_v57  ;;  %v3255_v5 = vpop.f32.mrb[30].mxu0 }
 0x11c   :  { %v1087_v8 = vadd.f32 %v3895_v18, %v1016_v61  ;;  %v1017_v11 = vsub.f32 %v3255_v5, %v889_v53  ;;  %v421_v12 = vpop.f32.mrb[31].mxu0 }
 0x11d   :  { %v1085_v14 = vadd.f32 %v3895_v18, %v1014_v2  ;;  %v1015_v15 = vsub.f32 %v421_v12, %v885_v57  ;;  %3326 = vmatprep.mubr.msk.bf16.mxu1 %vm1256_vm4, %v1197_v63 }
 0x11e   :  { %v1088_v16 = vadd.f32 %v3895_v18, %v1017_v11  ;;  %3327 = vmatmul.mubr.msk.bf16.gmra.mrb[28].mxu1 %vm1256_vm4, %v1198_v60  ;;  %v1151_v17 = vmax.f32 %v1087_v8, 0.0 }
 0x11f   :  { %v1086_v4 = vadd.f32 %v3895_v18, %v1015_v15  ;;  %v1149_v20 = vmax.f32 %v1085_v14, 0.0 }
 0x120   :  { %v1152_v19 = vmax.f32 %v1088_v16, 0.0 }
 0x121   :  { %v1150_v33 = vmax.f32 %v1086_v4, 0.0  ;;  %v3258_v22 = vpop.f32.mrb[32].mxu0 }
 0x122   :  { %v1200_v7 = vpack.c.bf16 %v1152_v19, %v1151_v17  ;;  %v1020_v24 = vsub.f32 %v3258_v22, %v3954_v23  ;;  %v434_v25 = vpop.f32.mrb[33].mxu0 }
 0x123   :  { %v1199_v26 = vpack.c.bf16 %v1150_v33, %v1149_v20  ;;  %v1018_v27 = vsub.f32 %v434_v25, %v3948_v13  ;;  %v3259_v1 = vpop.f32.mrb[34].mxu0 }
 0x124   :  { %v1091_v30 = vadd.f32 %v3895_v18, %v1020_v24  ;;  %v1021_v31 = vsub.f32 %v3259_v1, %v3954_v23  ;;  %v437_v34 = vpop.f32.mrb[35].mxu0 }
 0x125   :  { %v1089_v35 = vadd.f32 %v3895_v18, %v1018_v27  ;;  %v1019_v37 = vsub.f32 %v437_v34, %v3948_v13  ;;  %3330 = vmatprep.mubr.msk.bf16.mxu1 %vm1256_vm4, %v1199_v26 }
 0x126   :  { %v1092_v56 = vadd.f32 %v3895_v18, %v1021_v31  ;;  %3331 = vmatmul.mubr.msk.bf16.gmra.mrb[32].mxu1 %vm1256_vm4, %v1200_v7  ;;  %v1155_v36 = vmax.f32 %v1091_v30, 0.0 }
 0x127   :  { %v1090_v38 = vadd.f32 %v3895_v18, %v1019_v37  ;;  %v1153_v3 = vmax.f32 %v1089_v35, 0.0 }
 0x128   :  { %v1156_v39 = vmax.f32 %v1092_v56, 0.0 }
 0x129   :  { %v1154_v40 = vmax.f32 %v1090_v38, 0.0  ;;  %v3262_v42 = vpop.f32.mrb[36].mxu0 }
 0x12a   :  { %v1202_v0 = vpack.c.bf16 %v1156_v39, %v1155_v36  ;;  %v1024_v23 = vsub.f32 %v3262_v42, %v3965_v32  ;;  %v450_v43 = vpop.f32.mrb[37].mxu0 }
 0x12b   :  { %v1201_v46 = vpack.c.bf16 %v1154_v40, %v1153_v3  ;;  %v1022_v13 = vsub.f32 %v450_v43, %v3958_v28  ;;  %v3263_v49 = vpop.f32.mrb[38].mxu0 }
 0x12c   :  { %v1095_v50 = vadd.f32 %v3895_v18, %v1024_v23  ;;  %v1025_v52 = vsub.f32 %v3263_v49, %v3965_v32  ;;  %v453_v53 = vpop.f32.mrb[39].mxu0 }
 0x12d   :  { %v1093_v54 = vadd.f32 %v3895_v18, %v1022_v13  ;;  %v1023_v51 = vsub.f32 %v453_v53, %v3958_v28  ;;  %3334 = vmatprep.mubr.msk.bf16.mxu1 %vm1256_vm4, %v1201_v46 }
 0x12e   :  { %v1096_v55 = vadd.f32 %v3895_v18, %v1025_v52  ;;  %3335 = vmatmul.mubr.msk.bf16.gmra.mrb[36].mxu1 %vm1256_vm4, %v1202_v0  ;;  %v1159_v60 = vmax.f32 %v1095_v50, 0.0 }
 0x12f   :  { %v1094_v57 = vadd.f32 %v3895_v18, %v1023_v51  ;;  %v1157_v10 = vmax.f32 %v1093_v54, 0.0 }
 0x130   :  { %v1160_v61 = vmax.f32 %v1096_v55, 0.0 }
 0x131   :  { %v1158_v63 = vmax.f32 %v1094_v57, 0.0  ;;  %v3266_v2 = vpop.f32.mrb[40].mxu0 }
 0x132   :  { %v1204_v5 = vpack.c.bf16 %v1160_v61, %v1159_v60  ;;  %v1028_v32 = vsub.f32 %v3266_v2, %v3961_v29  ;;  %v466_v8 = vpop.f32.mrb[41].mxu0 }
 0x133   :  { %v1203_v11 = vpack.c.bf16 %v1158_v63, %v1157_v10  ;;  %v1026_v28 = vsub.f32 %v466_v8, %v3976_v41  ;;  %v3267_v12 = vpop.f32.mrb[42].mxu0 }
 0x134   :  { %v1099_v14 = vadd.f32 %v3895_v18, %v1028_v32  ;;  %v1029_v15 = vsub.f32 %v3267_v12, %v3961_v29  ;;  %v469_v16 = vpop.f32.mrb[43].mxu0 }
 0x135   :  { %v1097_v4 = vadd.f32 %v3895_v18, %v1026_v28  ;;  %v1027_v17 = vsub.f32 %v469_v16, %v3976_v41  ;;  %3338 = vmatprep.mubr.msk.bf16.mxu1 %vm1256_vm4, %v1203_v11 }
 0x136   :  { %v1100_v19 = vadd.f32 %v3895_v18, %v1029_v15  ;;  %3339 = vmatmul.mubr.msk.bf16.gmra.mrb[40].mxu1 %vm1256_vm4, %v1204_v5  ;;  %v1163_v33 = vmax.f32 %v1099_v14, 0.0 }
 0x137   :  { %v1098_v20 = vadd.f32 %v3895_v18, %v1027_v17  ;;  %v1161_v7 = vmax.f32 %v1097_v4, 0.0 }
 0x138   :  { %v1164_v22 = vmax.f32 %v1100_v19, 0.0 }
 0x139   :  { %v1162_v24 = vmax.f32 %v1098_v20, 0.0  ;;  %v3270_v25 = vpop.f32.mrb[44].mxu0 }
 0x13a   :  { %v1206_v26 = vpack.c.bf16 %v1164_v22, %v1163_v33  ;;  %v1032_v29 = vsub.f32 %v3270_v25, %v3980_v44  ;;  %v482_v27 = vpop.f32.mrb[45].mxu0 }
 0x13b   :  { %v1205_v1 = vpack.c.bf16 %v1162_v24, %v1161_v7  ;;  %v1030_v41 = vsub.f32 %v482_v27, %v3987_v47  ;;  %v3271_v30 = vpop.f32.mrb[46].mxu0 }
 0x13c   :  { %v1103_v31 = vadd.f32 %v3895_v18, %v1032_v29  ;;  %v1033_v34 = vsub.f32 %v3271_v30, %v3980_v44  ;;  %v485_v35 = vpop.f32.mrb[47].mxu0 }
 0x13d   :  { %v1101_v37 = vadd.f32 %v3895_v18, %v1030_v41  ;;  %v1031_v56 = vsub.f32 %v485_v35, %v3987_v47  ;;  %3342 = vmatprep.mubr.msk.bf16.mxu1 %vm1256_vm4, %v1205_v1 }
 0x13e   :  { %v1104_v38 = vadd.f32 %v3895_v18, %v1033_v34  ;;  %3343 = vmatmul.mubr.msk.bf16.gmra.mrb[44].mxu1 %vm1256_vm4, %v1206_v26  ;;  %v1167_v39 = vmax.f32 %v1103_v31, 0.0 }
 0x13f   :  { %v1102_v36 = vadd.f32 %v3895_v18, %v1031_v56  ;;  %v1165_v40 = vmax.f32 %v1101_v37, 0.0 }
 0x140   :  { %v1168_v3 = vmax.f32 %v1104_v38, 0.0 }
 0x141   :  { %v1166_v42 = vmax.f32 %v1102_v36, 0.0  ;;  %v3274_v0 = vpop.f32.mrb[48].mxu0 }
 0x142   :  { %v1208_v23 = vpack.c.bf16 %v1168_v3, %v1167_v39  ;;  %v1036_v44 = vsub.f32 %v3274_v0, %v3983_v45  ;;  %v498_v43 = vpop.f32.mrb[49].mxu0 }
 0x143   :  { %v1207_v46 = vpack.c.bf16 %v1166_v42, %v1165_v40  ;;  %v1034_v47 = vsub.f32 %v498_v43, %v3991_v48  ;;  %v3275_v13 = vpop.f32.mrb[50].mxu0 }
 0x144   :  { %v1107_v49 = vadd.f32 %v3895_v18, %v1036_v44  ;;  %v1037_v50 = vsub.f32 %v3275_v13, %v3983_v45  ;;  %v501_v52 = vpop.f32.mrb[51].mxu0  ;;  %v3495_v45 = vld [vmem:[%s4510_s7 + $0x18] sm:$0xff]  }
 0x145   :  { %v1105_v53 = vadd.f32 %v3895_v18, %v1034_v47  ;;  %v1035_v54 = vsub.f32 %v501_v52, %v3991_v48  ;;  %3346 = vmatprep.mubr.msk.bf16.mxu1 %vm1256_vm4, %v1207_v46  ;;  %3372 = vmatprep.subr.bf16.mxu0 %v3495_v45 }
 0x146   :  { %v1108_v51 = vadd.f32 %v3895_v18, %v1037_v50  ;;  %3347 = vmatmul.mubr.msk.bf16.gmra.mrb[48].mxu1 %vm1256_vm4, %v1208_v23  ;;  %v1171_v57 = vmax.f32 %v1107_v49, 0.0  ;;  %3477 = vmatprep.subr.bf16.mxu1 %v3495_v45 }
 0x147   :  { %v1106_v55 = vadd.f32 %v3895_v18, %v1035_v54  ;;  %v1169_v61 = vmax.f32 %v1105_v53, 0.0  ;;  %3373 = vmatpush3.bf16.msra.mxu0 %v3495_v45  ;;  %3481 = vmatpush3.bf16.msra.mxu1 %v3495_v45 }
 0x148   :  { %v1172_v60 = vmax.f32 %v1108_v51, 0.0 }
 0x149   :  { %v1170_v10 = vmax.f32 %v1106_v55, 0.0  ;;  %v3278_v63 = vpop.f32.mrb[52].mxu0 }
 0x14a   :  { %v1210_v2 = vpack.c.bf16 %v1172_v60, %v1171_v57  ;;  %v1040_v48 = vsub.f32 %v3278_v63, %v4007_v62  ;;  %v514_v5 = vpop.f32.mrb[53].mxu0 }
 0x14b   :  { %v1209_v32 = vpack.c.bf16 %v1170_v10, %v1169_v61  ;;  %v1038_v8 = vsub.f32 %v514_v5, %v4011_v58  ;;  %v3279_v11 = vpop.f32.mrb[54].mxu0 }
 0x14c   :  { %v1111_v28 = vadd.f32 %v3895_v18, %v1040_v48  ;;  %v1041_v12 = vsub.f32 %v3279_v11, %v4007_v62  ;;  %v517_v14 = vpop.f32.mrb[55].mxu0 }
 0x14d   :  { %v1109_v15 = vadd.f32 %v3895_v18, %v1038_v8  ;;  %v1039_v16 = vsub.f32 %v517_v14, %v4011_v58  ;;  %3350 = vmatprep.mubr.msk.bf16.mxu1 %vm1256_vm4, %v1209_v32 }
 0x14e   :  { %v1112_v4 = vadd.f32 %v3895_v18, %v1041_v12  ;;  %3351 = vmatmul.mubr.msk.bf16.gmra.mrb[52].mxu1 %vm1256_vm4, %v1210_v2  ;;  %v1175_v19 = vmax.f32 %v1111_v28, 0.0 }
 0x14f   :  { %v1110_v17 = vadd.f32 %v3895_v18, %v1039_v16  ;;  %v1173_v33 = vmax.f32 %v1109_v15, 0.0 }
 0x150   :  { %v1176_v20 = vmax.f32 %v1112_v4, 0.0 }
 0x151   :  { %v1174_v22 = vmax.f32 %v1110_v17, 0.0  ;;  %v3282_v62 = vpop.f32.mrb[56].mxu0 }
 0x152   :  { %v1212_v7 = vpack.c.bf16 %v1176_v20, %v1175_v19  ;;  %v1044_v24 = vsub.f32 %v3282_v62, %v4014_v9  ;;  %v530_v25 = vpop.f32.mrb[57].mxu0 }
 0x153   :  { %v1211_v26 = vpack.c.bf16 %v1174_v22, %v1173_v33  ;;  %v1042_v58 = vsub.f32 %v530_v25, %v4019_v59  ;;  %v3283_v29 = vpop.f32.mrb[58].mxu0 }
 0x154   :  { %v1115_v27 = vadd.f32 %v3895_v18, %v1044_v24  ;;  %v1045_v1 = vsub.f32 %v3283_v29, %v4014_v9  ;;  %v533_v41 = vpop.f32.mrb[59].mxu0 }
 0x155   :  { %v1113_v30 = vadd.f32 %v3895_v18, %v1042_v58  ;;  %v1043_v31 = vsub.f32 %v533_v41, %v4019_v59  ;;  %3354 = vmatprep.mubr.msk.bf16.mxu1 %vm1256_vm4, %v1211_v26 }
 0x156   :  { %v1116_v34 = vadd.f32 %v3895_v18, %v1045_v1  ;;  %3355 = vmatmul.mubr.msk.bf16.gmra.mrb[56].mxu1 %vm1256_vm4, %v1212_v7  ;;  %v1179_v37 = vmax.f32 %v1115_v27, 0.0 }
 0x157   :  { %v1114_v35 = vadd.f32 %v3895_v18, %v1043_v31  ;;  %v1177_v38 = vmax.f32 %v1113_v30, 0.0 }
 0x158   :  { %v1180_v56 = vmax.f32 %v1116_v34, 0.0 }
 0x159   :  { %v1178_v36 = vmax.f32 %v1114_v35, 0.0  ;;  %v3286_v39 = vpop.f32.mrb[60].mxu0 }
 0x15a   :  { %v1214_v3 = vpack.c.bf16 %v1180_v56, %v1179_v37  ;;  %v1048_v9 = vsub.f32 %v3286_v39, %v4029_v6  ;;  %v546_v40 = vpop.f32.mrb[61].mxu0 }
 0x15b   :  { %v1213_v42 = vpack.c.bf16 %v1178_v36, %v1177_v38  ;;  %v1046_v59 = vsub.f32 %v546_v40, %v4033_v21  ;;  %v3287_v0 = vpop.f32.mrb[62].mxu0 }
 0x15c   :  { %v1119_v23 = vadd.f32 %v3895_v18, %v1048_v9  ;;  %v1049_v44 = vsub.f32 %v3287_v0, %v4029_v6  ;;  %v549_v43 = vpop.f32.mrb[63].mxu0  ;;  %v4160_v6 = vld [vmem:[%s4511_s6] ss:$0 sm:$0xff] }
 0x15d   :  { %v1117_v46 = vadd.f32 %v3895_v18, %v1046_v59  ;;  %v1047_v47 = vsub.f32 %v549_v43, %v4033_v21  ;;  %3358 = vmatprep.mubr.msk.bf16.mxu1 %vm1256_vm4, %v1213_v42 }
 0x15e   :  { %v1120_v13 = vadd.f32 %v3895_v18, %v1049_v44  ;;  %3359 = vmatmul.mubr.msk.bf16.gmra.mrb[60].mxu1 %vm1256_vm4, %v1214_v3  ;;  %v1183_v50 = vmax.f32 %v1119_v23, 0.0 }
 0x15f   :  { %v1118_v49 = vadd.f32 %v3895_v18, %v1047_v47  ;;  %v1181_v53 = vmax.f32 %v1117_v46, 0.0 }
 0x160   :  { %v1184_v52 = vmax.f32 %v1120_v13, 0.0 }
 0x161   :  { %v1182_v54 = vmax.f32 %v1118_v49, 0.0 }
 0x162   :  { %v1216_v51 = vpack.c.bf16 %v1184_v52, %v1183_v50 }
 0x163   :  { %v1215_v55 = vpack.c.bf16 %v1182_v54, %v1181_v53 }
 0x165   :  { %3362 = vmatprep.mubr.msk.bf16.mxu1 %vm1256_vm4, %v1215_v55 }
 0x166   :  { %3363 = vmatmul.mubr.msk.bf16.gmra.mrb[64].mxu1 %vm1256_vm4, %v1216_v51 }
 0x1c1   :  { %v3304_v21 = vpop.f32.mrb[4].mxu1 }
 0x1c2   :  { %v1396_v57 = vadd.f32 %v3304_v21, %v4160_v6  ;;  %v1387_v60 = vpop.f32.mrb[5].mxu1 }
 0x1c3   :  { %v1388_v18 = vadd.f32 %v4160_v6, %v1387_v60  ;;  %v3305_v61 = vpop.f32.mrb[6].mxu1 }
 0x1c4   :  { %v1399_v10 = vadd.f32 %v3305_v61, %v4160_v6  ;;  %v1390_v63 = vpop.f32.mrb[7].mxu1  ;;  %v1644_v2 = vmax.f32 %v1396_v57, 0.0 }
 0x1c5   :  { %v1391_v45 = vadd.f32 %v4160_v6, %v1390_v63  ;;  %v1642_v5 = vmax.f32 %v1388_v18, 0.0 }
 0x1c6   :  { %v1645_v48 = vmax.f32 %v1399_v10, 0.0 }
 0x1c7   :  { %v1643_v32 = vmax.f32 %v1391_v45, 0.0 }
 0x1c8   :  { %v1707_v8 = vpack.c.bf16 %v1645_v48, %v1644_v2 }
 0x1c9   :  { %v1706_v11 = vpack.c.bf16 %v1643_v32, %v1642_v5  ;;  %v3308_v28 = vpop.f32.mrb[8].mxu1 }
 0x1ca   :  { %v1412_v12 = vadd.f32 %v3308_v28, %v4160_v6  ;;  %v1403_v14 = vpop.f32.mrb[9].mxu1 }
 0x1cb   :  { %v1404_v15 = vadd.f32 %v4160_v6, %v1403_v14  ;;  %v3309_v16 = vpop.f32.mrb[10].mxu1  ;;  %3374 = vmatprep.mubr.msk.bf16.mxu0 %vm1256_vm4, %v1706_v11 }
 0x1cc   :  { %v1415_v4 = vadd.f32 %v3309_v16, %v4160_v6  ;;  %v1406_v17 = vpop.f32.mrb[11].mxu1  ;;  %3375 = vmatmul.mubr.msk.bf16.vlgmr.msra.gmra.mrb[64].mxu0 %vm1256_vm4, %v1707_v8  ;;  %v1648_v20 = vmax.f32 %v1412_v12, 0.0 }
 0x1cd   :  { %v1407_v19 = vadd.f32 %v4160_v6, %v1406_v17  ;;  %v1646_v22 = vmax.f32 %v1404_v15, 0.0 }
 0x1ce   :  { %v1649_v33 = vmax.f32 %v1415_v4, 0.0 }
 0x1cf   :  { %v1647_v62 = vmax.f32 %v1407_v19, 0.0 }
 0x1d0   :  { %v1709_v7 = vpack.c.bf16 %v1649_v33, %v1648_v20 }
 0x1d1   :  { %v1708_v24 = vpack.c.bf16 %v1647_v62, %v1646_v22  ;;  %v3312_v25 = vpop.f32.mrb[12].mxu1 }
 0x1d2   :  { %v1428_v26 = vadd.f32 %v3312_v25, %v4160_v6  ;;  %v1419_v58 = vpop.f32.mrb[13].mxu1 }
 0x1d3   :  { %v1420_v29 = vadd.f32 %v4160_v6, %v1419_v58  ;;  %v3313_v27 = vpop.f32.mrb[14].mxu1  ;;  %3378 = vmatprep.mubr.msk.bf16.mxu0 %vm1256_vm4, %v1708_v24 }
 0x1d4   :  { %v1431_v1 = vadd.f32 %v3313_v27, %v4160_v6  ;;  %v1422_v41 = vpop.f32.mrb[15].mxu1  ;;  %3379 = vmatmul.mubr.msk.bf16.gmra.mrb[68].mxu0 %vm1256_vm4, %v1709_v7  ;;  %v1652_v31 = vmax.f32 %v1428_v26, 0.0 }
 0x1d5   :  { %v1423_v30 = vadd.f32 %v4160_v6, %v1422_v41  ;;  %v1650_v35 = vmax.f32 %v1420_v29, 0.0 }
 0x1d6   :  { %v1653_v34 = vmax.f32 %v1431_v1, 0.0 }
 0x1d7   :  { %v1651_v37 = vmax.f32 %v1423_v30, 0.0 }
 0x1d8   :  { %v1711_v56 = vpack.c.bf16 %v1653_v34, %v1652_v31 }
 0x1d9   :  { %v1710_v38 = vpack.c.bf16 %v1651_v37, %v1650_v35  ;;  %v3316_v36 = vpop.f32.mrb[16].mxu1 }
 0x1da   :  { %v1444_v39 = vadd.f32 %v3316_v36, %v4160_v6  ;;  %v1435_v3 = vpop.f32.mrb[17].mxu1 }
 0x1db   :  { %v1436_v9 = vadd.f32 %v4160_v6, %v1435_v3  ;;  %v3317_v40 = vpop.f32.mrb[18].mxu1  ;;  %3382 = vmatprep.mubr.msk.bf16.mxu0 %vm1256_vm4, %v1710_v38 }
 0x1dc   :  { %v1447_v42 = vadd.f32 %v3317_v40, %v4160_v6  ;;  %v1438_v59 = vpop.f32.mrb[19].mxu1  ;;  %3383 = vmatmul.mubr.msk.bf16.gmra.mrb[72].mxu0 %vm1256_vm4, %v1711_v56  ;;  %v1656_v23 = vmax.f32 %v1444_v39, 0.0 }
 0x1dd   :  { %v1439_v0 = vadd.f32 %v4160_v6, %v1438_v59  ;;  %v1654_v43 = vmax.f32 %v1436_v9, 0.0 }
 0x1de   :  { %v1657_v44 = vmax.f32 %v1447_v42, 0.0 }
 0x1df   :  { %v1655_v46 = vmax.f32 %v1439_v0, 0.0 }
 0x1e0   :  { %v1713_v47 = vpack.c.bf16 %v1657_v44, %v1656_v23 }
 0x1e1   :  { %v1712_v13 = vpack.c.bf16 %v1655_v46, %v1654_v43  ;;  %v3320_v49 = vpop.f32.mrb[20].mxu1 }
 0x1e2   :  { %v1460_v50 = vadd.f32 %v3320_v49, %v4160_v6  ;;  %v1451_v52 = vpop.f32.mrb[21].mxu1 }
 0x1e3   :  { %v1452_v53 = vadd.f32 %v4160_v6, %v1451_v52  ;;  %v3321_v54 = vpop.f32.mrb[22].mxu1  ;;  %3386 = vmatprep.mubr.msk.bf16.mxu0 %vm1256_vm4, %v1712_v13 }
 0x1e4   :  { %v1463_v51 = vadd.f32 %v3321_v54, %v4160_v6  ;;  %v1454_v55 = vpop.f32.mrb[23].mxu1  ;;  %3387 = vmatmul.mubr.msk.bf16.gmra.mrb[76].mxu0 %vm1256_vm4, %v1713_v47  ;;  %v1660_v57 = vmax.f32 %v1460_v50, 0.0 }
 0x1e5   :  { %v1455_v21 = vadd.f32 %v4160_v6, %v1454_v55  ;;  %v1658_v18 = vmax.f32 %v1452_v53, 0.0 }
 0x1e6   :  { %v1661_v60 = vmax.f32 %v1463_v51, 0.0 }
 0x1e7   :  { %v1659_v61 = vmax.f32 %v1455_v21, 0.0 }
 0x1e8   :  { %v1715_v10 = vpack.c.bf16 %v1661_v60, %v1660_v57 }
 0x1e9   :  { %v1714_v63 = vpack.c.bf16 %v1659_v61, %v1658_v18  ;;  %v3324_v45 = vpop.f32.mrb[24].mxu1 }
 0x1ea   :  { %v1476_v2 = vadd.f32 %v3324_v45, %v4160_v6  ;;  %v1467_v48 = vpop.f32.mrb[25].mxu1 }
 0x1eb   :  { %v1468_v5 = vadd.f32 %v4160_v6, %v1467_v48  ;;  %v3325_v32 = vpop.f32.mrb[26].mxu1  ;;  %3390 = vmatprep.mubr.msk.bf16.mxu0 %vm1256_vm4, %v1714_v63 }
 0x1ec   :  { %v1479_v8 = vadd.f32 %v3325_v32, %v4160_v6  ;;  %v1470_v11 = vpop.f32.mrb[27].mxu1  ;;  %3391 = vmatmul.mubr.msk.bf16.gmra.mrb[80].mxu0 %vm1256_vm4, %v1715_v10  ;;  %v1664_v12 = vmax.f32 %v1476_v2, 0.0 }
 0x1ed   :  { %v1471_v28 = vadd.f32 %v4160_v6, %v1470_v11  ;;  %v1662_v15 = vmax.f32 %v1468_v5, 0.0 }
 0x1ee   :  { %v1665_v14 = vmax.f32 %v1479_v8, 0.0 }
 0x1ef   :  { %v1663_v16 = vmax.f32 %v1471_v28, 0.0 }
 0x1f0   :  { %v1717_v4 = vpack.c.bf16 %v1665_v14, %v1664_v12 }
 0x1f1   :  { %v1716_v17 = vpack.c.bf16 %v1663_v16, %v1662_v15  ;;  %v3328_v19 = vpop.f32.mrb[28].mxu1 }
 0x1f2   :  { %v1492_v20 = vadd.f32 %v3328_v19, %v4160_v6  ;;  %v1483_v33 = vpop.f32.mrb[29].mxu1 }
 0x1f3   :  { %v1484_v22 = vadd.f32 %v4160_v6, %v1483_v33  ;;  %v3329_v62 = vpop.f32.mrb[30].mxu1  ;;  %3394 = vmatprep.mubr.msk.bf16.mxu0 %vm1256_vm4, %v1716_v17 }
 0x1f4   :  { %v1495_v7 = vadd.f32 %v3329_v62, %v4160_v6  ;;  %v1486_v24 = vpop.f32.mrb[31].mxu1  ;;  %3395 = vmatmul.mubr.msk.bf16.gmra.mrb[84].mxu0 %vm1256_vm4, %v1717_v4  ;;  %v1668_v26 = vmax.f32 %v1492_v20, 0.0 }
 0x1f5   :  { %v1487_v25 = vadd.f32 %v4160_v6, %v1486_v24  ;;  %v1666_v29 = vmax.f32 %v1484_v22, 0.0 }
 0x1f6   :  { %v1669_v58 = vmax.f32 %v1495_v7, 0.0 }
 0x1f7   :  { %v1667_v27 = vmax.f32 %v1487_v25, 0.0 }
 0x1f8   :  { %v1719_v1 = vpack.c.bf16 %v1669_v58, %v1668_v26 }
 0x1f9   :  { %v1718_v41 = vpack.c.bf16 %v1667_v27, %v1666_v29  ;;  %v3332_v30 = vpop.f32.mrb[32].mxu1 }
 0x1fa   :  { %v1508_v31 = vadd.f32 %v3332_v30, %v4160_v6  ;;  %v1499_v34 = vpop.f32.mrb[33].mxu1 }
 0x1fb   :  { %v1500_v35 = vadd.f32 %v4160_v6, %v1499_v34  ;;  %v3333_v37 = vpop.f32.mrb[34].mxu1  ;;  %3398 = vmatprep.mubr.msk.bf16.mxu0 %vm1256_vm4, %v1718_v41 }
 0x1fc   :  { %v1511_v56 = vadd.f32 %v3333_v37, %v4160_v6  ;;  %v1502_v38 = vpop.f32.mrb[35].mxu1  ;;  %3399 = vmatmul.mubr.msk.bf16.gmra.mrb[88].mxu0 %vm1256_vm4, %v1719_v1  ;;  %v1672_v39 = vmax.f32 %v1508_v31, 0.0 }
 0x1fd   :  { %v1503_v36 = vadd.f32 %v4160_v6, %v1502_v38  ;;  %v1670_v9 = vmax.f32 %v1500_v35, 0.0 }
 0x1fe   :  { %v1673_v3 = vmax.f32 %v1511_v56, 0.0 }
 0x1ff   :  { %v1671_v40 = vmax.f32 %v1503_v36, 0.0 }
 0x200   :  { %v1721_v42 = vpack.c.bf16 %v1673_v3, %v1672_v39 }
 0x201   :  { %v1720_v59 = vpack.c.bf16 %v1671_v40, %v1670_v9  ;;  %v3336_v0 = vpop.f32.mrb[36].mxu1 }
 0x202   :  { %v1524_v23 = vadd.f32 %v3336_v0, %v4160_v6  ;;  %v1515_v44 = vpop.f32.mrb[37].mxu1 }
 0x203   :  { %v1516_v43 = vadd.f32 %v4160_v6, %v1515_v44  ;;  %v3337_v46 = vpop.f32.mrb[38].mxu1  ;;  %3402 = vmatprep.mubr.msk.bf16.mxu0 %vm1256_vm4, %v1720_v59 }
 0x204   :  { %v1527_v47 = vadd.f32 %v3337_v46, %v4160_v6  ;;  %v1518_v13 = vpop.f32.mrb[39].mxu1  ;;  %3403 = vmatmul.mubr.msk.bf16.gmra.mrb[92].mxu0 %vm1256_vm4, %v1721_v42  ;;  %v1676_v50 = vmax.f32 %v1524_v23, 0.0 }
 0x205   :  { %v1519_v49 = vadd.f32 %v4160_v6, %v1518_v13  ;;  %v1674_v53 = vmax.f32 %v1516_v43, 0.0 }
 0x206   :  { %v1677_v52 = vmax.f32 %v1527_v47, 0.0 }
 0x207   :  { %v1675_v54 = vmax.f32 %v1519_v49, 0.0 }
 0x208   :  { %v1723_v51 = vpack.c.bf16 %v1677_v52, %v1676_v50 }
 0x209   :  { %v1722_v55 = vpack.c.bf16 %v1675_v54, %v1674_v53  ;;  %v3340_v21 = vpop.f32.mrb[40].mxu1 }
 0x20a   :  { %v1540_v57 = vadd.f32 %v3340_v21, %v4160_v6  ;;  %v1531_v60 = vpop.f32.mrb[41].mxu1 }
 0x20b   :  { %v1532_v18 = vadd.f32 %v4160_v6, %v1531_v60  ;;  %v3341_v61 = vpop.f32.mrb[42].mxu1  ;;  %3406 = vmatprep.mubr.msk.bf16.mxu0 %vm1256_vm4, %v1722_v55 }
 0x20c   :  { %v1543_v10 = vadd.f32 %v3341_v61, %v4160_v6  ;;  %v1534_v63 = vpop.f32.mrb[43].mxu1  ;;  %3407 = vmatmul.mubr.msk.bf16.gmra.mrb[96].mxu0 %vm1256_vm4, %v1723_v51  ;;  %v1680_v2 = vmax.f32 %v1540_v57, 0.0 }
 0x20d   :  { %v1535_v45 = vadd.f32 %v4160_v6, %v1534_v63  ;;  %v1678_v5 = vmax.f32 %v1532_v18, 0.0 }
 0x20e   :  { %v1681_v48 = vmax.f32 %v1543_v10, 0.0 }
 0x20f   :  { %v1679_v32 = vmax.f32 %v1535_v45, 0.0 }
 0x210   :  { %v1725_v8 = vpack.c.bf16 %v1681_v48, %v1680_v2 }
 0x211   :  { %v1724_v11 = vpack.c.bf16 %v1679_v32, %v1678_v5  ;;  %v3344_v28 = vpop.f32.mrb[44].mxu1 }
 0x212   :  { %v1556_v12 = vadd.f32 %v3344_v28, %v4160_v6  ;;  %v1547_v14 = vpop.f32.mrb[45].mxu1 }
 0x213   :  { %v1548_v15 = vadd.f32 %v4160_v6, %v1547_v14  ;;  %v3345_v16 = vpop.f32.mrb[46].mxu1  ;;  %3410 = vmatprep.mubr.msk.bf16.mxu0 %vm1256_vm4, %v1724_v11 }
 0x214   :  { %v1559_v4 = vadd.f32 %v3345_v16, %v4160_v6  ;;  %v1550_v17 = vpop.f32.mrb[47].mxu1  ;;  %3411 = vmatmul.mubr.msk.bf16.gmra.mrb[100].mxu0 %vm1256_vm4, %v1725_v8  ;;  %v1684_v20 = vmax.f32 %v1556_v12, 0.0 }
 0x215   :  { %v1551_v19 = vadd.f32 %v4160_v6, %v1550_v17  ;;  %v1682_v22 = vmax.f32 %v1548_v15, 0.0 }
 0x216   :  { %v1685_v33 = vmax.f32 %v1559_v4, 0.0 }
 0x217   :  { %v1683_v62 = vmax.f32 %v1551_v19, 0.0 }
 0x218   :  { %v1727_v7 = vpack.c.bf16 %v1685_v33, %v1684_v20 }
 0x219   :  { %v1726_v24 = vpack.c.bf16 %v1683_v62, %v1682_v22  ;;  %v3348_v25 = vpop.f32.mrb[48].mxu1 }
 0x21a   :  { %v1572_v26 = vadd.f32 %v3348_v25, %v4160_v6  ;;  %v1563_v58 = vpop.f32.mrb[49].mxu1 }
 0x21b   :  { %v1564_v29 = vadd.f32 %v4160_v6, %v1563_v58  ;;  %v3349_v27 = vpop.f32.mrb[50].mxu1  ;;  %3414 = vmatprep.mubr.msk.bf16.mxu0 %vm1256_vm4, %v1726_v24 }
 0x21c   :  { %v1575_v1 = vadd.f32 %v3349_v27, %v4160_v6  ;;  %v1566_v41 = vpop.f32.mrb[51].mxu1  ;;  %3415 = vmatmul.mubr.msk.bf16.gmra.mrb[104].mxu0 %vm1256_vm4, %v1727_v7  ;;  %v1688_v31 = vmax.f32 %v1572_v26, 0.0 }
 0x21d   :  { %v1567_v30 = vadd.f32 %v4160_v6, %v1566_v41  ;;  %v1686_v35 = vmax.f32 %v1564_v29, 0.0 }
 0x21e   :  { %v1689_v34 = vmax.f32 %v1575_v1, 0.0 }
 0x21f   :  { %v1687_v37 = vmax.f32 %v1567_v30, 0.0  ;;  %v4261_v30 = vld [vmem:[%s4512_s8] ss:$0 sm:$0xff] }
 0x220   :  { %v1729_v56 = vpack.c.bf16 %v1689_v34, %v1688_v31 }
 0x221   :  { %v1728_v38 = vpack.c.bf16 %v1687_v37, %v1686_v35  ;;  %v3352_v36 = vpop.f32.mrb[52].mxu1 }
 0x222   :  { %v1588_v39 = vadd.f32 %v3352_v36, %v4160_v6  ;;  %v1579_v3 = vpop.f32.mrb[53].mxu1 }
 0x223   :  { %v1580_v9 = vadd.f32 %v4160_v6, %v1579_v3  ;;  %v3353_v40 = vpop.f32.mrb[54].mxu1  ;;  %3418 = vmatprep.mubr.msk.bf16.mxu1 %vm1256_vm4, %v1728_v38 }
 0x224   :  { %v1591_v42 = vadd.f32 %v3353_v40, %v4160_v6  ;;  %v1582_v59 = vpop.f32.mrb[55].mxu1  ;;  %3419 = vmatmul.mubr.msk.bf16.vlgmr.msra.gmra.mrb[68].mxu1 %vm1256_vm4, %v1729_v56  ;;  %v1692_v23 = vmax.f32 %v1588_v39, 0.0 }
 0x225   :  { %v1583_v0 = vadd.f32 %v4160_v6, %v1582_v59  ;;  %v1690_v43 = vmax.f32 %v1580_v9, 0.0 }
 0x226   :  { %v1693_v44 = vmax.f32 %v1591_v42, 0.0 }
 0x227   :  { %v1691_v46 = vmax.f32 %v1583_v0, 0.0 }
 0x228   :  { %v1731_v47 = vpack.c.bf16 %v1693_v44, %v1692_v23  ;;  %v3496_v23 = vld [vmem:[%s4513_s9] sm:$0xff]  }
 0x229   :  { %v1730_v13 = vpack.c.bf16 %v1691_v46, %v1690_v43  ;;  %v3356_v49 = vpop.f32.mrb[56].mxu1  ;;  %3438 = vmatprep.subr.bf16.mxu1 %v3496_v23 }
 0x22a   :  { %v1604_v50 = vadd.f32 %v3356_v49, %v4160_v6  ;;  %v1595_v52 = vpop.f32.mrb[57].mxu1  ;;  %3439 = vmatpush3.bf16.msra.mxu1 %v3496_v23 }
 0x22b   :  { %v1596_v53 = vadd.f32 %v4160_v6, %v1595_v52  ;;  %v3357_v54 = vpop.f32.mrb[58].mxu1  ;;  %3422 = vmatprep.mubr.msk.bf16.mxu1 %vm1256_vm4, %v1730_v13 }
 0x22c   :  { %v1607_v51 = vadd.f32 %v3357_v54, %v4160_v6  ;;  %v1598_v55 = vpop.f32.mrb[59].mxu1  ;;  %3423 = vmatmul.mubr.msk.bf16.gmra.mrb[72].mxu1 %vm1256_vm4, %v1731_v47  ;;  %v1696_v57 = vmax.f32 %v1604_v50, 0.0 }
 0x22d   :  { %v1599_v21 = vadd.f32 %v4160_v6, %v1598_v55  ;;  %v1694_v18 = vmax.f32 %v1596_v53, 0.0 }
 0x22e   :  { %v1697_v60 = vmax.f32 %v1607_v51, 0.0 }
 0x22f   :  { %v1695_v61 = vmax.f32 %v1599_v21, 0.0 }
 0x230   :  { %v1733_v10 = vpack.c.bf16 %v1697_v60, %v1696_v57 }
 0x231   :  { %v1732_v63 = vpack.c.bf16 %v1695_v61, %v1694_v18  ;;  %v3360_v45 = vpop.f32.mrb[60].mxu1 }
 0x232   :  { %v1620_v2 = vadd.f32 %v3360_v45, %v4160_v6  ;;  %v1611_v48 = vpop.f32.mrb[61].mxu1 }
 0x233   :  { %v1612_v5 = vadd.f32 %v4160_v6, %v1611_v48  ;;  %v3361_v32 = vpop.f32.mrb[62].mxu1  ;;  %3426 = vmatprep.mubr.msk.bf16.mxu1 %vm1256_vm4, %v1732_v63 }
 0x234   :  { %v1623_v8 = vadd.f32 %v3361_v32, %v4160_v6  ;;  %v1614_v11 = vpop.f32.mrb[63].mxu1  ;;  %3427 = vmatmul.mubr.msk.bf16.gmra.mrb[76].mxu1 %vm1256_vm4, %v1733_v10  ;;  %v1700_v12 = vmax.f32 %v1620_v2, 0.0 }
 0x235   :  { %v1615_v28 = vadd.f32 %v4160_v6, %v1614_v11  ;;  %v1698_v15 = vmax.f32 %v1612_v5, 0.0 }
 0x236   :  { %v1701_v14 = vmax.f32 %v1623_v8, 0.0 }
 0x237   :  { %v1699_v16 = vmax.f32 %v1615_v28, 0.0 }
 0x238   :  { %v1735_v4 = vpack.c.bf16 %v1701_v14, %v1700_v12 }
 0x239   :  { %v1734_v17 = vpack.c.bf16 %v1699_v16, %v1698_v15  ;;  %v3364_v19 = vpop.f32.mrb[64].mxu1 }
 0x23a   :  { %v1636_v20 = vadd.f32 %v3364_v19, %v4160_v6  ;;  %v1627_v33 = vpop.f32.mrb[65].mxu1 }
 0x23b   :  { %v1628_v22 = vadd.f32 %v4160_v6, %v1627_v33  ;;  %v3365_v62 = vpop.f32.mrb[66].mxu1  ;;  %3430 = vmatprep.mubr.msk.bf16.mxu1 %vm1256_vm4, %v1734_v17  ;;  %v3497_v17 = vld [vmem:[%s4513_s9 + $0x8] sm:$0xff]  }
 0x23c   :  { %v1639_v7 = vadd.f32 %v3365_v62, %v4160_v6  ;;  %v1630_v24 = vpop.f32.mrb[67].mxu1  ;;  %3431 = vmatmul.mubr.msk.bf16.gmra.mrb[80].mxu1 %vm1256_vm4, %v1735_v4  ;;  %v1704_v26 = vmax.f32 %v1636_v20, 0.0  ;;  %3440 = vmatprep.subr.bf16.mxu1 %v3497_v17 }
 0x23d   :  { %v1631_v25 = vadd.f32 %v4160_v6, %v1630_v24  ;;  %v1702_v29 = vmax.f32 %v1628_v22, 0.0  ;;  %3441 = vmatpush3.bf16.msra.mxu1 %v3497_v17 }
 0x23e   :  { %v1705_v58 = vmax.f32 %v1639_v7, 0.0 }
 0x23f   :  { %v1703_v27 = vmax.f32 %v1631_v25, 0.0 }
 0x240   :  { %v1737_v1 = vpack.c.bf16 %v1705_v58, %v1704_v26 }
 0x241   :  { %v1736_v41 = vpack.c.bf16 %v1703_v27, %v1702_v29 }
 0x243   :  { %3434 = vmatprep.mubr.msk.bf16.mxu1 %vm1256_vm4, %v1736_v41 }
 0x244   :  { %3435 = vmatmul.mubr.msk.bf16.gmra.mrb[84].mxu1 %vm1256_vm4, %v1737_v1 }
 0x29f   :  { %v3376_v31 = vpop.f32.mrb[64].mxu0 }
 0x2a0   :  { %v1916_v34 = vadd.f32 %v3376_v31, %v4261_v30  ;;  %v1907_v35 = vpop.f32.mrb[65].mxu0 }
 0x2a1   :  { %v1908_v6 = vadd.f32 %v4261_v30, %v1907_v35  ;;  %v3377_v37 = vpop.f32.mrb[66].mxu0 }
 0x2a2   :  { %v2164_v56 = vmax.f32 %v1916_v34, 0.0  ;;  %v1919_v38 = vadd.f32 %v3377_v37, %v4261_v30  ;;  %v1910_v36 = vpop.f32.mrb[67].mxu0 }
 0x2a3   :  { %v2162_v39 = vmax.f32 %v1908_v6, 0.0  ;;  %v1911_v3 = vadd.f32 %v4261_v30, %v1910_v36 }
 0x2a4   :  { %v2165_v9 = vmax.f32 %v1919_v38, 0.0  ;;  %v2235_v40 = vsel %vm1256_vm4, %v2164_v56, -inf }
 0x2a5   :  { %v2226_v42 = vsel %vm1256_vm4, %v2162_v39, -inf  ;;  %v2163_v59 = vmax.f32 %v1911_v3, 0.0 }
 0x2a6   :  { %v2236_v0 = vsel %vm1256_vm4, %v2165_v9, -inf  ;;  %v3498_v9 = vld [vmem:[%s4513_s9 + $0x10] sm:$0xff]  }
 0x2a7   :  { %v2237_v44 = vmax.f32 %v2235_v40, %v2236_v0  ;;  %v2227_v43 = vsel %vm1256_vm4, %v2163_v59, -inf  ;;  %v3380_v46 = vpop.f32.mrb[68].mxu0  ;;  %v3499_v40 = vld [vmem:[%s4513_s9 + $0x18] sm:$0xff]   ;;  %3442 = vmatprep.subr.bf16.mxu1 %v3498_v9 }
 0x2a8   :  { %v2228_v47 = vmax.f32 %v2226_v42, %v2227_v43  ;;  %v1932_v13 = vadd.f32 %v3380_v46, %v4261_v30  ;;  %v1923_v49 = vpop.f32.mrb[69].mxu0  ;;  %3443 = vmatpush3.bf16.msra.mxu1 %v3498_v9 }
 0x2a9   :  { %v2238_v50 = vrot.slane %v2237_v44, 4  ;;  %v1924_v52 = vadd.f32 %v4261_v30, %v1923_v49  ;;  %v3381_v53 = vpop.f32.mrb[70].mxu0  ;;  %3444 = vmatprep.subr.bf16.mxu1 %v3499_v40 }
 0x2aa   :  { %v2229_v54 = vrot.slane %v2228_v47, 4  ;;  %v2168_v51 = vmax.f32 %v1932_v13, 0.0  ;;  %v1935_v55 = vadd.f32 %v3381_v53, %v4261_v30  ;;  %v1926_v21 = vpop.f32.mrb[71].mxu0 }
 0x2ab   :  { %v2239_v57 = vmax.f32 %v2237_v44, %v2238_v50  ;;  %v2166_v60 = vmax.f32 %v1924_v52, 0.0  ;;  %v1927_v18 = vadd.f32 %v4261_v30, %v1926_v21 }
 0x2ac   :  { %v2230_v61 = vmax.f32 %v2228_v47, %v2229_v54  ;;  %v2169_v10 = vmax.f32 %v1935_v55, 0.0  ;;  %v2253_v48 = vsel %vm1256_vm4, %v2168_v51, -inf  ;;  %3445 = vmatpush3.bf16.msra.mxu1 %v3499_v40 }
 0x2ad   :  { %v2240_v63 = vrot.slane %v2239_v57, 2  ;;  %v2167_v45 = vmax.f32 %v1927_v18, 0.0  ;;  %v2244_v8 = vsel %vm1256_vm4, %v2166_v60, -inf }
 0x2ae   :  { %v2231_v2 = vrot.slane %v2230_v61, 2  ;;  %v2254_v5 = vsel %vm1256_vm4, %v2169_v10, -inf }
 0x2af   :  { %v2241_v32 = vmax.f32 %v2239_v57, %v2240_v63  ;;  %v2255_v11 = vmax.f32 %v2253_v48, %v2254_v5  ;;  %v2245_v28 = vsel %vm1256_vm4, %v2167_v45, -inf  ;;  %v3384_v12 = vpop.f32.mrb[72].mxu0  ;;  %v4306_v45 = vld [vmem:[%s4514_s11] sm:$0xff]  }
 0x2b0   :  { %v2232_v14 = vmax.f32 %v2230_v61, %v2231_v2  ;;  %v2246_v15 = vmax.f32 %v2244_v8, %v2245_v28  ;;  %v1948_v16 = vadd.f32 %v3384_v12, %v4261_v30  ;;  %v1939_v4 = vpop.f32.mrb[73].mxu0  ;;  %3450 = vmatprep.subr.bf16.mxu1 %v4306_v45 }
 0x2b1   :  { %v2242_v19 = vrot.slane %v2241_v32, 1  ;;  %v2256_v20 = vrot.slane %v2255_v11, 4  ;;  %v1940_v33 = vadd.f32 %v4261_v30, %v1939_v4  ;;  %v3385_v22 = vpop.f32.mrb[74].mxu0 }
 0x2b2   :  { %v2233_v62 = vrot.slane %v2232_v14, 1  ;;  %v2247_v7 = vrot.slane %v2246_v15, 4  ;;  %v2172_v24 = vmax.f32 %v1948_v16, 0.0  ;;  %v1951_v25 = vadd.f32 %v3385_v22, %v4261_v30  ;;  %v1942_v26 = vpop.f32.mrb[75].mxu0 }
 0x2b3   :  { %v2243_v58 = vmax.f32 %v2241_v32, %v2242_v19  ;;  %v2257_v29 = vmax.f32 %v2255_v11, %v2256_v20  ;;  %v2170_v27 = vmax.f32 %v1940_v33, 0.0  ;;  %v1943_v1 = vadd.f32 %v4261_v30, %v1942_v26 }
 0x2b4   :  { %v2234_v41 = vmax.f32 %v2232_v14, %v2233_v62  ;;  %v2248_v31 = vmax.f32 %v2246_v15, %v2247_v7  ;;  %v2173_v34 = vmax.f32 %v1951_v25, 0.0  ;;  %v2271_v37 = vsel %vm1256_vm4, %v2172_v24, -inf }
 0x2b5   :  { %v2515_v35 = vpack.c.bf16 %v2243_v58, %v2243_v58  ;;  %v2258_v6 = vrot.slane %v2257_v29, 2  ;;  %v2171_v56 = vmax.f32 %v1943_v1, 0.0  ;;  %v2262_v39 = vsel %vm1256_vm4, %v2170_v27, -inf }
 0x2b6   :  { %v2514_v38 = vpack.c.bf16 %v2234_v41, %v2234_v41  ;;  %v2249_v36 = vrot.slane %v2248_v31, 2  ;;  %v2272_v3 = vsel %vm1256_vm4, %v2173_v34, -inf }
 0x2b7   :  { %v2594_v42 = vunpack.c.l.b16 %v2515_v35  ;;  %v2259_v59 = vmax.f32 %v2257_v29, %v2258_v6  ;;  %v2273_v0 = vmax.f32 %v2271_v37, %v2272_v3  ;;  %v2263_v23 = vsel %vm1256_vm4, %v2171_v56, -inf  ;;  %v3388_v44 = vpop.f32.mrb[76].mxu0 }
 0x2b8   :  { %v2593_v43 = vunpack.c.l.b16 %v2514_v38  ;;  %v2250_v46 = vmax.f32 %v2248_v31, %v2249_v36  ;;  %v2264_v47 = vmax.f32 %v2262_v39, %v2263_v23  ;;  %v1964_v13 = vadd.f32 %v3388_v44, %v4261_v30  ;;  %v1955_v49 = vpop.f32.mrb[77].mxu0 }
 0x2b9   :  { %v2260_v50 = vrot.slane %v2259_v59, 1  ;;  %v2274_v52 = vrot.slane %v2273_v0, 4  ;;  %v1956_v53 = vadd.f32 %v4261_v30, %v1955_v49  ;;  %v3389_v54 = vpop.f32.mrb[78].mxu0 }
 0x2ba   :  { %v2626_v51 = vsel %vm2625_vm5, %v2594_v42, %v2593_v43  ;;  %v2251_v55 = vrot.slane %v2250_v46, 1  ;;  %v2265_v21 = vrot.slane %v2264_v47, 4  ;;  %v2176_v57 = vmax.f32 %v1964_v13, 0.0  ;;  %v1958_v60 = vpop.f32.mrb[79].mxu0 }
 0x2bb   :  { %v2261_v18 = vmax.f32 %v2259_v59, %v2260_v50  ;;  %v2275_v61 = vmax.f32 %v2273_v0, %v2274_v52  ;;  %v2174_v10 = vmax.f32 %v1956_v53, 0.0  ;;  %v1967_v63 = vadd.f32 %v3389_v54, %v4261_v30 }
 0x2bc   :  { %v2252_v2 = vmax.f32 %v2250_v46, %v2251_v55  ;;  %v2266_v48 = vmax.f32 %v2264_v47, %v2265_v21  ;;  %v1959_v5 = vadd.f32 %v4261_v30, %v1958_v60  ;;  %v2289_v8 = vsel %vm1256_vm4, %v2176_v57, -inf }
 0x2bd   :  { %v2276_v32 = vrot.slane %v2275_v61, 2  ;;  %v2177_v11 = vmax.f32 %v1967_v63, 0.0  ;;  %v2517_v15 = vpack.c.bf16 %v2261_v18, %v2261_v18  ;;  %v2280_v4 = vsel %vm1256_vm4, %v2174_v10, -inf }
 0x2be   :  { %v2516_v28 = vpack.c.bf16 %v2252_v2, %v2252_v2  ;;  %v2267_v12 = vrot.slane %v2266_v48, 2  ;;  %v2175_v14 = vmax.f32 %v1959_v5, 0.0 }
 0x2bf   :  { %v2277_v16 = vmax.f32 %v2275_v61, %v2276_v32  ;;  %v2290_v17 = vsel %vm1256_vm4, %v2177_v11, -inf  ;;  %v3392_v19 = vpop.f32.mrb[80].mxu0  ;;  %v2596_v9 = vunpack.c.l.b16 %v2517_v15 }
 0x2c0   :  { %v2595_v20 = vunpack.c.l.b16 %v2516_v28  ;;  %v2268_v33 = vmax.f32 %v2266_v48, %v2267_v12  ;;  %v2291_v22 = vmax.f32 %v2289_v8, %v2290_v17  ;;  %v2281_v62 = vsel %vm1256_vm4, %v2175_v14, -inf  ;;  %v1971_v7 = vpop.f32.mrb[81].mxu0 }
 0x2c1   :  { %v2278_v24 = vrot.slane %v2277_v16, 1  ;;  %v2282_v25 = vmax.f32 %v2280_v4, %v2281_v62  ;;  %v1980_v26 = vadd.f32 %v3392_v19, %v4261_v30  ;;  %v1972_v58 = vadd.f32 %v4261_v30, %v1971_v7  ;;  %v3393_v29 = vpop.f32.mrb[82].mxu0 }
 0x2c2   :  { %v2628_v27 = vsel %vm2627_vm6, %v2595_v20, %v2626_v51  ;;  %v2269_v1 = vrot.slane %v2268_v33, 1  ;;  %v2292_v41 = vrot.slane %v2291_v22, 4  ;;  %v1983_v31 = vadd.f32 %v3393_v29, %v4261_v30  ;;  %v1974_v34 = vpop.f32.mrb[83].mxu0 }
 0x2c3   :  { %v2279_v35 = vmax.f32 %v2277_v16, %v2278_v24  ;;  %v2283_v6 = vrot.slane %v2282_v25, 4  ;;  %v2180_v37 = vmax.f32 %v1980_v26, 0.0  ;;  %v2178_v56 = vmax.f32 %v1972_v58, 0.0 }
 0x2c4   :  { %v2270_v38 = vmax.f32 %v2268_v33, %v2269_v1  ;;  %v2293_v36 = vmax.f32 %v2291_v22, %v2292_v41  ;;  %v2181_v39 = vmax.f32 %v1983_v31, 0.0  ;;  %v1975_v3 = vadd.f32 %v4261_v30, %v1974_v34 }
 0x2c5   :  { %v2519_v40 = vpack.c.bf16 %v2279_v35, %v2279_v35  ;;  %v2284_v42 = vmax.f32 %v2282_v25, %v2283_v6  ;;  %v2307_v59 = vsel %vm1256_vm4, %v2180_v37, -inf  ;;  %v2298_v47 = vsel %vm1256_vm4, %v2178_v56, -inf }
 0x2c6   :  { %v2518_v0 = vpack.c.bf16 %v2270_v38, %v2270_v38  ;;  %v2294_v23 = vrot.slane %v2293_v36, 2  ;;  %v2308_v44 = vsel %vm1256_vm4, %v2181_v39, -inf  ;;  %v2179_v43 = vmax.f32 %v1975_v3, 0.0 }
 0x2c7   :  { %v2285_v46 = vrot.slane %v2284_v42, 2  ;;  %v2309_v13 = vmax.f32 %v2307_v59, %v2308_v44  ;;  %v3396_v49 = vpop.f32.mrb[84].mxu0  ;;  %v2630_v50 = vsel %vm2629_vm7, %v2596_v9, %v2628_v27  ;;  %v2598_v32 = vunpack.c.l.b16 %v2519_v40 }
 0x2c8   :  { %v2597_v52 = vunpack.c.l.b16 %v2518_v0  ;;  %v2295_v53 = vmax.f32 %v2293_v36, %v2294_v23  ;;  %v2299_v54 = vsel %vm1256_vm4, %v2179_v43, -inf  ;;  %v1996_v51 = vadd.f32 %v3396_v49, %v4261_v30  ;;  %v1987_v55 = vpop.f32.mrb[85].mxu0 }
 0x2c9   :  { %v2286_v21 = vmax.f32 %v2284_v42, %v2285_v46  ;;  %v2310_v57 = vrot.slane %v2309_v13, 4  ;;  %v2300_v60 = vmax.f32 %v2298_v47, %v2299_v54  ;;  %v1988_v18 = vadd.f32 %v4261_v30, %v1987_v55  ;;  %v3397_v61 = vpop.f32.mrb[86].mxu0 }
 0x2ca   :  { %v2296_v10 = vrot.slane %v2295_v53, 1  ;;  %v2184_v63 = vmax.f32 %v1996_v51, 0.0  ;;  %v1999_v2 = vadd.f32 %v3397_v61, %v4261_v30  ;;  %v1990_v48 = vpop.f32.mrb[87].mxu0  ;;  %v2632_v5 = vsel %vm2631_vm8, %v2597_v52, %v2630_v50 }
 0x2cb   :  { %v2287_v8 = vrot.slane %v2286_v21, 1  ;;  %v2311_v11 = vmax.f32 %v2309_v13, %v2310_v57  ;;  %v2301_v28 = vrot.slane %v2300_v60, 4  ;;  %v2182_v14 = vmax.f32 %v1988_v18, 0.0 }
 0x2cc   :  { %v2297_v12 = vmax.f32 %v2295_v53, %v2296_v10  ;;  %v2185_v15 = vmax.f32 %v1999_v2, 0.0  ;;  %v1991_v16 = vadd.f32 %v4261_v30, %v1990_v48  ;;  %v2325_v20 = vsel %vm1256_vm4, %v2184_v63, -inf }
 0x2cd   :  { %v2288_v4 = vmax.f32 %v2286_v21, %v2287_v8  ;;  %v2312_v17 = vrot.slane %v2311_v11, 2  ;;  %v2302_v19 = vmax.f32 %v2300_v60, %v2301_v28  ;;  %v2634_v7 = vsel %vm2633_vm9, %v2598_v32, %v2632_v5 }
 0x2ce   :  { %v2521_v33 = vpack.c.bf16 %v2297_v12, %v2297_v12  ;;  %v2326_v22 = vsel %vm1256_vm4, %v2185_v15, -inf  ;;  %v2183_v62 = vmax.f32 %v1991_v16, 0.0  ;;  %v2316_v1 = vsel %vm1256_vm4, %v2182_v14, -inf }
 0x2cf   :  { %v2520_v24 = vpack.c.bf16 %v2288_v4, %v2288_v4  ;;  %v2313_v25 = vmax.f32 %v2311_v11, %v2312_v17  ;;  %v2303_v26 = vrot.slane %v2302_v19, 2  ;;  %v2327_v58 = vmax.f32 %v2325_v20, %v2326_v22  ;;  %v3400_v29 = vpop.f32.mrb[88].mxu0 }
 0x2d0   :  { %v2600_v27 = vunpack.c.l.b16 %v2521_v33  ;;  %v2317_v41 = vsel %vm1256_vm4, %v2183_v62, -inf  ;;  %v2012_v31 = vadd.f32 %v3400_v29, %v4261_v30  ;;  %v2003_v34 = vpop.f32.mrb[89].mxu0 }
 0x2d1   :  { %v2599_v35 = vunpack.c.l.b16 %v2520_v24  ;;  %v2314_v6 = vrot.slane %v2313_v25, 1  ;;  %v2304_v37 = vmax.f32 %v2302_v19, %v2303_v26  ;;  %v2328_v56 = vrot.slane %v2327_v58, 4  ;;  %v3401_v38 = vpop.f32.mrb[90].mxu0 }
 0x2d2   :  { %v2318_v36 = vmax.f32 %v2316_v1, %v2317_v41  ;;  %v2188_v39 = vmax.f32 %v2012_v31, 0.0  ;;  %v2004_v3 = vadd.f32 %v4261_v30, %v2003_v34  ;;  %v2015_v9 = vadd.f32 %v3401_v38, %v4261_v30  ;;  %v2006_v40 = vpop.f32.mrb[91].mxu0 }
 0x2d3   :  { %v2315_v42 = vmax.f32 %v2313_v25, %v2314_v6  ;;  %v2305_v59 = vrot.slane %v2304_v37, 1  ;;  %v2329_v0 = vmax.f32 %v2327_v58, %v2328_v56  ;;  %v2007_v23 = vadd.f32 %v4261_v30, %v2006_v40 }
 0x2d4   :  { %v2319_v44 = vrot.slane %v2318_v36, 4  ;;  %v2343_v43 = vsel %vm1256_vm4, %v2188_v39, -inf  ;;  %v2186_v46 = vmax.f32 %v2004_v3, 0.0  ;;  %v2189_v47 = vmax.f32 %v2015_v9, 0.0 }
 0x2d5   :  { %v2523_v13 = vpack.c.bf16 %v2315_v42, %v2315_v42  ;;  %v2306_v49 = vmax.f32 %v2304_v37, %v2305_v59  ;;  %v2330_v50 = vrot.slane %v2329_v0, 2  ;;  %v2187_v52 = vmax.f32 %v2007_v23, 0.0 }
 0x2d6   :  { %v2320_v53 = vmax.f32 %v2318_v36, %v2319_v44  ;;  %v2334_v54 = vsel %vm1256_vm4, %v2186_v46, -inf  ;;  %v2344_v51 = vsel %vm1256_vm4, %v2189_v47, -inf  ;;  %v2636_v55 = vsel %vm2635_vm10, %v2599_v35, %v2634_v7 }
 0x2d7   :  { %v2602_v21 = vunpack.c.l.b16 %v2523_v13  ;;  %v2522_v57 = vpack.c.bf16 %v2306_v49, %v2306_v49  ;;  %v2331_v60 = vmax.f32 %v2329_v0, %v2330_v50  ;;  %v2345_v18 = vmax.f32 %v2343_v43, %v2344_v51  ;;  %v3404_v61 = vpop.f32.mrb[92].mxu0 }
 0x2d8   :  { %v2321_v10 = vrot.slane %v2320_v53, 2  ;;  %v2335_v63 = vsel %vm1256_vm4, %v2187_v52, -inf  ;;  %v2028_v2 = vadd.f32 %v3404_v61, %v4261_v30  ;;  %v2019_v48 = vpop.f32.mrb[93].mxu0  ;;  %v4345_v5 = vsel %vm2637_vm11, %v2600_v27, %v2636_v55 }
 0x2d9   :  { %v2601_v32 = vunpack.c.l.b16 %v2522_v57  ;;  %v2332_v8 = vrot.slane %v2331_v60, 1  ;;  %v2346_v11 = vrot.slane %v2345_v18, 4  ;;  %v2336_v28 = vmax.f32 %v2334_v54, %v2335_v63  ;;  %v3405_v12 = vpop.f32.mrb[94].mxu0 }
 0x2da   :  { %v2322_v14 = vmax.f32 %v2320_v53, %v2321_v10  ;;  %v2192_v15 = vmax.f32 %v2028_v2, 0.0  ;;  %v2020_v16 = vadd.f32 %v4261_v30, %v2019_v48  ;;  %v2031_v4 = vadd.f32 %v3405_v12, %v4261_v30  ;;  %v2022_v17 = vpop.f32.mrb[95].mxu0 }
 0x2db   :  { %v2639_v19 = vsel %vm2625_vm5, %v2602_v21, %v2601_v32  ;;  %v2333_v20 = vmax.f32 %v2331_v60, %v2332_v8  ;;  %v2347_v33 = vmax.f32 %v2345_v18, %v2346_v11  ;;  %v2337_v22 = vrot.slane %v2336_v28, 4 }
 0x2dc   :  { %v2323_v62 = vrot.slane %v2322_v14, 1  ;;  %v2190_v7 = vmax.f32 %v2020_v16, 0.0  ;;  %v2193_v24 = vmax.f32 %v2031_v4, 0.0  ;;  %v2023_v58 = vadd.f32 %v4261_v30, %v2022_v17 }
 0x2dd   :  { %v2348_v25 = vrot.slane %v2347_v33, 2  ;;  %v2338_v26 = vmax.f32 %v2336_v28, %v2337_v22  ;;  %v2361_v27 = vsel %vm1256_vm4, %v2192_v15, -inf  ;;  %v2525_v41 = vpack.c.bf16 %v2333_v20, %v2333_v20 }
 0x2de   :  { %v2324_v29 = vmax.f32 %v2322_v14, %v2323_v62  ;;  %v2362_v1 = vsel %vm1256_vm4, %v2193_v24, -inf  ;;  %v2352_v56 = vsel %vm1256_vm4, %v2190_v7, -inf  ;;  %v2191_v38 = vmax.f32 %v2023_v58, 0.0 }
 0x2df   :  { %v2349_v31 = vmax.f32 %v2347_v33, %v2348_v25  ;;  %v2339_v34 = vrot.slane %v2338_v26, 2  ;;  %v2363_v35 = vmax.f32 %v2361_v27, %v2362_v1  ;;  %v3408_v6 = vpop.f32.mrb[96].mxu0  ;;  %v2604_v52 = vunpack.c.l.b16 %v2525_v41 }
 0x2e0   :  { %v2524_v37 = vpack.c.bf16 %v2324_v29, %v2324_v29  ;;  %v2044_v36 = vadd.f32 %v3408_v6, %v4261_v30  ;;  %v2035_v39 = vpop.f32.mrb[97].mxu0  ;;  %v2353_v23 = vsel %vm1256_vm4, %v2191_v38, -inf }
 0x2e1   :  { %v2350_v3 = vrot.slane %v2349_v31, 1  ;;  %v2340_v9 = vmax.f32 %v2338_v26, %v2339_v34  ;;  %v2364_v40 = vrot.slane %v2363_v35, 4  ;;  %v2036_v42 = vadd.f32 %v4261_v30, %v2035_v39  ;;  %v3409_v59 = vpop.f32.mrb[98].mxu0 }
 0x2e2   :  { %v2603_v0 = vunpack.c.l.b16 %v2524_v37  ;;  %v2196_v44 = vmax.f32 %v2044_v36, 0.0  ;;  %v2047_v43 = vadd.f32 %v3409_v59, %v4261_v30  ;;  %v2038_v46 = vpop.f32.mrb[99].mxu0  ;;  %v2354_v50 = vmax.f32 %v2352_v56, %v2353_v23 }
 0x2e3   :  { %v2351_v47 = vmax.f32 %v2349_v31, %v2350_v3  ;;  %v2341_v13 = vrot.slane %v2340_v9, 1  ;;  %v2365_v49 = vmax.f32 %v2363_v35, %v2364_v40  ;;  %v2194_v54 = vmax.f32 %v2036_v42, 0.0 }
 0x2e4   :  { %v2640_v53 = vsel %vm2627_vm6, %v2603_v0, %v2639_v19  ;;  %v2197_v51 = vmax.f32 %v2047_v43, 0.0  ;;  %v2355_v60 = vrot.slane %v2354_v50, 4  ;;  %v2379_v18 = vsel %vm1256_vm4, %v2196_v44, -inf }
 0x2e5   :  { %v2527_v55 = vpack.c.bf16 %v2351_v47, %v2351_v47  ;;  %v2342_v21 = vmax.f32 %v2340_v9, %v2341_v13  ;;  %v2366_v57 = vrot.slane %v2365_v49, 2  ;;  %v2039_v10 = vadd.f32 %v4261_v30, %v2038_v46 }
 0x2e6   :  { %v2380_v61 = vsel %vm1256_vm4, %v2197_v51, -inf  ;;  %v2641_v63 = vsel %vm2629_vm7, %v2604_v52, %v2640_v53  ;;  %v2356_v32 = vmax.f32 %v2354_v50, %v2355_v60  ;;  %v2370_v8 = vsel %vm1256_vm4, %v2194_v54, -inf }
 0x2e7   :  { %v2526_v2 = vpack.c.bf16 %v2342_v21, %v2342_v21  ;;  %v2367_v48 = vmax.f32 %v2365_v49, %v2366_v57  ;;  %v3412_v11 = vpop.f32.mrb[100].mxu0  ;;  %v2606_v28 = vunpack.c.l.b16 %v2527_v55  ;;  %v2381_v12 = vmax.f32 %v2379_v18, %v2380_v61 }
 0x2e8   :  { %v2195_v14 = vmax.f32 %v2039_v10, 0.0  ;;  %v2060_v15 = vadd.f32 %v3412_v11, %v4261_v30  ;;  %v2051_v16 = vpop.f32.mrb[101].mxu0  ;;  %v2357_v19 = vrot.slane %v2356_v32, 2 }
 0x2e9   :  { %v2605_v4 = vunpack.c.l.b16 %v2526_v2  ;;  %v2368_v17 = vrot.slane %v2367_v48, 1  ;;  %v2052_v20 = vadd.f32 %v4261_v30, %v2051_v16  ;;  %v3413_v33 = vpop.f32.mrb[102].mxu0  ;;  %v2382_v22 = vrot.slane %v2381_v12, 4 }
 0x2ea   :  { %v2371_v62 = vsel %vm1256_vm4, %v2195_v14, -inf  ;;  %v2200_v7 = vmax.f32 %v2060_v15, 0.0  ;;  %v2063_v24 = vadd.f32 %v3413_v33, %v4261_v30  ;;  %v2054_v25 = vpop.f32.mrb[103].mxu0  ;;  %v2358_v58 = vmax.f32 %v2356_v32, %v2357_v19 }
 0x2eb   :  { %v2369_v26 = vmax.f32 %v2367_v48, %v2368_v17  ;;  %v2372_v29 = vmax.f32 %v2370_v8, %v2371_v62  ;;  %v2198_v27 = vmax.f32 %v2052_v20, 0.0  ;;  %v2383_v1 = vmax.f32 %v2381_v12, %v2382_v22 }
 0x2ec   :  { %v2397_v41 = vsel %vm1256_vm4, %v2200_v7, -inf  ;;  %v2201_v31 = vmax.f32 %v2063_v24, 0.0  ;;  %v2055_v34 = vadd.f32 %v4261_v30, %v2054_v25  ;;  %v2359_v6 = vrot.slane %v2358_v58, 1 }
 0x2ed   :  { %v2529_v35 = vpack.c.bf16 %v2369_v26, %v2369_v26  ;;  %v2373_v37 = vrot.slane %v2372_v29, 4  ;;  %v2388_v56 = vsel %vm1256_vm4, %v2198_v27, -inf  ;;  %v2384_v38 = vrot.slane %v2383_v1, 2 }
 0x2ee   :  { %v2398_v36 = vsel %vm1256_vm4, %v2201_v31, -inf  ;;  %v2199_v39 = vmax.f32 %v2055_v34, 0.0  ;;  %v2642_v3 = vsel %vm2631_vm8, %v2605_v4, %v2641_v63  ;;  %v2360_v40 = vmax.f32 %v2358_v58, %v2359_v6 }
 0x2ef   :  { %v2608_v9 = vunpack.c.l.b16 %v2529_v35  ;;  %v2374_v42 = vmax.f32 %v2372_v29, %v2373_v37  ;;  %v2399_v59 = vmax.f32 %v2397_v41, %v2398_v36  ;;  %v3416_v0 = vpop.f32.mrb[104].mxu0  ;;  %v2385_v23 = vmax.f32 %v2383_v1, %v2384_v38 }
 0x2f0   :  { %v2389_v44 = vsel %vm1256_vm4, %v2199_v39, -inf  ;;  %v2076_v43 = vadd.f32 %v3416_v0, %v4261_v30  ;;  %v2067_v46 = vpop.f32.mrb[105].mxu0  ;;  %v2643_v47 = vsel %vm2633_vm9, %v2606_v28, %v2642_v3  ;;  %v2528_v13 = vpack.c.bf16 %v2360_v40, %v2360_v40 }
 0x2f1   :  { %v2375_v49 = vrot.slane %v2374_v42, 2  ;;  %v2400_v50 = vrot.slane %v2399_v59, 4  ;;  %v2390_v52 = vmax.f32 %v2388_v56, %v2389_v44  ;;  %v3417_v53 = vpop.f32.mrb[106].mxu0  ;;  %v2386_v54 = vrot.slane %v2385_v23, 1 }
 0x2f2   :  { %v2204_v51 = vmax.f32 %v2076_v43, 0.0  ;;  %v2068_v55 = vadd.f32 %v4261_v30, %v2067_v46  ;;  %v2079_v21 = vadd.f32 %v3417_v53, %v4261_v30  ;;  %v2070_v57 = vpop.f32.mrb[107].mxu0  ;;  %v2607_v60 = vunpack.c.l.b16 %v2528_v13 }
 0x2f3   :  { %v2376_v18 = vmax.f32 %v2374_v42, %v2375_v49  ;;  %v2401_v61 = vmax.f32 %v2399_v59, %v2400_v50  ;;  %v2391_v10 = vrot.slane %v2390_v52, 4  ;;  %v2387_v63 = vmax.f32 %v2385_v23, %v2386_v54 }
 0x2f4   :  { %v2415_v2 = vsel %vm1256_vm4, %v2204_v51, -inf  ;;  %v2202_v48 = vmax.f32 %v2068_v55, 0.0  ;;  %v2205_v32 = vmax.f32 %v2079_v21, 0.0  ;;  %v2071_v12 = vadd.f32 %v4261_v30, %v2070_v57 }
 0x2f5   :  { %v2377_v8 = vrot.slane %v2376_v18, 1  ;;  %v2402_v11 = vrot.slane %v2401_v61, 2  ;;  %v2392_v28 = vmax.f32 %v2390_v52, %v2391_v10  ;;  %v2531_v14 = vpack.c.bf16 %v2387_v63, %v2387_v63 }
 0x2f6   :  { %v2406_v15 = vsel %vm1256_vm4, %v2202_v48, -inf  ;;  %v2416_v16 = vsel %vm1256_vm4, %v2205_v32, -inf  ;;  %v2644_v4 = vsel %vm2635_vm10, %v2607_v60, %v2643_v47  ;;  %v2203_v7 = vmax.f32 %v2071_v12, 0.0 }
 0x2f7   :  { %v2378_v17 = vmax.f32 %v2376_v18, %v2377_v8  ;;  %v2403_v19 = vmax.f32 %v2401_v61, %v2402_v11  ;;  %v2393_v20 = vrot.slane %v2392_v28, 2  ;;  %v2417_v33 = vmax.f32 %v2415_v2, %v2416_v16  ;;  %v3420_v22 = vpop.f32.mrb[68].mxu1 }
 0x2f8   :  { %v2610_v62 = vunpack.c.l.b16 %v2531_v14  ;;  %v2645_v24 = vsel %vm2637_vm11, %v2608_v9, %v2644_v4  ;;  %v2092_v25 = vadd.f32 %v3420_v22, %v4261_v30  ;;  %v2083_v26 = vpop.f32.mrb[69].mxu1  ;;  %v2407_v31 = vsel %vm1256_vm4, %v2203_v7, -inf }
 0x2f9   :  { %v2530_v58 = vpack.c.bf16 %v2378_v17, %v2378_v17  ;;  %v2404_v29 = vrot.slane %v2403_v19, 1  ;;  %v2394_v27 = vmax.f32 %v2392_v28, %v2393_v20  ;;  %v2418_v1 = vrot.slane %v2417_v33, 4  ;;  %v3421_v41 = vpop.f32.mrb[70].mxu1 }
 0x2fa   :  { %v2660_v34 = vpack.c.b16 %v2645_v24, %v4345_v5  ;;  %v2208_v35 = vmax.f32 %v2092_v25, 0.0  ;;  %v2084_v6 = vadd.f32 %v4261_v30, %v2083_v26  ;;  %v2086_v37 = vpop.f32.mrb[71].mxu1  ;;  %v2408_v3 = vmax.f32 %v2406_v15, %v2407_v31 }
 0x2fb   :  { %v2609_v56 = vunpack.c.l.b16 %v2530_v58  ;;  %v2405_v38 = vmax.f32 %v2403_v19, %v2404_v29  ;;  %v2395_v36 = vrot.slane %v2394_v27, 1  ;;  %v2419_v39 = vmax.f32 %v2417_v33, %v2418_v1 }
 0x2fc   :  { %3446 = vmatprep.mubr.msk.bf16.mxu1 %vm1256_vm4, %v2660_v34  ;;  %v2206_v9 = vmax.f32 %v2084_v6, 0.0  ;;  %v2095_v40 = vadd.f32 %v3421_v41, %v4261_v30  ;;  %v2409_v5 = vrot.slane %v2408_v3, 4  ;;  %v2433_v44 = vsel %vm1256_vm4, %v2208_v35, -inf }
 0x2fd   :  { %v2646_v42 = vsel %vm2625_vm5, %v2610_v62, %v2609_v56  ;;  %v2533_v59 = vpack.c.bf16 %v2405_v38, %v2405_v38  ;;  %v2396_v0 = vmax.f32 %v2394_v27, %v2395_v36  ;;  %v2420_v23 = vrot.slane %v2419_v39, 2 }
 0x2fe   :  { %v2209_v43 = vmax.f32 %v2095_v40, 0.0  ;;  %v2087_v46 = vadd.f32 %v4261_v30, %v2086_v37  ;;  %v2424_v50 = vsel %vm1256_vm4, %v2206_v9, -inf  ;;  %v2410_v53 = vmax.f32 %v2408_v3, %v2409_v5 }
 0x2ff   :  { %v2612_v47 = vunpack.c.l.b16 %v2533_v59  ;;  %v2532_v13 = vpack.c.bf16 %v2396_v0, %v2396_v0  ;;  %v2421_v49 = vmax.f32 %v2419_v39, %v2420_v23  ;;  %v3424_v52 = vpop.f32.mrb[72].mxu1 }
 0x300   :  { %v2434_v54 = vsel %vm1256_vm4, %v2209_v43, -inf  ;;  %v2207_v51 = vmax.f32 %v2087_v46, 0.0  ;;  %v2108_v55 = vadd.f32 %v3424_v52, %v4261_v30  ;;  %v2099_v21 = vpop.f32.mrb[73].mxu1  ;;  %v2411_v63 = vrot.slane %v2410_v53, 2 }
 0x301   :  { %v2611_v57 = vunpack.c.l.b16 %v2532_v13  ;;  %v2422_v60 = vrot.slane %v2421_v49, 1  ;;  %v2435_v18 = vmax.f32 %v2433_v44, %v2434_v54  ;;  %v2100_v61 = vadd.f32 %v4261_v30, %v2099_v21  ;;  %v3425_v10 = vpop.f32.mrb[74].mxu1 }
 0x302   :  { %v2425_v2 = vsel %vm1256_vm4, %v2207_v51, -inf  ;;  %v2212_v48 = vmax.f32 %v2108_v55, 0.0  ;;  %v2111_v32 = vadd.f32 %v3425_v10, %v4261_v30  ;;  %v2102_v8 = vpop.f32.mrb[75].mxu1  ;;  %v2412_v15 = vmax.f32 %v2410_v53, %v2411_v63 }
 0x303   :  { %v2647_v11 = vsel %vm2627_vm6, %v2611_v57, %v2646_v42  ;;  %v2423_v28 = vmax.f32 %v2421_v49, %v2422_v60  ;;  %v2436_v12 = vrot.slane %v2435_v18, 4  ;;  %v2426_v14 = vmax.f32 %v2424_v50, %v2425_v2 }
 0x304   :  { %v2648_v16 = vsel %vm2629_vm7, %v2612_v47, %v2647_v11  ;;  %v2210_v19 = vmax.f32 %v2100_v61, 0.0  ;;  %v2213_v20 = vmax.f32 %v2111_v32, 0.0  ;;  %v2413_v33 = vrot.slane %v2412_v15, 1 }
 0x305   :  { %v2437_v4 = vmax.f32 %v2435_v18, %v2436_v12  ;;  %v2427_v17 = vrot.slane %v2426_v14, 4  ;;  %v2451_v22 = vsel %vm1256_vm4, %v2212_v48, -inf  ;;  %v2103_v62 = vadd.f32 %v4261_v30, %v2102_v8 }
 0x306   :  { %v2535_v7 = vpack.c.bf16 %v2423_v28, %v2423_v28  ;;  %v2452_v26 = vsel %vm1256_vm4, %v2213_v20, -inf  ;;  %v2414_v29 = vmax.f32 %v2412_v15, %v2413_v33  ;;  %v2442_v6 = vsel %vm1256_vm4, %v2210_v19, -inf }
 0x307   :  { %v2438_v24 = vrot.slane %v2437_v4, 2  ;;  %v2428_v25 = vmax.f32 %v2426_v14, %v2427_v17  ;;  %v3428_v58 = vpop.f32.mrb[76].mxu1  ;;  %v2453_v27 = vmax.f32 %v2451_v22, %v2452_v26  ;;  %v2211_v1 = vmax.f32 %v2103_v62, 0.0 }
 0x308   :  { %v2124_v41 = vadd.f32 %v3428_v58, %v4261_v30  ;;  %v2115_v31 = vpop.f32.mrb[77].mxu1  ;;  %v2534_v38 = vpack.c.bf16 %v2414_v29, %v2414_v29  ;;  %v2614_v40 = vunpack.c.l.b16 %v2535_v7 }
 0x309   :  { %v2439_v34 = vmax.f32 %v2437_v4, %v2438_v24  ;;  %v2429_v35 = vrot.slane %v2428_v25, 2  ;;  %v2116_v37 = vadd.f32 %v4261_v30, %v2115_v31  ;;  %v3429_v56 = vpop.f32.mrb[78].mxu1  ;;  %v2454_v36 = vrot.slane %v2453_v27, 4 }
 0x30a   :  { %v2443_v39 = vsel %vm1256_vm4, %v2211_v1, -inf  ;;  %v2216_v3 = vmax.f32 %v2124_v41, 0.0  ;;  %v2118_v9 = vpop.f32.mrb[79].mxu1  ;;  %v2613_v23 = vunpack.c.l.b16 %v2534_v38  ;;  %v2127_v43 = vadd.f32 %v3429_v56, %v4261_v30 }
 0x30b   :  { %v2440_v42 = vrot.slane %v2439_v34, 1  ;;  %v2430_v59 = vmax.f32 %v2428_v25, %v2429_v35  ;;  %v2444_v0 = vmax.f32 %v2442_v6, %v2443_v39  ;;  %v2455_v5 = vmax.f32 %v2453_v27, %v2454_v36 }
 0x30c   :  { %v2214_v44 = vmax.f32 %v2116_v37, 0.0  ;;  %v2469_v49 = vsel %vm1256_vm4, %v2216_v3, -inf  ;;  %v2649_v50 = vsel %vm2631_vm8, %v2613_v23, %v2648_v16  ;;  %v2217_v53 = vmax.f32 %v2127_v43, 0.0 }
 0x30d   :  { %v2441_v46 = vmax.f32 %v2439_v34, %v2440_v42  ;;  %v2431_v47 = vrot.slane %v2430_v59, 1  ;;  %v2445_v13 = vrot.slane %v2444_v0, 4  ;;  %v2456_v52 = vrot.slane %v2455_v5, 2 }
 0x30e   :  { %v2119_v54 = vadd.f32 %v4261_v30, %v2118_v9  ;;  %v2650_v21 = vsel %vm2633_vm9, %v2614_v40, %v2649_v50  ;;  %v2470_v61 = vsel %vm1256_vm4, %v2217_v53, -inf  ;;  %v2460_v12 = vsel %vm1256_vm4, %v2214_v44, -inf }
 0x30f   :  { %v2537_v51 = vpack.c.bf16 %v2441_v46, %v2441_v46  ;;  %v2432_v55 = vmax.f32 %v2430_v59, %v2431_v47  ;;  %v2446_v57 = vmax.f32 %v2444_v0, %v2445_v13  ;;  %v3432_v60 = vpop.f32.mrb[80].mxu1  ;;  %v2457_v18 = vmax.f32 %v2455_v5, %v2456_v52 }
 0x310   :  { %v2215_v10 = vmax.f32 %v2119_v54, 0.0  ;;  %v2140_v63 = vadd.f32 %v3432_v60, %v4261_v30  ;;  %v2131_v2 = vpop.f32.mrb[81].mxu1  ;;  %v2471_v8 = vmax.f32 %v2469_v49, %v2470_v61  ;;  %v3508_v30 = vld [vmem:[%s4512_s8] ss:$0 sm:$0xff] }
 0x311   :  { %v2536_v48 = vpack.c.bf16 %v2432_v55, %v2432_v55  ;;  %v2447_v32 = vrot.slane %v2446_v57, 2  ;;  %v3433_v11 = vpop.f32.mrb[82].mxu1  ;;  %v2458_v28 = vrot.slane %v2457_v18, 1  ;;  %v2616_v33 = vunpack.c.l.b16 %v2537_v51 }
 0x312   :  { %v2461_v14 = vsel %vm1256_vm4, %v2215_v10, -inf  ;;  %v2220_v15 = vmax.f32 %v2140_v63, 0.0  ;;  %v2134_v16 = vpop.f32.mrb[83].mxu1  ;;  %v2472_v19 = vrot.slane %v2471_v8, 4  ;;  %v2132_v62 = vadd.f32 %v3508_v30, %v2131_v2 }
 0x313   :  { %v2615_v4 = vunpack.c.l.b16 %v2536_v48  ;;  %v2448_v17 = vmax.f32 %v2446_v57, %v2447_v32  ;;  %v2462_v20 = vmax.f32 %v2460_v12, %v2461_v14  ;;  %v2459_v22 = vmax.f32 %v2457_v18, %v2458_v28 }
 0x314   :  { %v2143_v7 = vadd.f32 %v3508_v30, %v3433_v11  ;;  %v2473_v26 = vmax.f32 %v2471_v8, %v2472_v19  ;;  %v2487_v1 = vsel %vm1256_vm4, %v2220_v15, -inf  ;;  %v2135_v6 = vadd.f32 %v3508_v30, %v2134_v16 }
 0x315   :  { %v2651_v24 = vsel %vm2635_vm10, %v2615_v4, %v2650_v21  ;;  %v2449_v25 = vrot.slane %v2448_v17, 1  ;;  %v2463_v58 = vrot.slane %v2462_v20, 4  ;;  %v2539_v27 = vpack.c.bf16 %v2459_v22, %v2459_v22 }
 0x316   :  { %v4422_v29 = vsel %vm2637_vm11, %v2616_v33, %v2651_v24  ;;  %v2221_v41 = vmax.f32 %v2143_v7, 0.0  ;;  %v2474_v34 = vrot.slane %v2473_v26, 2  ;;  %v2218_v38 = vmax.f32 %v2132_v62, 0.0 }
 0x317   :  { %v2450_v31 = vmax.f32 %v2448_v17, %v2449_v25  ;;  %v2464_v35 = vmax.f32 %v2462_v20, %v2463_v58  ;;  %v3436_v37 = vpop.f32.mrb[84].mxu1  ;;  %v2618_v56 = vunpack.c.l.b16 %v2539_v27  ;;  %v2219_v23 = vmax.f32 %v2135_v6, 0.0 }
 0x318   :  { %v2488_v36 = vsel %vm1256_vm4, %v2221_v41, -inf  ;;  %v2156_v39 = vadd.f32 %v3508_v30, %v3436_v37  ;;  %v2147_v3 = vpop.f32.mrb[85].mxu1  ;;  %v2475_v40 = vmax.f32 %v2473_v26, %v2474_v34  ;;  %v2478_v52 = vsel %vm1256_vm4, %v2218_v38, -inf }
 0x319   :  { %v2538_v9 = vpack.c.bf16 %v2450_v31, %v2450_v31  ;;  %v2465_v42 = vrot.slane %v2464_v35, 2  ;;  %v2489_v59 = vmax.f32 %v2487_v1, %v2488_v36  ;;  %v3437_v0 = vpop.f32.mrb[86].mxu1  ;;  %v2148_v44 = vadd.f32 %v3508_v30, %v2147_v3 }
 0x31a   :  { %v2224_v5 = vmax.f32 %v2156_v39, 0.0  ;;  %v2159_v43 = vadd.f32 %v3508_v30, %v3437_v0  ;;  %v2150_v46 = vpop.f32.mrb[87].mxu1  ;;  %v2476_v13 = vrot.slane %v2475_v40, 1  ;;  %v2479_v53 = vsel %vm1256_vm4, %v2219_v23, -inf }
 0x31b   :  { %v2617_v47 = vunpack.c.l.b16 %v2538_v9  ;;  %v2466_v49 = vmax.f32 %v2464_v35, %v2465_v42  ;;  %v2490_v50 = vrot.slane %v2489_v59, 4  ;;  %v2480_v18 = vmax.f32 %v2478_v52, %v2479_v53 }
 0x31c   :  { %v2505_v54 = vsel %vm1256_vm4, %v2224_v5, -inf  ;;  %v2225_v51 = vmax.f32 %v2159_v43, 0.0  ;;  %v2477_v21 = vmax.f32 %v2475_v40, %v2476_v13  ;;  %v2222_v61 = vmax.f32 %v2148_v44, 0.0  ;;  %v3501_v13 = vld [vmem:[%s4514_s11 + $0x8] sm:$0xff]  }
 0x31d   :  { %v2653_v55 = vsel %vm2625_vm5, %v2618_v56, %v2617_v47  ;;  %v2467_v57 = vrot.slane %v2466_v49, 1  ;;  %v2491_v60 = vmax.f32 %v2489_v59, %v2490_v50  ;;  %v2151_v63 = vadd.f32 %v3508_v30, %v2150_v46  ;;  %v3503_v50 = vld [vmem:[%s4514_s11 + $0x18] sm:$0xff]  }
 0x31e   :  { %v2506_v10 = vsel %vm1256_vm4, %v2225_v51, -inf  ;;  %v2541_v8 = vpack.c.bf16 %v2477_v21, %v2477_v21  ;;  %v2481_v11 = vrot.slane %v2480_v18, 4  ;;  %v2496_v4 = vsel %vm1256_vm4, %v2222_v61, -inf }
 0x31f   :  { %v2468_v2 = vmax.f32 %v2466_v49, %v2467_v57  ;;  %v2492_v48 = vrot.slane %v2491_v60, 2  ;;  %v2507_v32 = vmax.f32 %v2505_v54, %v2506_v10  ;;  %v2223_v28 = vmax.f32 %v2151_v63, 0.0  ;;  %v3502_v49 = vld [vmem:[%s4514_s11 + $0x10] sm:$0xff]  }
 0x320   :  { %v2482_v16 = vmax.f32 %v2480_v18, %v2481_v11  ;;  %v2620_v62 = vunpack.c.l.b16 %v2541_v8  ;;  %v3506_v8 = vld [vmem:[%s4515_s13 + $0x10] sm:$0xff]   ;;  %v3507_v11 = vld [vmem:[%s4515_s13 + $0x18] sm:$0xff]  }
 0x321   :  { %v2540_v12 = vpack.c.bf16 %v2468_v2, %v2468_v2  ;;  %v2493_v14 = vmax.f32 %v2491_v60, %v2492_v48  ;;  %v2508_v15 = vrot.slane %v2507_v32, 4  ;;  %v2497_v17 = vsel %vm1256_vm4, %v2223_v28, -inf  ;;  %v3076_v28 = vld [vmem:[%s4517_s12] ss:$0 sm:$0xff] }
 0x322   :  { %v2498_v22 = vmax.f32 %v2496_v4, %v2497_v17  ;;  %v2483_v30 = vrot.slane %v2482_v16, 2 }
 0x323   :  { %v2619_v19 = vunpack.c.l.b16 %v2540_v12  ;;  %v2494_v20 = vrot.slane %v2493_v14, 1  ;;  %v2509_v33 = vmax.f32 %v2507_v32, %v2508_v15  ;;  %v3505_v32 = vld [vmem:[%s4515_s13 + $0x8] sm:$0xff]  }
 0x324   :  { %v2499_v25 = vrot.slane %v2498_v22, 4  ;;  %v2484_v26 = vmax.f32 %v2482_v16, %v2483_v30 }
 0x325   :  { %v2654_v7 = vsel %vm2627_vm6, %v2619_v19, %v2653_v55  ;;  %v2510_v24 = vrot.slane %v2509_v33, 2  ;;  %v2495_v27 = vmax.f32 %v2493_v14, %v2494_v20 }
 0x326   :  { %v2655_v58 = vsel %vm2629_vm7, %v2620_v62, %v2654_v7  ;;  %v2500_v41 = vmax.f32 %v2498_v22, %v2499_v25  ;;  %v2485_v31 = vrot.slane %v2484_v26, 1  ;;  %v3083_v25 = vld [vmem:[%s4518_s14] ss:$0 sm:$0xff] }
 0x327   :  { %v2511_v1 = vmax.f32 %v2509_v33, %v2510_v24  ;;  %v2543_v37 = vpack.c.bf16 %v2495_v27, %v2495_v27 }
 0x328   :  { %v2501_v35 = vrot.slane %v2500_v41, 2  ;;  %v2486_v6 = vmax.f32 %v2484_v26, %v2485_v31  ;;  %v3510_v31 = vld [vmem:[%s4506_s1] sm:$0xff] }
 0x329   :  { %v2512_v34 = vrot.slane %v2511_v1, 1  ;;  %v2622_v9 = vunpack.c.l.b16 %v2543_v37  ;;  %v3511_v37 = vld [vmem:[%s4506_s1 + $0x18] sm:$0xff] }
 0x32a   :  { %v2502_v56 = vmax.f32 %v2500_v41, %v2501_v35  ;;  %v2542_v38 = vpack.c.bf16 %v2486_v6, %v2486_v6 }
 0x32b   :  { %v2513_v36 = vmax.f32 %v2511_v1, %v2512_v34  ;;  %v2941_v34 = vsel %vm564_vm2, %v3510_v31, 0.0 }
 0x32c   :  { %v2503_v39 = vrot.slane %v2502_v56, 1  ;;  %v2621_v3 = vunpack.c.l.b16 %v2542_v38 }
 0x32d   :  { %v2545_v59 = vpack.c.bf16 %v2513_v36, %v2513_v36 }
 0x32e   :  { %v2504_v40 = vmax.f32 %v2502_v56, %v2503_v39  ;;  %v2656_v42 = vsel %vm2631_vm8, %v2621_v3, %v2655_v58  ;;  %v3509_v58 = vld [vmem:[%s4506_s1 + $0x10] sm:$0xff]  ;;  %v2944_v56 = vsel %vm564_vm2, %v3511_v37, 0.0  ;;  %v3512_v3 = vld [vmem:[%s4506_s1 + $0x8] sm:$0xff] }
 0x32f   :  { %v2657_v23 = vsel %vm2633_vm9, %v2622_v9, %v2656_v42  ;;  %v2624_v44 = vunpack.c.l.b16 %v2545_v59  ;;  %v2943_v27 = vsel %vm564_vm2, %v3509_v58, 0.0  ;;  %v2942_v9 = vsel %vm564_vm2, %v3512_v3, 0.0 }
 0x330   :  { %v2544_v0 = vpack.c.bf16 %v2504_v40, %v2504_v40 }
 0x332   :  { %v2623_v5 = vunpack.c.l.b16 %v2544_v0 }
 0x334   :  { %v2658_v43 = vsel %vm2635_vm10, %v2623_v5, %v2657_v23 }
 0x335   :  { %v2659_v46 = vsel %vm2637_vm11, %v2624_v44, %v2658_v43 }
 0x336   :  { %v2661_v47 = vpack.c.b16 %v2659_v46, %v4422_v29  ;;  %v3504_v29 = vld [vmem:[%s4515_s13] sm:$0xff]  }
 0x338   :  { %3447 = vmatmul.mubr.msk.bf16.vlgmr.msra.gmra.mrb[88].mxu1 %vm1256_vm4, %v2661_v47 }
 0x339   :  { %3451 = vmatpush3.bf16.msra.mxu1 %v4306_v45  ;;  %v3069_v45 = vld [vmem:[%s4516_s10] ss:$0 sm:$0xff] }
 0x33a   :  { %3452 = vmatprep.subr.bf16.mxu1 %v3501_v13 }
 0x33d   :  { %3453 = vmatpush3.bf16.msra.mxu1 %v3501_v13 }
 0x33e   :  { %3454 = vmatprep.subr.bf16.mxu1 %v3502_v49 }
 0x341   :  { %3455 = vmatpush3.bf16.msra.mxu1 %v3502_v49 }
 0x342   :  { %3456 = vmatprep.subr.bf16.mxu1 %v3503_v50 }
 0x345   :  { %3457 = vmatpush3.bf16.msra.mxu1 %v3503_v50 }
 0x346   :  { %3462 = vmatprep.subr.bf16.mxu1 %v3504_v29 }
 0x40b   :  { %v3448_v52 = vpop.f32.mrb[88].mxu1 }
 0x40c   :  { %v2735_v53 = vadd.f32 %v3448_v52, %v3069_v45  ;;  %v2726_v54 = vpop.f32.mrb[89].mxu1 }
 0x40d   :  { %v2727_v51 = vadd.f32 %v3069_v45, %v2726_v54  ;;  %v3449_v55 = vpop.f32.mrb[90].mxu1 }
 0x40e   :  { %v2738_v21 = vadd.f32 %v3449_v55, %v3069_v45  ;;  %v2729_v57 = vpop.f32.mrb[91].mxu1  ;;  %v2743_v18 = vmax.f32 %v2735_v53, 0.0 }
 0x40f   :  { %v2730_v60 = vadd.f32 %v3069_v45, %v2729_v57  ;;  %v2741_v10 = vmax.f32 %v2727_v51, 0.0 }
 0x410   :  { %v2744_v61 = vmax.f32 %v2738_v21, 0.0 }
 0x411   :  { %v2742_v63 = vmax.f32 %v2730_v60, 0.0 }
 0x412   :  { %v2746_v2 = vpack.c.bf16 %v2744_v61, %v2743_v18 }
 0x413   :  { %v2745_v48 = vpack.c.bf16 %v2742_v63, %v2741_v10 }
 0x415   :  { %3458 = vmatprep.mubr.msk.bf16.mxu1 %vm1256_vm4, %v2745_v48 }
 0x416   :  { %3459 = vmatmul.mubr.msk.bf16.vlgmr.msra.gmra.mrb[92].mxu1 %vm1256_vm4, %v2746_v2 }
 0x417   :  { %3463 = vmatpush3.bf16.msra.mxu1 %v3504_v29 }
 0x418   :  { %3464 = vmatprep.subr.bf16.mxu1 %v3505_v32 }
 0x41b   :  { %3465 = vmatpush3.bf16.msra.mxu1 %v3505_v32 }
 0x41c   :  { %3466 = vmatprep.subr.bf16.mxu1 %v3506_v8 }
 0x41f   :  { %3467 = vmatpush3.bf16.msra.mxu1 %v3506_v8 }
 0x420   :  { %3468 = vmatprep.subr.bf16.mxu1 %v3507_v11 }
 0x423   :  { %3469 = vmatpush3.bf16.msra.mxu1 %v3507_v11 }
 0x4e9   :  { %v3460_v12 = vpop.f32.mrb[92].mxu1 }
 0x4ea   :  { %v2835_v14 = vadd.f32 %v3460_v12, %v3076_v28  ;;  %v2826_v15 = vpop.f32.mrb[93].mxu1 }
 0x4eb   :  { %v2827_v16 = vadd.f32 %v3076_v28, %v2826_v15  ;;  %v3461_v4 = vpop.f32.mrb[94].mxu1 }
 0x4ec   :  { %v2838_v17 = vadd.f32 %v3461_v4, %v3076_v28  ;;  %v2829_v19 = vpop.f32.mrb[95].mxu1  ;;  %v2843_v33 = vmax.f32 %v2835_v14, 0.0 }
 0x4ed   :  { %v2830_v20 = vadd.f32 %v3076_v28, %v2829_v19  ;;  %v2841_v62 = vmax.f32 %v2827_v16, 0.0 }
 0x4ee   :  { %v2844_v22 = vmax.f32 %v2838_v17, 0.0 }
 0x4ef   :  { %v2842_v30 = vmax.f32 %v2830_v20, 0.0 }
 0x4f0   :  { %v2846_v7 = vpack.c.bf16 %v2844_v22, %v2843_v33 }
 0x4f1   :  { %v2845_v24 = vpack.c.bf16 %v2842_v30, %v2841_v62 }
 0x4f3   :  { %3470 = vmatprep.mubr.msk.bf16.mxu1 %vm1256_vm4, %v2845_v24 }
 0x4f4   :  { %3471 = vmatmul.mubr.msk.bf16.vlgmr.msra.gmra.mrb[96].mxu1 %vm1256_vm4, %v2846_v7 }
 0x5c7   :  { %v3472_v26 = vpop.f32.mrb[96].mxu1 }
 0x5c8   :  { %v2935_v1 = vadd.f32 %v3472_v26, %v3083_v25  ;;  %v2926_v41 = vpop.f32.mrb[97].mxu1 }
 0x5c9   :  { %v2927_v35 = vadd.f32 %v3083_v25, %v2926_v41  ;;  %v3473_v6 = vpop.f32.mrb[98].mxu1 }
 0x5ca   :  { %v2947_v38 = vadd.f32 %v2943_v27, %v2935_v1  ;;  %v2938_v36 = vadd.f32 %v3473_v6, %v3083_v25  ;;  %v2929_v39 = vpop.f32.mrb[99].mxu1 }
 0x5cb   :  { %v2945_v40 = vadd.f32 %v2941_v34, %v2927_v35  ;;  %v2930_v42 = vadd.f32 %v3083_v25, %v2929_v39 }
 0x5cc   :  { %2951 = vst [vmem:[%s4519_s15 + $0x10] sm:$0xff] %v2947_v38  ;;  %v2948_v59 = vadd.f32 %v2944_v56, %v2938_v36 }
 0x5cd   :  { %2949 = vst [vmem:[%s4519_s15] sm:$0xff] %v2945_v40  ;;  %v2946_v0 = vadd.f32 %v2942_v9, %v2930_v42 }
 0x5ce   :  { %2952 = vst [vmem:[%s4519_s15 + $0x18] sm:$0xff] %v2948_v59 }
 0x5cf   :  { %2950 = vst [vmem:[%s4519_s15 + $0x8] sm:$0xff] %v2946_v0 }

</bundles_post_ra>
